<compile_context>
chip_gen: v5e
topology: v5e:2x2
jax: 0.10.0
libtpu: 0.0.40
codegen_flags: <defaults>
</compile_context>

<pallas_src>
import functools

import jax
import jax.numpy as jnp
from jax.experimental import pallas as pl
from jax.experimental.pallas import tpu as pltpu


_LANE = 128
_SUBLANE = 8
_VMEM_BUDGET = 36 * 1024 * 1024       # target double-buffered working set
_VMEM_LIMIT_MIN = 16 * 1024 * 1024
_VMEM_LIMIT_MAX = 48 * 1024 * 1024    # v7x-safe per review; plenty of slack on v5e/v6e


def _round_up(x, m):
    return ((x + m - 1) // m) * m


def _tile_bytes(rows, cols, itemsize=4):
    """VMEM footprint of an f32 (rows, cols) tile after (8, 128) layout padding."""
    return _round_up(rows, _SUBLANE) * _round_up(cols, _LANE) * itemsize


def _plan_tiles(B, P, C, hidden, embed):
    """Pick a batch tile (divisor of B) and a VMEM limit from a footprint model."""
    per_batch = (_tile_bytes(P, C)        # raw-view slab   (tb, P, C)
                 + _tile_bytes(C, P)      # NCHW slab       (tb, C, P) (lane-padded P)
                 + _tile_bytes(P, hidden)  # spatial output (tb, P, hidden)
                 + _tile_bytes(1, embed))  # global output  (1, tb, embed) (approx)
    fixed = (_tile_bytes(C, hidden) + _tile_bytes(1, hidden)
             + _tile_bytes(C, embed) + _tile_bytes(1, embed))
    tb = 1
    for d in range(1, B + 1):
        if B % d:
            continue
        if d > 1 and 2 * d > B:
            continue                      # keep grid >= 2 whenever B >= 2
        if 2 * (d * per_batch + fixed) <= _VMEM_BUDGET:
            tb = d                        # largest divisor within budget wins
    est = 2 * (tb * per_batch + fixed)
    vmem_limit = int(min(_VMEM_LIMIT_MAX,
                         max(_VMEM_LIMIT_MIN, est + est // 4 + (2 << 20))))
    return tb, vmem_limit


# ----------------------------------------------------------------------------
# Fused kernel: one grid step = tb whole batches -> spatial head + global head
# ----------------------------------------------------------------------------
def _encoder_heads_kernel(raw_ref, nchw_ref, ws_ref, bs_ref, wg_ref, bg_ref,
                          sp_ref, gl_ref, *, inv_p):
    tb, p, c = raw_ref.shape

    # Spatial head: relu(enc_image @ Ws.T + bs) on the raw-view rows (MXU).
    x = jnp.reshape(raw_ref[...], (tb * p, c))            # leading-dim collapse (cheap)
    sp = jnp.dot(x, ws_ref[...], preferred_element_type=jnp.float32)
    sp = jnp.maximum(sp + bs_ref[...], 0.0)
    sp_ref[...] = jnp.reshape(sp, sp_ref.shape).astype(sp_ref.dtype)

    # Global head: per-channel mean over pixels (VPU/XLU reduce, co-issues with
    # the MXU work above), then the tiny projection + relu, finished in-tile.
    g = jnp.sum(nchw_ref[...], axis=-1) * inv_p           # (tb, C)
    gl = jnp.dot(g, wg_ref[...], preferred_element_type=jnp.float32)
    gl = jnp.maximum(gl + bg_ref[...], 0.0)                # (tb, E)
    gl_ref[...] = gl[None].astype(gl_ref.dtype)            # (1, tb, E)


def _encoder_heads(enc_raw, x_nchw, ws_t, bs_row, wg_t, bg_row, *, tb, vmem_limit):
    B, P, C = enc_raw.shape
    hidden = ws_t.shape[1]
    embed = wg_t.shape[1]
    nb = B // tb
    kernel = functools.partial(_encoder_heads_kernel, inv_p=1.0 / P)
    spatial, glob = pl.pallas_call(
        kernel,
        out_shape=(jax.ShapeDtypeStruct((B, P, hidden), jnp.float32),
                   jax.ShapeDtypeStruct((nb, tb, embed), jnp.float32)),
        grid_spec=pltpu.PrefetchScalarGridSpec(
            num_scalar_prefetch=0,
            grid=(nb,),
            in_specs=[
                pl.BlockSpec((tb, P, C), lambda i: (i, 0, 0)),   # raw .view() rows
                pl.BlockSpec((tb, C, P), lambda i: (i, 0, 0)),   # NCHW slab
                pl.BlockSpec((C, hidden), lambda i: (0, 0)),
                pl.BlockSpec((1, hidden), lambda i: (0, 0)),
                pl.BlockSpec((C, embed), lambda i: (0, 0)),
                pl.BlockSpec((1, embed), lambda i: (0, 0)),
            ],
            out_specs=[
                pl.BlockSpec((tb, P, hidden), lambda i: (i, 0, 0)),
                pl.BlockSpec((1, tb, embed), lambda i: (i, 0, 0)),
            ],
        ),
        compiler_params=pltpu.CompilerParams(
            dimension_semantics=("parallel",),
            vmem_limit_bytes=vmem_limit,
        ),
    )(enc_raw, x_nchw, ws_t, bs_row, wg_t, bg_row)
    return spatial, jnp.reshape(glob, (B, embed))


# ----------------------------------------------------------------------------
# Encoder forward (head only; the resnet backbone output is the input)
# ----------------------------------------------------------------------------
@jax.jit
def encoder_forward(encoded_image, ws, bs, wg, bg):
    """encoded_image: (B, C, H, W) float32 -- output of the resnet backbone."""
    B, C, Hs, Ws_ = encoded_image.shape
    P = Hs * Ws_
    hidden = ws.shape[0]
    embed = wg.shape[0]

    x = encoded_image.astype(jnp.float32)
    # Both torch .view()s are raw memory reshapes -> free XLA bitcasts of the
    # same HBM buffer; the kernel streams both views through one pipeline.
    enc_image = jnp.reshape(x, (B, P, C))
    x_nchw = jnp.reshape(x, (B, C, P))

    ws_t = ws.T.astype(jnp.float32)
    wg_t = wg.T.astype(jnp.float32)
    bs_row = bs.reshape(1, -1).astype(jnp.float32)
    bg_row = bg.reshape(1, -1).astype(jnp.float32)

    tb, vmem_limit = _plan_tiles(B, P, C, hidden, embed)
    spatial_image, global_image = _encoder_heads(
        enc_image, x_nchw, ws_t, bs_row, wg_t, bg_row, tb=tb, vmem_limit=vmem_limit)
    return spatial_image, global_image, enc_image


def kaiming_uniform(key, shape):
    # torch.nn.init.kaiming_uniform_ default: a=0, fan_in, leaky_relu gain=sqrt(2)
    fan_in = shape[1]
    bound = jnp.sqrt(6.0 / fan_in)
    return jax.random.uniform(key, shape, jnp.float32, -bound, bound)


def _reference(encoded_image, ws, bs, wg, bg):
    B, C, H, W = encoded_image.shape
    P = H * W
    enc_ref = jnp.reshape(encoded_image, (B, P, C))
    spatial_ref = jax.nn.relu(enc_ref @ ws.T + bs)
    global_f = jnp.mean(jnp.reshape(encoded_image, (B, C, P)), axis=2)
    global_ref = jax.nn.relu(global_f @ wg.T + bg)
    return spatial_ref, global_ref, enc_ref


def _check(x, ws, bs, wg, bg, hidden, embed):
    sp, gl, enc = jax.block_until_ready(encoder_forward(x, ws, bs, wg, bg))
    sp_r, gl_r, enc_r = _reference(x, ws, bs, wg, bg)
    B, C, H, W = x.shape
    assert sp.shape == (B, H * W, hidden)
    assert gl.shape == (B, embed)
    assert enc.shape == (B, H * W, C)
    assert jnp.allclose(sp, sp_r, atol=1e-3, rtol=1e-3)
    assert jnp.allclose(gl, gl_r, atol=1e-3, rtol=1e-3)
    assert jnp.array_equal(enc, enc_r)


if __name__ == "__main__":
    # C = 2048 is hard-coded by nn.Linear(2048, ...); small batch / spatial extent.
    hidden_size, embed_size = 32, 32
    key = jax.random.PRNGKey(0)
    k1, k2, k3, k_ws, k_wg = jax.random.split(key, 5)

    ws = kaiming_uniform(k_ws, (hidden_size, 2048))   # spatial_features.weight
    bs = jnp.zeros((hidden_size,), jnp.float32)       # spatial_features.bias
    wg = kaiming_uniform(k_wg, (embed_size, 2048))    # global_features.weight
    bg = jnp.zeros((embed_size,), jnp.float32)        # global_features.bias

    # Case 1: P = 4*4 = 16 (divides C), B = 2 -> tb = 1, grid = 2.
    x1 = jax.random.normal(k1, (2, 2048, 4, 4), jnp.float32)
    _check(x1, ws, bs, wg, bg, hidden_size, embed_size)

    # Case 2: P = 3*3 = 9 (does not divide C), B = 2.
    x2 = jax.random.normal(k2, (2, 2048, 3, 3), jnp.float32)
    _check(x2, ws, bs, wg, bg, hidden_size, embed_size)

    # Case 3: production spatial extent P = 7*7 = 49, B = 4 -> tb = 2, grid = 2.
    x3 = jax.random.normal(k3, (4, 2048, 7, 7), jnp.float32)
    _check(x3, ws, bs, wg, bg, hidden_size, embed_size)

    print("KERNEL_OK")
</pallas_src>

<mosaic_0001>
module attributes {stable_mosaic.version = 11 : i64} {
  func.func @_encoder_heads_kernel(%arg0: i32, %arg1: memref<1x16x2048xf32, #tpu.memory_space<vmem>>, %arg2: memref<1x2048x16xf32, #tpu.memory_space<vmem>>, %arg3: memref<2048x32xf32, #tpu.memory_space<vmem>>, %arg4: memref<1x32xf32, #tpu.memory_space<vmem>>, %arg5: memref<2048x32xf32, #tpu.memory_space<vmem>>, %arg6: memref<1x32xf32, #tpu.memory_space<vmem>>, %arg7: memref<1x16x32xf32, #tpu.memory_space<vmem>>, %arg8: memref<1x1x32xf32, #tpu.memory_space<vmem>>) attributes {dimension_semantics = [#tpu.dimension_semantics<parallel>], iteration_bounds = array<i64: 2>, scalar_prefetch = 0 : i64, scratch_operands = 0 : i64, tpu.core_type = #tpu.core_type<tc>, window_params = [{transform_indices = @transform_0, window_bounds = array<i64: 1, 16, 2048>}, {transform_indices = @transform_1, window_bounds = array<i64: 1, 2048, 16>}, {pipeline_mode = #tpu.pipeline_mode<synchronous>, transform_indices = @transform_2, window_bounds = array<i64: 2048, 32>}, {pipeline_mode = #tpu.pipeline_mode<synchronous>, transform_indices = @transform_3, window_bounds = array<i64: 1, 32>}, {pipeline_mode = #tpu.pipeline_mode<synchronous>, transform_indices = @transform_4, window_bounds = array<i64: 2048, 32>}, {pipeline_mode = #tpu.pipeline_mode<synchronous>, transform_indices = @transform_5, window_bounds = array<i64: 1, 32>}, {transform_indices = @transform_6, window_bounds = array<i64: 1, 16, 32>}, {transform_indices = @transform_7, window_bounds = array<i64: 1, 1, 32>}]} {
    %c0 = arith.constant 0 : index
    %c0_0 = arith.constant 0 : index
    %c0_1 = arith.constant 0 : index
    %0 = vector.load %arg1[%c0, %c0_0, %c0_1] : memref<1x16x2048xf32, #tpu.memory_space<vmem>>, vector<1x16x2048xf32>
    %1 = vector.shape_cast %0 : vector<1x16x2048xf32> to vector<16x2048xf32>
    %c0_2 = arith.constant 0 : index
    %c0_3 = arith.constant 0 : index
    %2 = vector.load %arg3[%c0_2, %c0_3] : memref<2048x32xf32, #tpu.memory_space<vmem>>, vector<2048x32xf32>
    %cst = arith.constant dense<0.000000e+00> : vector<16x32xf32>
    %3 = tpu.matmul %1, %2, %cst {dimension_numbers = #tpu.dot_dimension_numbers<[1], [0], [0], [1], [0, 0, 1, 1], [], []>} : vector<16x2048xf32>, vector<2048x32xf32>, vector<16x32xf32> -> vector<16x32xf32>
    %c0_4 = arith.constant 0 : index
    %c0_5 = arith.constant 0 : index
    %4 = vector.load %arg4[%c0_4, %c0_5] : memref<1x32xf32, #tpu.memory_space<vmem>>, vector<1x32xf32>
    %5 = vector.broadcast %4 : vector<1x32xf32> to vector<16x32xf32>
    %6 = arith.addf %3, %5 : vector<16x32xf32>
    %cst_6 = arith.constant 0.000000e+00 : f32
    %7 = vector.broadcast %cst_6 : f32 to vector<16x32xf32>
    %8 = arith.maximumf %6, %7 : vector<16x32xf32>
    %9 = vector.shape_cast %8 : vector<16x32xf32> to vector<1x16x32xf32>
    %c0_7 = arith.constant 0 : index
    %c0_8 = arith.constant 0 : index
    %c0_9 = arith.constant 0 : index
    %10 = vector.load %arg7[%c0_7, %c0_8, %c0_9] : memref<1x16x32xf32, #tpu.memory_space<vmem>>, vector<1x16x32xf32>
    tpu.vector_store %arg7[%c0_7, %c0_8, %c0_9], %9 {strides = array<i32>} : memref<1x16x32xf32, #tpu.memory_space<vmem>>, vector<1x16x32xf32>,
    %c0_10 = arith.constant 0 : index
    %c0_11 = arith.constant 0 : index
    %c0_12 = arith.constant 0 : index
    %11 = vector.load %arg2[%c0_10, %c0_11, %c0_12] : memref<1x2048x16xf32, #tpu.memory_space<vmem>>, vector<1x2048x16xf32>
    %cst_13 = arith.constant dense<0.000000e+00> : vector<1x2048xf32>
    %12 = vector.multi_reduction <add>, %11, %cst_13 [2] : vector<1x2048x16xf32> to vector<1x2048xf32>
    %cst_14 = arith.constant 6.250000e-02 : f32
    %13 = vector.broadcast %cst_14 : f32 to vector<1x2048xf32>
    %14 = arith.mulf %12, %13 : vector<1x2048xf32>
    %c0_15 = arith.constant 0 : index
    %c0_16 = arith.constant 0 : index
    %15 = vector.load %arg5[%c0_15, %c0_16] : memref<2048x32xf32, #tpu.memory_space<vmem>>, vector<2048x32xf32>
    %cst_17 = arith.constant dense<0.000000e+00> : vector<1x32xf32>
    %16 = tpu.matmul %14, %15, %cst_17 {dimension_numbers = #tpu.dot_dimension_numbers<[1], [0], [0], [1], [0, 0, 1, 1], [], []>} : vector<1x2048xf32>, vector<2048x32xf32>, vector<1x32xf32> -> vector<1x32xf32>
    %c0_18 = arith.constant 0 : index
    %c0_19 = arith.constant 0 : index
    %17 = vector.load %arg6[%c0_18, %c0_19] : memref<1x32xf32, #tpu.memory_space<vmem>>, vector<1x32xf32>
    %18 = arith.addf %16, %17 : vector<1x32xf32>
    %cst_20 = arith.constant 0.000000e+00 : f32
    %19 = vector.broadcast %cst_20 : f32 to vector<1x32xf32>
    %20 = arith.maximumf %18, %19 : vector<1x32xf32>
    %21 = vector.shape_cast %20 : vector<1x32xf32> to vector<1x1x32xf32>
    %c0_21 = arith.constant 0 : index
    %c0_22 = arith.constant 0 : index
    %c0_23 = arith.constant 0 : index
    %22 = vector.load %arg8[%c0_21, %c0_22, %c0_23] : memref<1x1x32xf32, #tpu.memory_space<vmem>>, vector<1x1x32xf32>
    tpu.vector_store %arg8[%c0_21, %c0_22, %c0_23], %21 {strides = array<i32>} : memref<1x1x32xf32, #tpu.memory_space<vmem>>, vector<1x1x32xf32>,
    return
  }
  func.func @transform_0(%arg0: i32) -> (i32, i32, i32) {
    %c0_i32 = arith.constant 0 : i32
    %c0_i32_0 = arith.constant 0 : i32
    %c0_i32_1 = arith.constant 0 : i32
    return %arg0, %c0_i32, %c0_i32_0 : i32, i32, i32
  }
  func.func @transform_1(%arg0: i32) -> (i32, i32, i32) {
    %c0_i32 = arith.constant 0 : i32
    %c0_i32_0 = arith.constant 0 : i32
    %c0_i32_1 = arith.constant 0 : i32
    return %arg0, %c0_i32, %c0_i32_0 : i32, i32, i32
  }
  func.func @transform_2(%arg0: i32) -> (i32, i32) {
    %c0_i32 = arith.constant 0 : i32
    %c0_i32_0 = arith.constant 0 : i32
    %c0_i32_1 = arith.constant 0 : i32
    return %c0_i32, %c0_i32_0 : i32, i32
  }
  func.func @transform_3(%arg0: i32) -> (i32, i32) {
    %c0_i32 = arith.constant 0 : i32
    %c0_i32_0 = arith.constant 0 : i32
    %c0_i32_1 = arith.constant 0 : i32
    return %c0_i32, %c0_i32_0 : i32, i32
  }
  func.func @transform_4(%arg0: i32) -> (i32, i32) {
    %c0_i32 = arith.constant 0 : i32
    %c0_i32_0 = arith.constant 0 : i32
    %c0_i32_1 = arith.constant 0 : i32
    return %c0_i32, %c0_i32_0 : i32, i32
  }
  func.func @transform_5(%arg0: i32) -> (i32, i32) {
    %c0_i32 = arith.constant 0 : i32
    %c0_i32_0 = arith.constant 0 : i32
    %c0_i32_1 = arith.constant 0 : i32
    return %c0_i32, %c0_i32_0 : i32, i32
  }
  func.func @transform_6(%arg0: i32) -> (i32, i32, i32) {
    %c0_i32 = arith.constant 0 : i32
    %c0_i32_0 = arith.constant 0 : i32
    %c0_i32_1 = arith.constant 0 : i32
    return %arg0, %c0_i32, %c0_i32_0 : i32, i32, i32
  }
  func.func @transform_7(%arg0: i32) -> (i32, i32, i32) {
    %c0_i32 = arith.constant 0 : i32
    %c0_i32_0 = arith.constant 0 : i32
    %c0_i32_1 = arith.constant 0 : i32
    return %arg0, %c0_i32, %c0_i32_0 : i32, i32, i32
  }
}

</mosaic_0001>

<bundles_post_ra>
// kernel: encoder_forward.1
= control target key start
LH: loop header
LB: loop body
LE: loop exit
PB: predicated region body
PF: predicated region fallthrough
CT: control target
= control target key end

     0   :  { %s6785_s0 = inlined_call_operand.vmem [shape: f32[2,16,2048], index: 0, kind: input, shape index: {}]   ;;  %s6786_s1 = inlined_call_operand.vmem [shape: f32[2,2048,16], index: 1, kind: input, shape index: {}]   ;;  %s6787_s2 = inlined_call_operand.vmem [shape: f32[2048,32], index: 2, kind: input, shape index: {}]   ;;  %s6788_s3 = inlined_call_operand.vmem [shape: f32[1,32], index: 3, kind: input, shape index: {}]   ;;  %s6789_s4 = inlined_call_operand.vmem [shape: f32[2048,32], index: 4, kind: input, shape index: {}]   ;;  %s6790_s5 = inlined_call_operand.vmem [shape: f32[1,32], index: 5, kind: input, shape index: {}]   ;;  %s6791_s6 = inlined_call_operand.hbm [shape: f32[2,16,32], index: 6, kind: output, shape index: {0}]   ;;  %s6792_s7 = inlined_call_operand.hbm [shape: f32[2,1,32], index: 7, kind: output, shape index: {1}]  }
   0x1   :  { %6794 = sst [smem:[#allocation8_spill]] %s6785_s0 }
   0x2   :  { %13 = vsyncpa [#allocation3], 0 }
   0x3   :  { %15 = vsyncpa [#allocation3 + $0x1], 0 }
   0x4   :  { %16 = vsyncpa [#allocation5], 0 }
   0x5   :  { %18 = vsyncpa [#allocation5 + $0x1], 0  ;;  %s3970_s24 = smov 0   ;;  %s3972_s25 = smov 0  }
   0x6   :  { %s3974_s26 = smov 0   ;;  %s3976_s27 = smov 0  }
   0x7 LB: > { %s3991_s28 = sadd.s32 4294967295, %s3926_s27   ;;  %s3768_s29 = sadd.s32 4294967294, %s3926_s27   ;;  %s3926_s27 = sphi %s3976_s27, %s6804_s27   ;;  %s3922_s26 = sphi %s3974_s26, %s6803_s26   ;;  %s3918_s25 = sphi %s3972_s25, %s6802_s25   ;;  %s3914_s24 = sphi %s3970_s24, %s6801_s24  }
   0x8   : > { %s3995_s30 = sadd.s32 1, %s3926_s27   ;;  %s167_s8 = sadd.s32 1, %s3922_s26 }
   0x9   : > { %s164_s9 = ssub.s32 %s3926_s27, %s3995_s30  ;;  %p177_p0 = scmp.ne.s32.totalorder %s3922_s26, %s3918_s25 }
   0xa   : > { %p165_p1 = scmp.eq.s32.totalorder %s164_s9, 0  ;;  %p178_p2 = scmp.eq.s32.totalorder %s3991_s28, 1 }
   0xb   : > { %p183_p3 = scmp.ne.s32.totalorder %s3918_s25, %s3914_s24  ;;  %p184_p4 = scmp.eq.s32.totalorder %s3768_s29, 1 }
   0xc   : > { %s4006_s10 = scalar_select %p165_p1, %s3922_s26, %s167_s8  }
   0xd   : > { %p4008_p5 = por %p178_p2, %p177_p0  ;;  %p4012_p6 = por %p184_p4, %p183_p3 }
   0xe   : > { %p3771_p7 = scmp.ge.s32.totalorder %s3926_s27, 1  ;;  %p256_p8 = scmp.lt.s32.totalorder %s3926_s27, 3 }
  0x10   : > { %p257_p9 = pnand %p3771_p7, %p256_p8 }
  0x11   : > { %p297_p10 = scmp.lt.s32.totalorder (!%p257_p9), %s3991_s28, 1  ;;  %s6797_s0 = sld [smem:[#allocation8_spill]] (!%p257_p9) }
  0x12   : > { %260 = sbr.rel (%p257_p9) target bundleno = 971 (0x3cb), region = 44  ;;  %s5716_s15 = sand.u32 (!%p257_p9), 1, %s3918_s25  }
  0x13   : > { %s3772_s18 = sshll.u32 (!%p257_p9), %s5716_s15, 4  ;;  %s3784_s22 = sshll.u32 (!%p257_p9), %s3991_s28, 4 }
  0x14   : > { %s3634_s13 = scalar_lea.sflag (!%p257_p9), [#allocation3], %s5716_s15 }
  0x17   : > { %v354_v0 = vld [vmem:[%s6787_s2 + $0x78] sm:$0xff]  ;;  %v353_v1 = vld [vmem:[%s6787_s2 + $0x70] sm:$0xff]  ;;  %s4026_s17 = scalar_select %p297_p10, %s3991_s28, 1  ;;  %v352_v2 = vld [vmem:[%s6787_s2 + $0x68] sm:$0xff]  ;;  %vm1228_vm0 = vcmask 130048   ;;  %vm2771_vm1 = vcmask 130112  }
  0x18   : > { %599 = vmatpush.msra.mxu0 %v354_v0  ;;  %v351_v3 = vld [vmem:[%s6787_s2 + $0x60] sm:$0xff]  ;;  %v350_v4 = vld [vmem:[%s6787_s2 + $0x58] sm:$0xff]  ;;  %v349_v11 = vld [vmem:[%s6787_s2 + $0x50] sm:$0xff]  ;;  %vm2775_vm2 = vcmask 195712   ;;  %vm6793_vm3 = vcmask 261312   ;;  %vm2783_vm4 = vcmask 326912  }
  0x19   : > { %s3783_s20 = sshll.u32 %s4026_s17, 11  ;;  %v348_v14 = vld [vmem:[%s6787_s2 + $0x48] sm:$0xff]  ;;  %v347_v16 = vld [vmem:[%s6787_s2 + $0x40] sm:$0xff]  ;;  %v346_v20 = vld [vmem:[%s6787_s2 + $0x38] sm:$0xff]  ;;  %s3782_s23 = sshll.u32 %s4026_s17, 8  ;;  %vm2787_vm5 = vcmask 392512  }
  0x1a   : > { %600 = vmatpush.msra.mxu0 %v353_v1  ;;  %s4038_s8 = scalar_lea.vmem %s6786_s1, %s3783_s20  ;;  %v345_v21 = vld [vmem:[%s6787_s2 + $0x30] sm:$0xff]  ;;  %v344_v22 = vld [vmem:[%s6787_s2 + $0x28] sm:$0xff]  ;;  %v370_v25 = vld [vmem:[%s6787_s2 + $0xf8] sm:$0xff]  ;;  %s4149_s16 = scalar_lea.vmem %s6797_s0, %s3782_s23  ;;  %vm2791_vm6 = vcmask 458112   ;;  %vm2795_vm7 = vcmask 523712   ;;  %vm2799_vm8 = vcmask 589312  }
  0x1b   : > { %v976_v5 = vld [vmem:[%s4038_s8 + $0x20] sm:$0xff]  ;;  %v974_v6 = vld [vmem:[%s4038_s8 + $0x10] sm:$0xff]  ;;  %v977_v12 = vld [vmem:[%s4038_s8 + $0x28] sm:$0xff]  ;;  %622 = vmatpush.msra.mxu1 %v370_v25  ;;  %vm2803_vm9 = vcmask 654912   ;;  %vm2807_vm10 = vcmask 720512   ;;  %vm2811_vm11 = vcmask 786112  }
  0x1c   : > { %601 = vmatpush.msra.mxu0 %v352_v2  ;;  %v972_v7 = vld [vmem:[%s4038_s8] sm:$0xff]  ;;  %v1241_v8 = vsel %vm1228_vm0, %v976_v5, 0.0  ;;  %v1235_v9 = vsel %vm1228_vm0, %v974_v6, 0.0  ;;  %v975_v13 = vld [vmem:[%s4038_s8 + $0x18] sm:$0xff]  ;;  %v973_v15 = vld [vmem:[%s4038_s8 + $0x8] sm:$0xff]  ;;  %v1244_v17 = vsel %vm1228_vm0, %v977_v12, 0.0 }
  0x1d   : > { %v1229_v10 = vsel %vm1228_vm0, %v972_v7, 0.0  ;;  %1242 = vadd.xlane.f32.xlu2 %v1241_v8  ;;  %1236 = vadd.xlane.f32.xlu1 %v1235_v9  ;;  %v1238_v18 = vsel %vm1228_vm0, %v975_v13, 0.0  ;;  %v1232_v19 = vsel %vm1228_vm0, %v973_v15, 0.0  ;;  %v980_v23 = vld [vmem:[%s4038_s8 + $0x40] sm:$0xff]  ;;  %v979_v24 = vld [vmem:[%s4038_s8 + $0x38] sm:$0xff]  ;;  %v978_v26 = vld [vmem:[%s4038_s8 + $0x30] sm:$0xff] }
  0x1e   : > { %602 = vmatpush.msra.mxu0 %v351_v3  ;;  %1230 = vadd.xlane.f32.xlu0 %v1229_v10  ;;  %v343_v27 = vld [vmem:[%s6787_s2 + $0x20] sm:$0xff]  ;;  %v1253_v28 = vsel %vm1228_vm0, %v980_v23, 0.0  ;;  %v1250_v29 = vsel %vm1228_vm0, %v979_v24, 0.0  ;;  %v1247_v30 = vsel %vm1228_vm0, %v978_v26, 0.0  ;;  %v342_v31 = vld [vmem:[%s6787_s2 + $0x18] sm:$0xff]  ;;  %v341_v32 = vld [vmem:[%s6787_s2 + $0x10] sm:$0xff] }
  0x1f   : > { %v369_v33 = vld [vmem:[%s6787_s2 + $0xf0] sm:$0xff]  ;;  %v368_v34 = vld [vmem:[%s6787_s2 + $0xe8] sm:$0xff]  ;;  %v983_v35 = vld [vmem:[%s4038_s8 + $0x58] sm:$0xff]  ;;  %vm2815_vm12 = vcmask 851712   ;;  %vm2819_vm13 = vcmask 917312   ;;  %vm2823_vm14 = vcmask 982912  }
  0x20   : > { %603 = vmatpush.msra.mxu0 %v350_v4  ;;  %v982_v36 = vld [vmem:[%s4038_s8 + $0x50] sm:$0xff]  ;;  %v340_v37 = vld [vmem:[%s6787_s2 + $0x8] sm:$0xff]  ;;  %623 = vmatpush.msra.mxu1 %v369_v33  ;;  %v367_v39 = vld [vmem:[%s6787_s2 + $0xe0] sm:$0xff]  ;;  %v1262_v41 = vsel %vm1228_vm0, %v983_v35, 0.0  ;;  %vm2827_vm15 = vcmask 1048512   ;;  %s5737_s20 = scalar_lea.vmem [#allocation2], %s3772_s18 }
  0x21   : > { %v981_v38 = vld [vmem:[%s4038_s8 + $0x48] sm:$0xff]  ;;  %v339_v40 = vld [vmem:[%s6787_s2] sm:$0xff]  ;;  %v1259_v42 = vsel %vm1228_vm0, %v982_v36, 0.0  ;;  %v418_v44 = vld [vmem:[%s6787_s2 + $0x278] sm:$0xff]  ;;  %s3650_s21 = sshll.u32 %s5737_s20, 4  ;;  %s3651_s21 = int_to_ptr.vmem [resolvable:$true] %s3650_s21 }
  0x22   : > { %604 = vmatpush.msra.mxu0 %v349_v11  ;;  %624 = vmatpush.msra.mxu1 %v368_v34  ;;  %v1256_v43 = vsel %vm1228_vm0, %v981_v38, 0.0  ;;  %v366_v45 = vld [vmem:[%s6787_s2 + $0xd8] sm:$0xff]  ;;  %v417_v46 = vld [vmem:[%s6787_s2 + $0x270] sm:$0xff]  ;;  %v985_v49 = vld [vmem:[%s4038_s8 + $0x68] sm:$0xff] }
  0x23   : > { %v365_v47 = vld [vmem:[%s6787_s2 + $0xd0] sm:$0xff]  ;;  %v416_v50 = vld [vmem:[%s6787_s2 + $0x268] sm:$0xff]  ;;  %v984_v51 = vld [vmem:[%s4038_s8 + $0x60] sm:$0xff]  ;;  %v1268_v55 = vsel %vm1228_vm0, %v985_v49, 0.0 }
  0x24   : > { %605 = vmatpush.msra.mxu0 %v348_v14  ;;  %625 = vmatpush.msra.mxu1 %v367_v39  ;;  %v986_v48 = vld [vmem:[%s4038_s8 + $0x70] sm:$0xff]  ;;  %v364_v52 = vld [vmem:[%s6787_s2 + $0xc8] sm:$0xff]  ;;  %v415_v53 = vld [vmem:[%s6787_s2 + $0x260] sm:$0xff]  ;;  %v1265_v56 = vsel %vm1228_vm0, %v984_v51, 0.0 }
  0x25   : > { %1245 = vadd.xlane.f32.xlu2 %v1244_v17  ;;  %1239 = vadd.xlane.f32.xlu1 %v1238_v18  ;;  %v1271_v54 = vsel %vm1228_vm0, %v986_v48, 0.0  ;;  %v414_v57 = vld [vmem:[%s6787_s2 + $0x258] sm:$0xff]  ;;  %v363_v58 = vld [vmem:[%s6787_s2 + $0xc0] sm:$0xff]  ;;  %v413_v59 = vld [vmem:[%s6787_s2 + $0x250] sm:$0xff] }
  0x26   : > { %606 = vmatpush.msra.mxu0 %v347_v16  ;;  %1233 = vadd.xlane.f32.xlu0 %v1232_v19  ;;  %v989_v60 = vld [vmem:[%s4038_s8 + $0x88] sm:$0xff]  ;;  %v362_v61 = vld [vmem:[%s6787_s2 + $0xb8] sm:$0xff]  ;;  %v988_v62 = vld [vmem:[%s4038_s8 + $0x80] sm:$0xff] }
  0x27   : > { %626 = vmatpush.msra.mxu1 %v366_v45  ;;  %v412_v63 = vld [vmem:[%s6787_s2 + $0x248] sm:$0xff]  ;;  %v307_v0 = vld [vmem:[%s4149_s16] sm:$0xff]  ;;  %v987_v1 = vld [vmem:[%s4038_s8 + $0x78] sm:$0xff]  ;;  %v1280_v4 = vsel %vm1228_vm0, %v989_v60, 0.0  ;;  %v1277_v5 = vsel %vm1228_vm0, %v988_v62, 0.0 }
  0x28   : > { %607 = vmatpush.msra.mxu0 %v346_v20  ;;  %v361_v2 = vld [vmem:[%s6787_s2 + $0xb0] sm:$0xff]  ;;  %v411_v3 = vld [vmem:[%s6787_s2 + $0x240] sm:$0xff]  ;;  %v1274_v6 = vsel %vm1228_vm0, %v987_v1, 0.0  ;;  %v410_v7 = vld [vmem:[%s6787_s2 + $0x238] sm:$0xff] }
  0x29   : > { %627 = vmatpush.msra.mxu1 %v365_v47  ;;  %v360_v8 = vld [vmem:[%s6787_s2 + $0xa8] sm:$0xff]  ;;  %v409_v9 = vld [vmem:[%s6787_s2 + $0x230] sm:$0xff]  ;;  %v359_v10 = vld [vmem:[%s6787_s2 + $0xa0] sm:$0xff] }
  0x2a   : > { %608 = vmatpush.msra.mxu0 %v345_v21  ;;  %v992_v11 = vld [vmem:[%s4038_s8 + $0xa0] sm:$0xff]  ;;  %v991_v12 = vld [vmem:[%s4038_s8 + $0x98] sm:$0xff]  ;;  %v408_v13 = vld [vmem:[%s6787_s2 + $0x228] sm:$0xff] }
  0x2b   : > { %628 = vmatpush.msra.mxu1 %v364_v52  ;;  %v990_v14 = vld [vmem:[%s4038_s8 + $0x90] sm:$0xff]  ;;  %v358_v15 = vld [vmem:[%s6787_s2 + $0x98] sm:$0xff]  ;;  %v407_v16 = vld [vmem:[%s6787_s2 + $0x220] sm:$0xff]  ;;  %v1289_v17 = vsel %vm1228_vm0, %v992_v11, 0.0  ;;  %v1286_v18 = vsel %vm1228_vm0, %v991_v12, 0.0 }
  0x2c   : > { %609 = vmatpush.msra.mxu0 %v344_v22  ;;  %v1283_v19 = vsel %vm1228_vm0, %v990_v14, 0.0  ;;  %v406_v20 = vld [vmem:[%s6787_s2 + $0x218] sm:$0xff]  ;;  %v357_v21 = vld [vmem:[%s6787_s2 + $0x90] sm:$0xff]  ;;  %v356_v23 = vld [vmem:[%s6787_s2 + $0x88] sm:$0xff] }
  0x2d   : > { %1254 = vadd.xlane.f32.xlu2 %v1253_v28  ;;  %1251 = vadd.xlane.f32.xlu1 %v1250_v29  ;;  %v405_v22 = vld [vmem:[%s6787_s2 + $0x210] sm:$0xff]  ;;  %v995_v24 = vld [vmem:[%s4038_s8 + $0xb8] sm:$0xff]  ;;  %v404_v26 = vld [vmem:[%s6787_s2 + $0x208] sm:$0xff] }
  0x2e   : > { %610 = vmatpush.msra.mxu0 %v343_v27  ;;  %1248 = vadd.xlane.f32.xlu0 %v1247_v30  ;;  %v994_v25 = vld [vmem:[%s4038_s8 + $0xb0] sm:$0xff]  ;;  %v993_v27 = vld [vmem:[%s4038_s8 + $0xa8] sm:$0xff]  ;;  %v355_v28 = vld [vmem:[%s6787_s2 + $0x80] sm:$0xff] }
  0x2f   : > { %629 = vmatpush.msra.mxu1 %v363_v58  ;;  %v386_v29 = vld [vmem:[%s6787_s2 + $0x178] sm:$0xff]  ;;  %v403_v30 = vld [vmem:[%s6787_s2 + $0x200] sm:$0xff]  ;;  %v1295_v33 = vsel %vm1228_vm0, %v994_v25, 0.0  ;;  %v1292_v34 = vsel %vm1228_vm0, %v993_v27, 0.0  ;;  %v433_v36 = vld [vmem:[%s6787_s2 + $0x2f0] sm:$0xff] }
  0x30   : > { %611 = vmatpush.msra.mxu0 %v342_v31  ;;  %v434_v31 = vld [vmem:[%s6787_s2 + $0x2f8] sm:$0xff]  ;;  %645 = vmatpush.msra.mxu2 %v386_v29  ;;  %v481_v38 = vld [vmem:[%s6787_s2 + $0x470] sm:$0xff]  ;;  %v997_v39 = vld [vmem:[%s4038_s8 + $0xc8] sm:$0xff] }
  0x31   : > { %630 = vmatpush.msra.mxu1 %v362_v61  ;;  %v482_v35 = vld [vmem:[%s6787_s2 + $0x478] sm:$0xff]  ;;  %v996_v45 = vld [vmem:[%s4038_s8 + $0xc0] sm:$0xff]  ;;  %v1001_v58 = vld [vmem:[%s4038_s8 + $0xe8] sm:$0xff] }
  0x32   : > { %612 = vmatpush.msra.mxu0 %v341_v32  ;;  %v1298_v32 = vsel %vm1228_vm0, %v995_v24, 0.0  ;;  %v479_v47 = vld [vmem:[%s6787_s2 + $0x460] sm:$0xff]  ;;  %v1301_v51 = vsel %vm1228_vm0, %v996_v45, 0.0  ;;  %v478_v52 = vld [vmem:[%s6787_s2 + $0x458] sm:$0xff]  ;;  %v476_v60 = vld [vmem:[%s6787_s2 + $0x448] sm:$0xff] }
  0x33   : > { %631 = vmatpush.msra.mxu1 %v361_v2  ;;  %v383_v48 = vld [vmem:[%s6787_s2 + $0x160] sm:$0xff]  ;;  %v999_v61 = vld [vmem:[%s4038_s8 + $0xd8] sm:$0xff]  ;;  %v428_v62 = vld [vmem:[%s6787_s2 + $0x2c8] sm:$0xff]  ;;  %v1316_v2 = vsel %vm1228_vm0, %v1001_v58, 0.0 }
  0x34   : > { %613 = vmatpush.msra.mxu0 %v340_v37  ;;  %v998_v37 = vld [vmem:[%s4038_s8 + $0xd0] sm:$0xff]  ;;  %v380_v1 = vld [vmem:[%s6787_s2 + $0x148] sm:$0xff]  ;;  %v378_v11 = vld [vmem:[%s6787_s2 + $0x138] sm:$0xff] }
  0x35   : > { %1263 = vadd.xlane.f32.xlu2 %v1262_v41  ;;  %1260 = vadd.xlane.f32.xlu1 %v1259_v42  ;;  %v385_v41 = vld [vmem:[%s6787_s2 + $0x170] sm:$0xff]  ;;  %v480_v42 = vld [vmem:[%s6787_s2 + $0x468] sm:$0xff]  ;;  %v1307_v49 = vsel %vm1228_vm0, %v998_v37, 0.0  ;;  %v1003_v12 = vld [vmem:[%s4038_s8 + $0xf8] sm:$0xff] }
  0x36   : > { %614 = vmatpush.msra.mxu0 %v339_v40  ;;  %1257 = vadd.xlane.f32.xlu0 %v1256_v43  ;;  %v432_v40 = vld [vmem:[%s6787_s2 + $0x2e8] sm:$0xff]  ;;  %v323_v43 = vld [vmem:[%s4149_s16 + $0x80] sm:$0xff]  ;;  %v469_v25 = vld [vmem:[%s6787_s2 + $0x410] sm:$0xff] }
  0x37   : > { %615 = vmatmul.f32.vlgmr.msra.gmra.mxu0 %v307_v0  ;;  %632 = vmatpush.msra.mxu1 %v360_v8  ;;  %v475_v0 = vld [vmem:[%s6787_s2 + $0x440] sm:$0xff]  ;;  %v473_v8 = vld [vmem:[%s6787_s2 + $0x430] sm:$0xff]  ;;  %v472_v14 = vld [vmem:[%s6787_s2 + $0x428] sm:$0xff] }
  0x38   : > { %691 = vmatpush.msrb.mxu0 %v418_v44  ;;  %646 = vmatpush.msra.mxu2 %v385_v41  ;;  %v384_v44 = vld [vmem:[%s6787_s2 + $0x168] sm:$0xff]  ;;  %v375_v27 = vld [vmem:[%s6787_s2 + $0x120] sm:$0xff]  ;;  %v1006_v29 = vld [vmem:[%s4038_s8 + $0x110] sm:$0xff] }
  0x39   : > { %633 = vmatpush.msra.mxu1 %v359_v10  ;;  %v426_v10 = vld [vmem:[%s6787_s2 + $0x2b8] sm:$0xff]  ;;  %v376_v24 = vld [vmem:[%s6787_s2 + $0x128] sm:$0xff]  ;;  %v545_v41 = vld [vmem:[%s6787_s2 + $0x670] sm:$0xff] }
  0x3a   : > { %692 = vmatpush.msrb.mxu0 %v417_v46  ;;  %v431_v46 = vld [vmem:[%s6787_s2 + $0x2e0] sm:$0xff]  ;;  %647 = vmatpush.msra.mxu2 %v384_v44  ;;  %v1010_v44 = vld [vmem:[%s4038_s8 + $0x130] sm:$0xff]  ;;  %v1009_v45 = vld [vmem:[%s4038_s8 + $0x128] sm:$0xff] }
  0x3b   : > { %634 = vmatpush.msra.mxu1 %v358_v15  ;;  %v425_v15 = vld [vmem:[%s6787_s2 + $0x2b0] sm:$0xff] }
  0x3c   : > { %693 = vmatpush.msrb.mxu0 %v416_v50  ;;  %v1304_v50 = vsel %vm1228_vm0, %v997_v39, 0.0  ;;  %648 = vmatpush.msra.mxu2 %v383_v48  ;;  %v421_v39 = vld [vmem:[%s6787_s2 + $0x290] sm:$0xff]  ;;  %v419_v48 = vld [vmem:[%s6787_s2 + $0x280] sm:$0xff] }
  0x3d   : > { %1272 = vadd.xlane.f32.xlu2 %v1271_v54  ;;  %1269 = vadd.xlane.f32.xlu1 %v1268_v55  ;;  %v382_v54 = vld [vmem:[%s6787_s2 + $0x158] sm:$0xff]  ;;  %v477_v55 = vld [vmem:[%s6787_s2 + $0x450] sm:$0xff] }
  0x3e   : > { %694 = vmatpush.msrb.mxu0 %v415_v53  ;;  %1266 = vadd.xlane.f32.xlu0 %v1265_v56  ;;  %v430_v53 = vld [vmem:[%s6787_s2 + $0x2d8] sm:$0xff]  ;;  %v429_v56 = vld [vmem:[%s6787_s2 + $0x2d0] sm:$0xff] }
  0x3f   : > { %635 = vmatpush.msra.mxu1 %v357_v21  ;;  %618 = vmatmul.f32.gmra.mxu0 %v323_v43  ;;  %v372_v43 = vld [vmem:[%s6787_s2 + $0x108] sm:$0xff]  ;;  %v541_v58 = vld [vmem:[%s6787_s2 + $0x650] sm:$0xff] }
  0x40   : > { %695 = vmatpush.msrb.mxu0 %v414_v57  ;;  %v381_v57 = vld [vmem:[%s6787_s2 + $0x150] sm:$0xff]  ;;  %649 = vmatpush.msra.mxu2 %v382_v54 }
  0x41   : > { %636 = vmatpush.msra.mxu1 %v356_v23  ;;  %v424_v23 = vld [vmem:[%s6787_s2 + $0x2a8] sm:$0xff] }
  0x42   : > { %696 = vmatpush.msrb.mxu0 %v413_v59  ;;  %v1000_v59 = vld [vmem:[%s4038_s8 + $0xe0] sm:$0xff]  ;;  %650 = vmatpush.msra.mxu2 %v381_v57  ;;  %v450_v57 = vld [vmem:[%s6787_s2 + $0x378] sm:$0xff] }
  0x43   : > { %637 = vmatpush.msra.mxu1 %v355_v28  ;;  %v1007_v28 = vld [vmem:[%s4038_s8 + $0x118] sm:$0xff] }
  0x44   : > { %697 = vmatpush.msrb.mxu0 %v412_v63  ;;  %v311_v63 = vld [vmem:[%s4149_s16 + $0x20] sm:$0xff]  ;;  %651 = vmatpush.msra.mxu2 %v380_v1  ;;  %v1011_v1 = vld [vmem:[%s4038_s8 + $0x138] sm:$0xff] }
  0x45   : > { %1281 = vadd.xlane.f32.xlu2 %v1280_v4  ;;  %1278 = vadd.xlane.f32.xlu1 %v1277_v5  ;;  %v1310_v4 = vsel %vm1228_vm0, %v999_v61, 0.0  ;;  %v474_v5 = vld [vmem:[%s6787_s2 + $0x438] sm:$0xff]  ;;  %v327_v61 = vld [vmem:[%s4149_s16 + $0xa0] sm:$0xff] }
  0x46   : > { %698 = vmatpush.msrb.mxu0 %v411_v3  ;;  %1275 = vadd.xlane.f32.xlu0 %v1274_v6  ;;  %v1313_v3 = vsel %vm1228_vm0, %v1000_v59, 0.0  ;;  %v427_v6 = vld [vmem:[%s6787_s2 + $0x2c0] sm:$0xff]  ;;  %v1013_v59 = vld [vmem:[%s4038_s8 + $0x148] sm:$0xff] }
  0x47   : > { %714 = vmatpush.msrb.mxu1 %v434_v31  ;;  %v1005_v31 = vld [vmem:[%s4038_s8 + $0x108] sm:$0xff] }
  0x48   : > { %699 = vmatpush.msrb.mxu0 %v410_v7  ;;  %v379_v7 = vld [vmem:[%s6787_s2 + $0x140] sm:$0xff]  ;;  %v1328_v37 = vsel %vm1228_vm0, %v1005_v31, 0.0 }
  0x49   : > { %715 = vmatpush.msrb.mxu1 %v433_v36  ;;  %652 = vmatpush.msra.mxu2 %v379_v7  ;;  %v1331_v36 = vsel %vm1228_vm0, %v1006_v29, 0.0  ;;  %v1346_v7 = vsel %vm1228_vm0, %v1011_v1, 0.0  ;;  %v444_v29 = vld [vmem:[%s6787_s2 + $0x348] sm:$0xff]  ;;  %v315_v31 = vld [vmem:[%s4149_s16 + $0x40] sm:$0xff] }
  0x4a   : > { %700 = vmatpush.msrb.mxu0 %v409_v9  ;;  %v1004_v9 = vld [vmem:[%s4038_s8 + $0x100] sm:$0xff] }
  0x4b   : > { %716 = vmatpush.msrb.mxu1 %v432_v40  ;;  %653 = vmatpush.msra.mxu2 %v378_v11  ;;  %v373_v40 = vld [vmem:[%s6787_s2 + $0x110] sm:$0xff] }
  0x4c   : > { %701 = vmatpush.msrb.mxu0 %v408_v13  ;;  %v1002_v13 = vld [vmem:[%s4038_s8 + $0xf0] sm:$0xff] }
  0x4d   : > { %1290 = vadd.xlane.f32.xlu2 %v1289_v17  ;;  %1287 = vadd.xlane.f32.xlu1 %v1286_v18  ;;  %v308_v17 = vld [vmem:[%s4149_s16 + $0x8] sm:$0xff]  ;;  %v471_v18 = vld [vmem:[%s6787_s2 + $0x420] sm:$0xff]  ;;  %v1319_v21 = vsel %vm1228_vm0, %v1002_v13, 0.0  ;;  %v537_v11 = vld [vmem:[%s6787_s2 + $0x630] sm:$0xff] }
  0x4e   : > { %702 = vmatpush.msrb.mxu0 %v407_v16  ;;  %1284 = vadd.xlane.f32.xlu0 %v1283_v19  ;;  %v377_v16 = vld [vmem:[%s6787_s2 + $0x130] sm:$0xff]  ;;  %v1325_v19 = vsel %vm1228_vm0, %v1004_v9, 0.0  ;;  %v494_v9 = vld [vmem:[%s6787_s2 + $0x4d8] sm:$0xff]  ;;  %v1016_v13 = vld [vmem:[%s4038_s8 + $0x160] sm:$0xff] }
  0x4f   : > { %717 = vmatpush.msrb.mxu1 %v431_v46  ;;  %654 = vmatpush.msra.mxu2 %v377_v16  ;;  %v544_v46 = vld [vmem:[%s6787_s2 + $0x668] sm:$0xff]  ;;  %v1015_v16 = vld [vmem:[%s4038_s8 + $0x158] sm:$0xff] }
  0x50   : > { %703 = vmatpush.msrb.mxu0 %v406_v20  ;;  %v1322_v20 = vsel %vm1228_vm0, %v1003_v12, 0.0  ;;  %638 = vmatmul.f32.vlgmr.msra.gmra.mxu1 %v308_v17  ;;  %v324_v12 = vld [vmem:[%s4149_s16 + $0x88] sm:$0xff] }
  0x51   : > { %718 = vmatpush.msrb.mxu1 %v430_v53  ;;  %655 = vmatpush.msra.mxu2 %v376_v24  ;;  %v1340_v53 = vsel %vm1228_vm0, %v1009_v45, 0.0  ;;  %v536_v17 = vld [vmem:[%s6787_s2 + $0x628] sm:$0xff]  ;;  %v1361_v24 = vsel %vm1228_vm0, %v1016_v13, 0.0  ;;  %v399_v45 = vld [vmem:[%s6787_s2 + $0x1e0] sm:$0xff] }
  0x52   : > { %704 = vmatpush.msrb.mxu0 %v405_v22  ;;  %v470_v22 = vld [vmem:[%s6787_s2 + $0x418] sm:$0xff] }
  0x53   : > { %719 = vmatpush.msrb.mxu1 %v429_v56  ;;  %656 = vmatpush.msra.mxu2 %v375_v27  ;;  %v497_v56 = vld [vmem:[%s6787_s2 + $0x4f0] sm:$0xff]  ;;  %v491_v27 = vld [vmem:[%s6787_s2 + $0x4c0] sm:$0xff] }
  0x54   : > { %705 = vmatpush.msrb.mxu0 %v404_v26  ;;  %v423_v26 = vld [vmem:[%s6787_s2 + $0x2a0] sm:$0xff] }
  0x55   : > { %1299 = vadd.xlane.f32.xlu2 %v1298_v32  ;;  %1296 = vadd.xlane.f32.xlu1 %v1295_v33  ;;  %v422_v32 = vld [vmem:[%s6787_s2 + $0x298] sm:$0xff] }
  0x56   : > { %706 = vmatpush.msrb.mxu0 %v403_v30  ;;  %1293 = vadd.xlane.f32.xlu0 %v1292_v34  ;;  %v468_v30 = vld [vmem:[%s6787_s2 + $0x408] sm:$0xff]  ;;  %v374_v33 = vld [vmem:[%s6787_s2 + $0x118] sm:$0xff]  ;;  %v467_v34 = vld [vmem:[%s6787_s2 + $0x400] sm:$0xff] }
  0x57   : > { %720 = vmatpush.msrb.mxu1 %v428_v62  ;;  %707 = vmatmul.f32.vlgmr.msrb.gmra.mxu0 %v311_v63  ;;  %v1012_v62 = vld [vmem:[%s4038_s8 + $0x140] sm:$0xff]  ;;  %v540_v63 = vld [vmem:[%s6787_s2 + $0x648] sm:$0xff] }
  0x58   : > { %783 = vmatpush.msra.mxu0 %v482_v35  ;;  %v1334_v35 = vsel %vm1228_vm0, %v1007_v28, 0.0  ;;  %657 = vmatpush.msra.mxu2 %v374_v33  ;;  %v534_v28 = vld [vmem:[%s6787_s2 + $0x618] sm:$0xff]  ;;  %v533_v33 = vld [vmem:[%s6787_s2 + $0x610] sm:$0xff] }
  0x59   : > { %721 = vmatpush.msrb.mxu1 %v427_v6  ;;  %v1349_v6 = vsel %vm1228_vm0, %v1012_v62, 0.0 }
  0x5a   : > { %784 = vmatpush.msra.mxu0 %v481_v38  ;;  %v546_v38 = vld [vmem:[%s6787_s2 + $0x678] sm:$0xff]  ;;  %658 = vmatpush.msra.mxu2 %v373_v40  ;;  %v1017_v40 = vld [vmem:[%s4038_s8 + $0x168] sm:$0xff] }
  0x5b   : > { %722 = vmatpush.msrb.mxu1 %v426_v10  ;;  %v447_v10 = vld [vmem:[%s6787_s2 + $0x360] sm:$0xff] }
  0x5c   : > { %785 = vmatpush.msra.mxu0 %v480_v42  ;;  %v420_v42 = vld [vmem:[%s6787_s2 + $0x288] sm:$0xff]  ;;  %659 = vmatpush.msra.mxu2 %v372_v43 }
  0x5d   : > { %1308 = vadd.xlane.f32.xlu2 %v1307_v49  ;;  %1305 = vadd.xlane.f32.xlu1 %v1304_v50  ;;  %v371_v49 = vld [vmem:[%s6787_s2 + $0x100] sm:$0xff] }
  0x5e   : > { %786 = vmatpush.msra.mxu0 %v479_v47  ;;  %1302 = vadd.xlane.f32.xlu0 %v1301_v51  ;;  %v1008_v47 = vld [vmem:[%s4038_s8 + $0x120] sm:$0xff]  ;;  %v498_v51 = vld [vmem:[%s6787_s2 + $0x4f8] sm:$0xff] }
  0x5f   : > { %723 = vmatpush.msrb.mxu1 %v425_v15  ;;  %v543_v50 = vld [vmem:[%s6787_s2 + $0x660] sm:$0xff]  ;;  %v1337_v54 = vsel %vm1228_vm0, %v1008_v47, 0.0  ;;  %660 = vmatpush.msra.mxu2 %v371_v49  ;;  %v446_v15 = vld [vmem:[%s6787_s2 + $0x358] sm:$0xff]  ;;  %v1364_v49 = vsel %vm1228_vm0, %v1017_v40, 0.0 }
  0x60   : > { %787 = vmatpush.msra.mxu0 %v478_v52  ;;  %v1343_v52 = vsel %vm1228_vm0, %v1010_v44, 0.0  ;;  %641 = vmatmul.f32.gmra.mxu1 %v324_v12  ;;  %v488_v44 = vld [vmem:[%s6787_s2 + $0x4a8] sm:$0xff]  ;;  %v319_v40 = vld [vmem:[%s4149_s16 + $0x60] sm:$0xff] }
  0x61   : > { %724 = vmatpush.msrb.mxu1 %v424_v23  ;;  %737 = vmatpush.msrb.mxu2 %v450_v57  ;;  %v401_v23 = vld [vmem:[%s6787_s2 + $0x1f0] sm:$0xff] }
  0x62   : > { %788 = vmatpush.msra.mxu0 %v477_v55  ;;  %v542_v55 = vld [vmem:[%s6787_s2 + $0x658] sm:$0xff]  ;;  %v2267_v57 = vld [vmem:[%s6789_s4 + $0x70] sm:$0xff] }
  0x63   : > { %725 = vmatpush.msrb.mxu1 %v423_v26  ;;  %710 = vmatmul.f32.gmra.mxu0 %v327_v61  ;;  %v312_v61 = vld [vmem:[%s4149_s16 + $0x28] sm:$0xff] }
  0x64   : > { %789 = vmatpush.msra.mxu0 %v476_v60  ;;  %v496_v60 = vld [vmem:[%s6787_s2 + $0x4e8] sm:$0xff] }
  0x65   : > { %1317 = vadd.xlane.f32.xlu2 %v1316_v2  ;;  %1314 = vadd.xlane.f32.xlu1 %v1313_v3  ;;  %v495_v2 = vld [vmem:[%s6787_s2 + $0x4e0] sm:$0xff] }
  0x66   : > { %790 = vmatpush.msra.mxu0 %v475_v0  ;;  %1311 = vadd.xlane.f32.xlu0 %v1310_v4  ;;  %v449_v0 = vld [vmem:[%s6787_s2 + $0x370] sm:$0xff]  ;;  %v539_v3 = vld [vmem:[%s6787_s2 + $0x640] sm:$0xff]  ;;  %v448_v4 = vld [vmem:[%s6787_s2 + $0x368] sm:$0xff] }
  0x67   : > { %726 = vmatpush.msrb.mxu1 %v422_v32  ;;  %738 = vmatpush.msrb.mxu2 %v449_v0  ;;  %v1019_v32 = vld [vmem:[%s4038_s8 + $0x178] sm:$0xff] }
  0x68   : > { %791 = vmatpush.msra.mxu0 %v474_v5  ;;  %v1352_v5 = vsel %vm1228_vm0, %v1013_v59, 0.0  ;;  %v1370_v47 = vsel %vm1228_vm0, %v1019_v32, 0.0  ;;  %v1021_v59 = vld [vmem:[%s4038_s8 + $0x188] sm:$0xff]  ;;  %v1024_v32 = vld [vmem:[%s4038_s8 + $0x1a0] sm:$0xff] }
  0x69   : > { %727 = vmatpush.msrb.mxu1 %v421_v39  ;;  %739 = vmatpush.msrb.mxu2 %v448_v4  ;;  %v485_v4 = vld [vmem:[%s6787_s2 + $0x490] sm:$0xff] }
  0x6a   : > { %792 = vmatpush.msra.mxu0 %v473_v8  ;;  %v538_v8 = vld [vmem:[%s6787_s2 + $0x638] sm:$0xff] }
  0x6b   : > { %728 = vmatpush.msrb.mxu1 %v420_v42  ;;  %740 = vmatpush.msrb.mxu2 %v447_v10  ;;  %v442_v42 = vld [vmem:[%s6787_s2 + $0x338] sm:$0xff] }
  0x6c   : > { %793 = vmatpush.msra.mxu0 %v472_v14  ;;  %v493_v14 = vld [vmem:[%s6787_s2 + $0x4d0] sm:$0xff]  ;;  %v398_v10 = vld [vmem:[%s6787_s2 + $0x1d8] sm:$0xff] }
  0x6d   : > { %1326 = vadd.xlane.f32.xlu2 %v1325_v19  ;;  %1323 = vadd.xlane.f32.xlu1 %v1322_v20  ;;  %v1014_v19 = vld [vmem:[%s4038_s8 + $0x150] sm:$0xff]  ;;  %v492_v20 = vld [vmem:[%s6787_s2 + $0x4c8] sm:$0xff] }
  0x6e   : > { %794 = vmatpush.msra.mxu0 %v471_v18  ;;  %1320 = vadd.xlane.f32.xlu0 %v1319_v21  ;;  %v402_v18 = vld [vmem:[%s6787_s2 + $0x1f8] sm:$0xff]  ;;  %v445_v21 = vld [vmem:[%s6787_s2 + $0x350] sm:$0xff]  ;;  %v1355_v26 = vsel %vm1228_vm0, %v1014_v19, 0.0  ;;  %v484_v19 = vld [vmem:[%s6787_s2 + $0x488] sm:$0xff] }
  0x6f   : > { %729 = vmatpush.msrb.mxu1 %v419_v48  ;;  %741 = vmatpush.msrb.mxu2 %v446_v15 }
  0x70   : > { %795 = vmatpush.msra.mxu0 %v470_v22  ;;  %v535_v22 = vld [vmem:[%s6787_s2 + $0x620] sm:$0xff]  ;;  %668 = vmatpush.msra.mxu3 %v402_v18 }
  0x71   : > { %806 = vmatpush.msra.mxu1 %v498_v51  ;;  %742 = vmatpush.msrb.mxu2 %v445_v21  ;;  %v2268_v51 = vld [vmem:[%s6789_s4 + $0x78] sm:$0xff] }
  0x72   : > { %796 = vmatpush.msra.mxu0 %v469_v25  ;;  %v1358_v25 = vsel %vm1228_vm0, %v1015_v16, 0.0  ;;  %669 = vmatpush.msra.mxu3 %v401_v23  ;;  %v2265_v16 = vld [vmem:[%s6789_s4 + $0x60] sm:$0xff]  ;;  %v397_v23 = vld [vmem:[%s6787_s2 + $0x1d0] sm:$0xff] }
  0x73   : > { %807 = vmatpush.msra.mxu1 %v497_v56  ;;  %743 = vmatpush.msrb.mxu2 %v444_v29  ;;  %v1022_v56 = vld [vmem:[%s4038_s8 + $0x190] sm:$0xff] }
  0x74   : > { %797 = vmatpush.msra.mxu0 %v468_v30  ;;  %v490_v30 = vld [vmem:[%s6787_s2 + $0x4b8] sm:$0xff]  ;;  %v1379_v13 = vsel %vm1228_vm0, %v1022_v56, 0.0  ;;  %730 = vmatmul.f32.vlgmr.msrb.gmra.mxu1 %v312_v61  ;;  %v559_v61 = vld [vmem:[%s6787_s2 + $0x6e0] sm:$0xff] }
  0x75   : > { %1335 = vadd.xlane.f32.xlu2 %v1334_v35  ;;  %1332 = vadd.xlane.f32.xlu1 %v1331_v36  ;;  %v1018_v35 = vld [vmem:[%s4038_s8 + $0x170] sm:$0xff] }
  0x76   : > { %798 = vmatpush.msra.mxu0 %v467_v34  ;;  %1329 = vadd.xlane.f32.xlu0 %v1328_v37  ;;  %v443_v34 = vld [vmem:[%s6787_s2 + $0x340] sm:$0xff]  ;;  %v489_v36 = vld [vmem:[%s6787_s2 + $0x4b0] sm:$0xff]  ;;  %v400_v37 = vld [vmem:[%s6787_s2 + $0x1e8] sm:$0xff]  ;;  %v1367_v48 = vsel %vm1228_vm0, %v1018_v35, 0.0 }
  0x77   : > { %808 = vmatpush.msra.mxu1 %v496_v60  ;;  %799 = vmatmul.f32.vlgmr.msra.gmra.mxu0 %v315_v31  ;;  %v440_v60 = vld [vmem:[%s6787_s2 + $0x328] sm:$0xff] }
  0x78   : > { %875 = vmatpush.msrb.mxu0 %v546_v38  ;;  %744 = vmatpush.msrb.mxu2 %v443_v34  ;;  %v2263_v34 = vld [vmem:[%s6789_s4 + $0x50] sm:$0xff] }
  0x79   : > { %809 = vmatpush.msra.mxu1 %v495_v2  ;;  %670 = vmatpush.msra.mxu3 %v400_v37  ;;  %v1020_v2 = vld [vmem:[%s4038_s8 + $0x180] sm:$0xff] }
  0x7a   : > { %876 = vmatpush.msrb.mxu0 %v545_v41  ;;  %v532_v41 = vld [vmem:[%s6787_s2 + $0x608] sm:$0xff]  ;;  %745 = vmatpush.msrb.mxu2 %v442_v42  ;;  %v1373_v15 = vsel %vm1228_vm0, %v1020_v2, 0.0  ;;  %v435_v2 = vld [vmem:[%s6787_s2 + $0x300] sm:$0xff] }
  0x7b   : > { %810 = vmatpush.msra.mxu1 %v494_v9  ;;  %671 = vmatpush.msra.mxu3 %v399_v45  ;;  %v439_v9 = vld [vmem:[%s6787_s2 + $0x320] sm:$0xff]  ;;  %v2262_v45 = vld [vmem:[%s6789_s4 + $0x48] sm:$0xff] }
  0x7c   : > { %877 = vmatpush.msrb.mxu0 %v544_v46  ;;  %v2766_v46 = vlaneseq }
  0x7d   : > { %1344 = vadd.xlane.f32.xlu2 %v1343_v52  ;;  %1341 = vadd.xlane.f32.xlu1 %v1340_v53  ;;  %v487_v52 = vld [vmem:[%s6787_s2 + $0x4a0] sm:$0xff]  ;;  %v441_v53 = vld [vmem:[%s6787_s2 + $0x330] sm:$0xff] }
  0x7e   : > { %878 = vmatpush.msrb.mxu0 %v543_v50  ;;  %1338 = vadd.xlane.f32.xlu0 %v1337_v54  ;;  %v531_v50 = vld [vmem:[%s6787_s2 + $0x600] sm:$0xff] }
  0x7f   : > { %811 = vmatpush.msra.mxu1 %v493_v14  ;;  %v331_v54 = vld [vmem:[%s4149_s16 + $0xc0] sm:$0xff]  ;;  %746 = vmatpush.msrb.mxu2 %v441_v53  ;;  %v1376_v14 = vsel %vm1228_vm0, %v1021_v59, 0.0 }
  0x80   : > { %879 = vmatpush.msrb.mxu0 %v542_v55  ;;  %v4557_v55 = vand.u32 127, %v2766_v46  ;;  %672 = vmatpush.msra.mxu3 %v398_v10 }
  0x81   : > { %812 = vmatpush.msra.mxu1 %v492_v20  ;;  %802 = vmatmul.f32.gmra.mxu0 %v331_v54  ;;  %v438_v20 = vld [vmem:[%s6787_s2 + $0x318] sm:$0xff] }
  0x82   : > { %880 = vmatpush.msrb.mxu0 %v541_v58  ;;  %v486_v58 = vld [vmem:[%s6787_s2 + $0x498] sm:$0xff]  ;;  %v4572_v1 = vadd.s32 4294967288, %v4557_v55  ;;  %747 = vmatpush.msrb.mxu2 %v440_v60  ;;  %v4624_v29 = vadd.s32 4294967264, %v4557_v55  ;;  %v4636_v35 = vadd.s32 4294967256, %v4557_v55  ;;  %v4644_v42 = vadd.s32 4294967248, %v4557_v55 }
  0x83   : > { %813 = vmatpush.msra.mxu1 %v491_v27  ;;  %v483_v27 = vld [vmem:[%s6787_s2 + $0x480] sm:$0xff]  ;;  %673 = vmatpush.msra.mxu3 %v397_v23  ;;  %v4662_v54 = vadd.s32 4294967240, %v4557_v55 }
  0x84   : > { %881 = vmatpush.msrb.mxu0 %v540_v63  ;;  %748 = vmatpush.msrb.mxu2 %v439_v9  ;;  %v309_v9 = vld [vmem:[%s4149_s16 + $0x10] sm:$0xff] }
  0x85   : > { %1353 = vadd.xlane.f32.xlu2 %v1352_v5  ;;  %1350 = vadd.xlane.f32.xlu1 %v1349_v6  ;;  %v4582_v5 = vadd.s32 4294967280, %v4557_v55 }
  0x86   : > { %882 = vmatpush.msrb.mxu0 %v539_v3  ;;  %1347 = vadd.xlane.f32.xlu0 %v1346_v7  ;;  %v2266_v3 = vld [vmem:[%s6789_s4 + $0x68] sm:$0xff]  ;;  %v4585_v7 = vadd.s32 4294967272, %v4557_v55 }
  0x87   : > { %814 = vmatpush.msra.mxu1 %v490_v30  ;;  %749 = vmatpush.msrb.mxu2 %v438_v20  ;;  %v514_v20 = vld [vmem:[%s6787_s2 + $0x578] sm:$0xff] }
  0x88   : > { %883 = vmatpush.msrb.mxu0 %v538_v8  ;;  %661 = vmatmul.f32.vlgmr.msra.gmra.mxu2 %v309_v9  ;;  %v2255_v9 = vld [vmem:[%s6789_s4 + $0x10] sm:$0xff] }
  0x89   : > { %815 = vmatpush.msra.mxu1 %v489_v36 }
  0x8a   : > { %884 = vmatpush.msrb.mxu0 %v537_v11 }
  0x8b   : > { %816 = vmatpush.msra.mxu1 %v488_v44  ;;  %v561_v44 = vld [vmem:[%s6787_s2 + $0x6f0] sm:$0xff] }
  0x8c   : > { %885 = vmatpush.msrb.mxu0 %v536_v17 }
  0x8d   : > { %1362 = vadd.xlane.f32.xlu2 %v1361_v24  ;;  %1359 = vadd.xlane.f32.xlu1 %v1358_v25 }
  0x8e   : > { %886 = vmatpush.msrb.mxu0 %v535_v22  ;;  %1356 = vadd.xlane.f32.xlu0 %v1355_v26  ;;  %v2264_v22 = vld [vmem:[%s6789_s4 + $0x58] sm:$0xff]  ;;  %v1025_v26 = vld [vmem:[%s4038_s8 + $0x1a8] sm:$0xff] }
  0x8f   : > { %817 = vmatpush.msra.mxu1 %v487_v52  ;;  %v560_v52 = vld [vmem:[%s6787_s2 + $0x6e8] sm:$0xff] }
  0x90   : > { %887 = vmatpush.msrb.mxu0 %v534_v28  ;;  %v4526_v38 = vpop.xlane.xlu2 %1242  ;;  %v1237_v39 = vpop.xlane.xlu1 %1236  ;;  %v437_v28 = vld [vmem:[%s6787_s2 + $0x310] sm:$0xff] }
  0x91   : > { %v1231_v43 = vpop.xlane.xlu0 %1230  ;;  %v1999_v6 = vmul.f32 0.0625, %v1237_v39  ;;  %818 = vmatpush.msra.mxu1 %v486_v58  ;;  %v2001_v30 = vmul.f32 0.0625, %v4526_v38  ;;  %v1023_v39 = vld [vmem:[%s4038_s8 + $0x198] sm:$0xff]  ;;  %750 = vmatpush.msrb.mxu2 %v437_v28  ;;  %v436_v58 = vld [vmem:[%s6787_s2 + $0x308] sm:$0xff] }
  0x92   : > { %888 = vmatpush.msrb.mxu0 %v533_v33  ;;  %v1997_v62 = vmul.f32 0.0625, %v1231_v43  ;;  %v562_v33 = vld [vmem:[%s6787_s2 + $0x6f8] sm:$0xff] }
  0x93   : > { %819 = vmatpush.msra.mxu1 %v485_v4  ;;  %v2774_v21 = vperm.slane %v1999_v6, %v4582_v5  ;;  %v1027_v6 = vld [vmem:[%s4038_s8 + $0x1b8] sm:$0xff]  ;;  %751 = vmatpush.msrb.mxu2 %v436_v58  ;;  %v4765_v58 = vadd.s32 4294967192, %v4557_v55 }
  0x94   : > { %889 = vmatpush.msrb.mxu0 %v532_v41  ;;  %v2768_v17 = vperm.slane %v1997_v62, %v4557_v55  ;;  %v396_v41 = vld [vmem:[%s6787_s2 + $0x1c8] sm:$0xff]  ;;  %v395_v62 = vld [vmem:[%s6787_s2 + $0x1c0] sm:$0xff] }
  0x95   : > { %1371 = vadd.xlane.f32.xlu2 %v1370_v47  ;;  %1368 = vadd.xlane.f32.xlu1 %v1367_v48  ;;  %v1388_v48 = vsel %vm1228_vm0, %v1025_v26, 0.0  ;;  %v4716_v26 = vadd.s32 4294967216, %v4557_v55 }
  0x96   : > { %1365 = vadd.xlane.f32.xlu0 %v1364_v49  ;;  %890 = vmatpush.msrb.mxu0 %v531_v50  ;;  %v1385_v49 = vsel %vm1228_vm0, %v1024_v32, 0.0  ;;  %v2782_v50 = vperm.slane %v2001_v30, %v4624_v29  ;;  %v2258_v30 = vld [vmem:[%s6789_s4 + $0x28] sm:$0xff] }
  0x97   : > { %820 = vmatpush.msra.mxu1 %v484_v19  ;;  %891 = vmatmul.f32.vlgmr.msrb.gmra.mxu0 %v319_v40  ;;  %v1031_v40 = vld [vmem:[%s4038_s8 + $0x1d8] sm:$0xff] }
  0x98   : > { %3310 = vmatpush.msra.mxu0 %v2268_v51  ;;  %v1246_v63 = vpop.xlane.xlu2 %1245  ;;  %v1240_v0 = vpop.xlane.xlu1 %1239  ;;  %v1382_v51 = vsel %vm1228_vm0, %v1023_v39, 0.0  ;;  %674 = vmatpush.msra.mxu3 %v396_v41  ;;  %v335_v41 = vld [vmem:[%s4149_s16 + $0xe0] sm:$0xff] }
  0x99   : > { %v1234_v8 = vpop.xlane.xlu0 %1233  ;;  %v2000_v11 = vmul.f32 0.0625, %v1240_v0  ;;  %v2002_v36 = vmul.f32 0.0625, %v1246_v63  ;;  %821 = vmatpush.msra.mxu1 %v483_v27  ;;  %v1028_v63 = vld [vmem:[%s4038_s8 + $0x1c0] sm:$0xff]  ;;  %v2260_v0 = vld [vmem:[%s6789_s4 + $0x38] sm:$0xff]  ;;  %752 = vmatpush.msrb.mxu2 %v435_v2 }
  0x9a   : > { %3311 = vmatpush.msra.mxu0 %v2267_v57  ;;  %v1998_v12 = vmul.f32 0.0625, %v1234_v8  ;;  %v2261_v57 = vld [vmem:[%s6789_s4 + $0x40] sm:$0xff]  ;;  %v558_v8 = vld [vmem:[%s6787_s2 + $0x6d8] sm:$0xff]  ;;  %675 = vmatpush.msra.mxu3 %v395_v62  ;;  %v1397_v23 = vsel %vm1228_vm0, %v1028_v63, 0.0 }
  0x9b   : > { %v2778_v24 = vperm.slane %v2000_v11, %v4585_v7  ;;  %898 = vmatpush.msrb.mxu1 %v562_v33  ;;  %v2786_v53 = vperm.slane %v2002_v36, %v4636_v35  ;;  %829 = vmatpush.msra.mxu2 %v514_v20  ;;  %v393_v33 = vld [vmem:[%s6787_s2 + $0x1b0] sm:$0xff]  ;;  %v556_v36 = vld [vmem:[%s6787_s2 + $0x6c8] sm:$0xff]  ;;  %v554_v62 = vld [vmem:[%s6787_s2 + $0x6b8] sm:$0xff] }
  0x9c   : > { %3312 = vmatpush.msra.mxu0 %v2266_v3  ;;  %v2770_v18 = vperm.slane %v1998_v12, %v4572_v1  ;;  %v4686_v3 = vadd.s32 4294967232, %v4557_v55  ;;  %v389_v20 = vld [vmem:[%s6787_s2 + $0x190] sm:$0xff] }
  0x9d   : > { %1380 = vadd.xlane.f32.xlu2 %v1379_v13  ;;  %1377 = vadd.xlane.f32.xlu1 %v1376_v14  ;;  %v4696_v14 = vadd.s32 4294967224, %v4557_v55 }
  0x9e   : > { %v2772_v25 = vsel %vm2771_vm1, %v2770_v18, %v2768_v17  ;;  %1374 = vadd.xlane.f32.xlu0 %v1373_v15  ;;  %3313 = vmatpush.msra.mxu0 %v2265_v16  ;;  %v1026_v15 = vld [vmem:[%s4038_s8 + $0x1b0] sm:$0xff]  ;;  %v394_v17 = vld [vmem:[%s6787_s2 + $0x1b8] sm:$0xff] }
  0x9f   : > { %v2776_v31 = vsel %vm2775_vm2, %v2774_v21, %v2772_v25  ;;  %899 = vmatpush.msrb.mxu1 %v561_v44  ;;  %v2259_v16 = vld [vmem:[%s6789_s4 + $0x30] sm:$0xff]  ;;  %v1391_v28 = vsel %vm1228_vm0, %v1026_v15, 0.0  ;;  %676 = vmatpush.msra.mxu3 %v394_v17  ;;  %v2254_v17 = vld [vmem:[%s6789_s4 + $0x8] sm:$0xff] }
  0xa0   : > { %v1255_v37 = vpop.xlane.xlu2 %1254  ;;  %v1252_v38 = vpop.xlane.xlu1 %1251  ;;  %3314 = vmatpush.msra.mxu0 %v2264_v22  ;;  %v2780_v46 = vsel %vm6793_vm3, %v2778_v24, %v2776_v31  ;;  %v557_v21 = vld [vmem:[%s6787_s2 + $0x6d0] sm:$0xff]  ;;  %v1394_v24 = vsel %vm1228_vm0, %v1027_v6, 0.0 }
  0xa1   : > { %v1249_v43 = vpop.xlane.xlu0 %1248  ;;  %v2004_v56 = vmul.f32 0.0625, %v1252_v38  ;;  %v2784_v59 = vsel %vm2783_vm4, %v2782_v50, %v2780_v46  ;;  %900 = vmatpush.msrb.mxu1 %v560_v52  ;;  %v2005_v4 = vmul.f32 0.0625, %v1255_v37  ;;  %v2257_v37 = vld [vmem:[%s6789_s4 + $0x20] sm:$0xff]  ;;  %v4737_v38 = vadd.s32 4294967208, %v4557_v55  ;;  %677 = vmatpush.msra.mxu3 %v393_v33  ;;  %v1030_v46 = vld [vmem:[%s4038_s8 + $0x1d0] sm:$0xff]  ;;  %v388_v33 = vld [vmem:[%s6787_s2 + $0x188] sm:$0xff] }
  0xa2   : > { %v2003_v47 = vmul.f32 0.0625, %v1249_v43  ;;  %3315 = vmatpush.msra.mxu0 %v2263_v34  ;;  %v2788_v11 = vsel %vm2787_vm5, %v2786_v53, %v2784_v59  ;;  %v513_v34 = vld [vmem:[%s6787_s2 + $0x570] sm:$0xff]  ;;  %v392_v43 = vld [vmem:[%s6787_s2 + $0x1a8] sm:$0xff]  ;;  %v4755_v52 = vadd.s32 4294967200, %v4557_v55 }
  0xa3   : > { %v2794_v10 = vperm.slane %v2004_v56, %v4662_v54  ;;  %901 = vmatpush.msrb.mxu1 %v559_v61  ;;  %v2798_v25 = vperm.slane %v2005_v4, %v4686_v3  ;;  %830 = vmatpush.msra.mxu2 %v513_v34  ;;  %v1029_v53 = vld [vmem:[%s4038_s8 + $0x1c8] sm:$0xff]  ;;  %v2256_v56 = vld [vmem:[%s6789_s4 + $0x18] sm:$0xff]  ;;  %v511_v61 = vld [vmem:[%s6787_s2 + $0x560] sm:$0xff]  ;;  %v1403_v4 = vsel %vm1228_vm0, %v1030_v46, 0.0 }
  0xa4   : > { %3316 = vmatpush.msra.mxu0 %v2262_v45  ;;  %v2790_v60 = vperm.slane %v2003_v47, %v4644_v42  ;;  %v512_v47 = vld [vmem:[%s6787_s2 + $0x568] sm:$0xff]  ;;  %678 = vmatpush.msra.mxu3 %v392_v43 }
  0xa5   : > { %1389 = vadd.xlane.f32.xlu2 %v1388_v48  ;;  %1386 = vadd.xlane.f32.xlu1 %v1385_v49  ;;  %v555_v48 = vld [vmem:[%s6787_s2 + $0x6c0] sm:$0xff]  ;;  %v328_v34 = vld [vmem:[%s4149_s16 + $0xa8] sm:$0xff] }
  0xa6   : > { %1383 = vadd.xlane.f32.xlu0 %v1382_v51  ;;  %3317 = vmatpush.msra.mxu0 %v2261_v57  ;;  %v2792_v18 = vsel %vm2791_vm6, %v2790_v60, %v2788_v11  ;;  %v391_v57 = vld [vmem:[%s6787_s2 + $0x1a0] sm:$0xff]  ;;  %v1406_v60 = vsel %vm1228_vm0, %v1031_v40, 0.0  ;;  %v390_v11 = vld [vmem:[%s6787_s2 + $0x198] sm:$0xff] }
  0xa7   : > { %902 = vmatpush.msrb.mxu1 %v558_v8  ;;  %v2796_v31 = vsel %vm2795_vm7, %v2794_v10, %v2792_v18  ;;  %894 = vmatmul.f32.gmra.mxu0 %v335_v41  ;;  %v1400_v8 = vsel %vm1228_vm0, %v1029_v53, 0.0  ;;  %v551_v40 = vld [vmem:[%s6787_s2 + $0x6a0] sm:$0xff]  ;;  %v466_v53 = vld [vmem:[%s6787_s2 + $0x3f8] sm:$0xff] }
  0xa8   : > { %v1264_v12 = vpop.xlane.xlu2 %1263  ;;  %v1261_v13 = vpop.xlane.xlu1 %1260  ;;  %3318 = vmatpush.msra.mxu0 %v2260_v0  ;;  %v2800_v45 = vsel %vm2799_vm8, %v2798_v25, %v2796_v31  ;;  %831 = vmatpush.msra.mxu2 %v512_v47  ;;  %v552_v25 = vld [vmem:[%s6787_s2 + $0x6a8] sm:$0xff]  ;;  %v4815_v31 = vadd.s32 4294967176, %v4557_v55  ;;  %v387_v47 = vld [vmem:[%s6787_s2 + $0x180] sm:$0xff] }
  0xa9   : > { %v1258_v19 = vpop.xlane.xlu0 %1257  ;;  %v2007_v27 = vmul.f32 0.0625, %v1261_v13  ;;  %903 = vmatpush.msrb.mxu1 %v557_v21  ;;  %v2008_v39 = vmul.f32 0.0625, %v1264_v12  ;;  %679 = vmatpush.msra.mxu3 %v391_v57  ;;  %v510_v12 = vld [vmem:[%s6787_s2 + $0x558] sm:$0xff]  ;;  %v4789_v13 = vadd.s32 4294967184, %v4557_v55  ;;  %v1034_v21 = vld [vmem:[%s4038_s8 + $0x1f0] sm:$0xff] }
  0xaa   : > { %v2006_v22 = vmul.f32 0.0625, %v1258_v19  ;;  %3319 = vmatpush.msra.mxu0 %v2259_v16  ;;  %832 = vmatpush.msra.mxu2 %v511_v61  ;;  %v553_v16 = vld [vmem:[%s6787_s2 + $0x6b0] sm:$0xff]  ;;  %v1415_v43 = vsel %vm1228_vm0, %v1034_v21, 0.0  ;;  %v506_v57 = vld [vmem:[%s6787_s2 + $0x538] sm:$0xff]  ;;  %v504_v21 = vld [vmem:[%s6787_s2 + $0x528] sm:$0xff] }
  0xab   : > { %v2806_v44 = vperm.slane %v2007_v27, %v4716_v26  ;;  %904 = vmatpush.msrb.mxu1 %v556_v36  ;;  %v2810_v63 = vperm.slane %v2008_v39, %v4737_v38  ;;  %680 = vmatpush.msra.mxu3 %v390_v11  ;;  %v2253_v27 = vld [vmem:[%s6789_s4] sm:$0xff]  ;;  %v508_v39 = vld [vmem:[%s6787_s2 + $0x548] sm:$0xff] }
  0xac   : > { %v2802_v32 = vperm.slane %v2006_v22, %v4696_v14  ;;  %3320 = vmatpush.msra.mxu0 %v2258_v30  ;;  %v509_v22 = vld [vmem:[%s6787_s2 + $0x550] sm:$0xff]  ;;  %833 = vmatpush.msra.mxu2 %v510_v12  ;;  %v548_v11 = vld [vmem:[%s6787_s2 + $0x688] sm:$0xff] }
  0xad   : > { %1398 = vadd.xlane.f32.xlu2 %v1397_v23  ;;  %1395 = vadd.xlane.f32.xlu1 %v1394_v24  ;;  %v1033_v24 = vld [vmem:[%s4038_s8 + $0x1e8] sm:$0xff] }
  0xae   : > { %1392 = vadd.xlane.f32.xlu0 %v1391_v28  ;;  %v2804_v49 = vsel %vm2803_vm9, %v2802_v32, %v2800_v45  ;;  %3321 = vmatpush.msra.mxu0 %v2257_v37  ;;  %v1032_v32 = vld [vmem:[%s4038_s8 + $0x1e0] sm:$0xff]  ;;  %v464_v12 = vld [vmem:[%s6787_s2 + $0x3e8] sm:$0xff] }
  0xaf   : > { %905 = vmatpush.msrb.mxu1 %v555_v48  ;;  %v2808_v6 = vsel %vm2807_vm10, %v2806_v44, %v2804_v49  ;;  %681 = vmatpush.msra.mxu3 %v389_v20  ;;  %v1412_v44 = vsel %vm1228_vm0, %v1033_v24, 0.0  ;;  %v1409_v46 = vsel %vm1228_vm0, %v1032_v32, 0.0  ;;  %v507_v49 = vld [vmem:[%s6787_s2 + $0x540] sm:$0xff]  ;;  %v462_v32 = vld [vmem:[%s6787_s2 + $0x3d8] sm:$0xff] }
  0xb0   : > { %v1273_v50 = vpop.xlane.xlu2 %1272  ;;  %v1270_v51 = vpop.xlane.xlu1 %1269  ;;  %3322 = vmatpush.msra.mxu0 %v2256_v56  ;;  %v2812_v19 = vsel %vm2811_vm11, %v2810_v63, %v2808_v6  ;;  %834 = vmatpush.msra.mxu2 %v509_v22  ;;  %v1037_v63 = vld [vmem:[%s4038_s8 + $0x208] sm:$0xff]  ;;  %v1035_v6 = vld [vmem:[%s4038_s8 + $0x1f8] sm:$0xff]  ;;  %v547_v22 = vld [vmem:[%s6787_s2 + $0x680] sm:$0xff] }
  0xb1   : > { %v1267_v59 = vpop.xlane.xlu0 %1266  ;;  %v2010_v0 = vmul.f32 0.0625, %v1270_v51  ;;  %906 = vmatpush.msrb.mxu1 %v554_v62  ;;  %v2011_v15 = vmul.f32 0.0625, %v1273_v50  ;;  %682 = vmatpush.msra.mxu3 %v388_v33  ;;  %v550_v51 = vld [vmem:[%s6787_s2 + $0x698] sm:$0xff]  ;;  %v465_v62 = vld [vmem:[%s6787_s2 + $0x3f0] sm:$0xff]  ;;  %v1418_v20 = vsel %vm1228_vm0, %v1035_v6, 0.0  ;;  %v459_v6 = vld [vmem:[%s6787_s2 + $0x3c0] sm:$0xff] }
  0xb2   : > { %v2009_v2 = vmul.f32 0.0625, %v1267_v59  ;;  %3323 = vmatpush.msra.mxu0 %v2255_v9  ;;  %733 = vmatmul.f32.gmra.mxu1 %v328_v34  ;;  %v549_v59 = vld [vmem:[%s6787_s2 + $0x690] sm:$0xff]  ;;  %v316_v9 = vld [vmem:[%s4149_s16 + $0x48] sm:$0xff] }
  0xb3   : > { %v2818_v18 = vperm.slane %v2010_v0, %v4765_v58  ;;  %907 = vmatpush.msrb.mxu1 %v553_v16  ;;  %v2822_v36 = vperm.slane %v2011_v15, %v4789_v13  ;;  %835 = vmatpush.msra.mxu2 %v508_v39  ;;  %v1036_v0 = vld [vmem:[%s4038_s8 + $0x200] sm:$0xff]  ;;  %v1424_v16 = vsel %vm1228_vm0, %v1037_v63, 0.0  ;;  %v2283_v33 = vld [vmem:[%s6789_s4 + $0xf0] sm:$0xff]  ;;  %v1039_v39 = vld [vmem:[%s4038_s8 + $0x218] sm:$0xff] }
  0xb4   : > { %v2814_v10 = vperm.slane %v2009_v2, %v4755_v52  ;;  %3324 = vmatpush.msra.mxu0 %v2254_v17  ;;  %683 = vmatpush.msra.mxu3 %v387_v47  ;;  %v1421_v17 = vsel %vm1228_vm0, %v1036_v0, 0.0  ;;  %v2281_v63 = vld [vmem:[%s6789_s4 + $0xe0] sm:$0xff]  ;;  %v500_v0 = vld [vmem:[%s6787_s2 + $0x508] sm:$0xff] }
  0xb5   : > { %1407 = vadd.xlane.f32.xlu2 %v1406_v60  ;;  %1404 = vadd.xlane.f32.xlu1 %v1403_v4 }
  0xb6   : > { %1401 = vadd.xlane.f32.xlu0 %v1400_v8  ;;  %v2816_v23 = vsel %vm2815_vm12, %v2814_v10, %v2812_v19  ;;  %908 = vmatpush.msrb.mxu1 %v552_v25  ;;  %v505_v8 = vld [vmem:[%s6787_s2 + $0x530] sm:$0xff]  ;;  %v2284_v25 = vld [vmem:[%s6789_s4 + $0xf8] sm:$0xff] }
  0xb7   : > { %3325 = vmatpush.msra.mxu0 %v2253_v27  ;;  %v2820_v45 = vsel %vm2819_vm13, %v2818_v18, %v2816_v23  ;;  %836 = vmatpush.msra.mxu2 %v507_v49  ;;  %v463_v23 = vld [vmem:[%s6787_s2 + $0x3e0] sm:$0xff]  ;;  %v2282_v49 = vld [vmem:[%s6789_s4 + $0xe8] sm:$0xff] }
  0xb8   : > { %v1282_v28 = vpop.xlane.xlu2 %1281  ;;  %v1279_v30 = vpop.xlane.xlu1 %1278  ;;  %909 = vmatpush.msrb.mxu1 %v551_v40  ;;  %v2824_v50 = vsel %vm2823_vm14, %v2822_v36, %v2820_v45  ;;  %760 = vmatpush.msrb.mxu3 %v466_v53  ;;  %v503_v27 = vld [vmem:[%s6787_s2 + $0x520] sm:$0xff]  ;;  %v502_v36 = vld [vmem:[%s6787_s2 + $0x518] sm:$0xff]  ;;  %v1038_v45 = vld [vmem:[%s4038_s8 + $0x210] sm:$0xff] }
  0xb9   : > { %v1276_v37 = vpop.xlane.xlu0 %1275  ;;  %v2014_v60 = vmul.f32 0.0625, %v1282_v28  ;;  %v2013_v61 = vmul.f32 0.0625, %v1279_v30  ;;  %837 = vmatpush.msra.mxu2 %v506_v57  ;;  %v325_v30 = vld [vmem:[%s4149_s16 + $0x90] sm:$0xff]  ;;  %v1430_v57 = vsel %vm1228_vm0, %v1039_v39, 0.0 }
  0xba   : > { %v2012_v41 = vmul.f32 0.0625, %v1276_v37  ;;  %910 = vmatpush.msrb.mxu1 %v550_v51  ;;  %761 = vmatpush.msrb.mxu3 %v465_v62  ;;  %v1040_v37 = vld [vmem:[%s4038_s8 + $0x220] sm:$0xff] }
  0xbb   : > { %v2830_v18 = vperm.slane %v2014_v60, %v4572_v1  ;;  %v2829_v19 = vperm.slane %v2013_v61, %v4557_v55  ;;  %838 = vmatpush.msra.mxu2 %v505_v8  ;;  %822 = vmatmul.f32.vlgmr.msra.gmra.mxu1 %v316_v9  ;;  %v460_v60 = vld [vmem:[%s6787_s2 + $0x3c8] sm:$0xff]  ;;  %v2280_v8 = vld [vmem:[%s6789_s4 + $0xd8] sm:$0xff]  ;;  %v499_v9 = vld [vmem:[%s6787_s2 + $0x500] sm:$0xff] }
  0xbc   : > { %v2826_v48 = vperm.slane %v2012_v41, %v4815_v31  ;;  %911 = vmatpush.msrb.mxu1 %v549_v59  ;;  %762 = vmatpush.msrb.mxu3 %v464_v12  ;;  %v1427_v59 = vsel %vm1228_vm0, %v1038_v45, 0.0  ;;  %v458_v12 = vld [vmem:[%s6787_s2 + $0x3b8] sm:$0xff]  ;;  %v576_v45 = vld [vmem:[%s6787_s2 + $0x768] sm:$0xff] }
  0xbd   : > { %1416 = vadd.xlane.f32.xlu2 %v1415_v43  ;;  %1413 = vadd.xlane.f32.xlu1 %v1412_v44  ;;  %v2831_v34 = vsel %vm2771_vm1, %v2830_v18, %v2829_v19  ;;  %v461_v44 = vld [vmem:[%s6787_s2 + $0x3d0] sm:$0xff] }
  0xbe   : > { %1410 = vadd.xlane.f32.xlu0 %v1409_v46  ;;  %v2828_v56 = vsel %vm2827_vm15, %v2826_v48, %v2824_v50  ;;  %912 = vmatpush.msrb.mxu1 %v548_v11  ;;  %v332_v46 = vld [vmem:[%s4149_s16 + $0xc8] sm:$0xff]  ;;  %v501_v50 = vld [vmem:[%s6787_s2 + $0x510] sm:$0xff] }
  0xbf   : > { %3326 = vmatmul.f32.vlgmr.msra.gmra.mxu0 %v2828_v56  ;;  %839 = vmatpush.msra.mxu2 %v504_v21  ;;  %v1433_v56 = vsel %vm1228_vm0, %v1040_v37, 0.0  ;;  %v313_v11 = vld [vmem:[%s4149_s16 + $0x30] sm:$0xff]  ;;  %v1043_v21 = vld [vmem:[%s4038_s8 + $0x238] sm:$0xff] }
  0xc0   : > { %v1291_v2 = vpop.xlane.xlu2 %1290  ;;  %v1288_v4 = vpop.xlane.xlu1 %1287  ;;  %913 = vmatpush.msrb.mxu1 %v547_v22  ;;  %763 = vmatpush.msrb.mxu3 %v463_v23  ;;  %v1042_v22 = vld [vmem:[%s4038_s8 + $0x230] sm:$0xff]  ;;  %v1442_v37 = vsel %vm1228_vm0, %v1043_v21, 0.0 }
  0xc1   : > { %v1285_v10 = vpop.xlane.xlu0 %1284  ;;  %v2016_v24 = vmul.f32 0.0625, %v1288_v4  ;;  %v2017_v40 = vmul.f32 0.0625, %v1291_v2  ;;  %840 = vmatpush.msra.mxu2 %v503_v27  ;;  %v1041_v27 = vld [vmem:[%s4038_s8 + $0x228] sm:$0xff]  ;;  %v1439_v39 = vsel %vm1228_vm0, %v1042_v22, 0.0 }
  0xc2   : > { %v2015_v15 = vmul.f32 0.0625, %v1285_v10  ;;  %3330 = vmatpush.msra.mxu1 %v2284_v25  ;;  %664 = vmatmul.f32.gmra.mxu2 %v325_v30  ;;  %v457_v25 = vld [vmem:[%s6787_s2 + $0x3b0] sm:$0xff] }
  0xc3   : > { %v2834_v47 = vperm.slane %v2016_v24, %v4585_v7  ;;  %764 = vmatpush.msrb.mxu3 %v462_v32  ;;  %841 = vmatpush.msra.mxu2 %v502_v36  ;;  %v2836_v61 = vperm.slane %v2017_v40, %v4624_v29  ;;  %v577_v32 = vld [vmem:[%s6787_s2 + $0x770] sm:$0xff] }
  0xc4   : > { %v2832_v28 = vperm.slane %v2015_v15, %v4582_v5  ;;  %3331 = vmatpush.msra.mxu1 %v2283_v33  ;;  %v578_v15 = vld [vmem:[%s6787_s2 + $0x778] sm:$0xff]  ;;  %v2278_v33 = vld [vmem:[%s6789_s4 + $0xc8] sm:$0xff] }
  0xc5   : > { %1425 = vadd.xlane.f32.xlu2 %v1424_v16  ;;  %1422 = vadd.xlane.f32.xlu1 %v1421_v17 }
  0xc6   : > { %1419 = vadd.xlane.f32.xlu0 %v1418_v20  ;;  %v2833_v51 = vsel %vm2775_vm2, %v2832_v28, %v2831_v34  ;;  %765 = vmatpush.msrb.mxu3 %v461_v44  ;;  %v2279_v20 = vld [vmem:[%s6789_s4 + $0xd0] sm:$0xff]  ;;  %v320_v28 = vld [vmem:[%s4149_s16 + $0x68] sm:$0xff] }
  0xc7   : > { %825 = vmatmul.f32.gmra.mxu1 %v332_v46  ;;  %842 = vmatpush.msra.mxu2 %v501_v50  ;;  %v2835_v2 = vsel %vm6793_vm3, %v2834_v47, %v2833_v51  ;;  %v456_v44 = vld [vmem:[%s6787_s2 + $0x3a8] sm:$0xff]  ;;  %v2277_v46 = vld [vmem:[%s6789_s4 + $0xc0] sm:$0xff] }
  0xc8   : > { %v1300_v41 = vpop.xlane.xlu2 %1299  ;;  %v1297_v43 = vpop.xlane.xlu1 %1296  ;;  %3332 = vmatpush.msra.mxu1 %v2282_v49  ;;  %766 = vmatpush.msrb.mxu3 %v460_v60  ;;  %v2837_v17 = vsel %vm2783_vm4, %v2836_v61, %v2835_v2  ;;  %v575_v51 = vld [vmem:[%s6787_s2 + $0x760] sm:$0xff]  ;;  %v454_v60 = vld [vmem:[%s6787_s2 + $0x398] sm:$0xff]  ;;  %v1046_v2 = vld [vmem:[%s4038_s8 + $0x250] sm:$0xff] }
  0xc9   : > { %v1294_v48 = vpop.xlane.xlu0 %1293  ;;  %v2019_v62 = vmul.f32 0.0625, %v1297_v43  ;;  %v2020_v10 = vmul.f32 0.0625, %v1300_v41  ;;  %843 = vmatpush.msra.mxu2 %v500_v0  ;;  %v1436_v43 = vsel %vm1228_vm0, %v1041_v27, 0.0  ;;  %v574_v61 = vld [vmem:[%s6787_s2 + $0x758] sm:$0xff]  ;;  %v2275_v0 = vld [vmem:[%s6789_s4 + $0xb0] sm:$0xff]  ;;  %v572_v27 = vld [vmem:[%s6787_s2 + $0x748] sm:$0xff] }
  0xca   : > { %v2018_v53 = vmul.f32 0.0625, %v1294_v48  ;;  %3333 = vmatpush.msra.mxu1 %v2281_v63  ;;  %767 = vmatpush.msrb.mxu3 %v459_v6  ;;  %v455_v48 = vld [vmem:[%s6787_s2 + $0x3a0] sm:$0xff] }
  0xcb   : > { %v2840_v16 = vperm.slane %v2019_v62, %v4644_v42  ;;  %844 = vmatpush.msra.mxu2 %v499_v9  ;;  %v2842_v34 = vperm.slane %v2020_v10, %v4662_v54  ;;  %v329_v62 = vld [vmem:[%s4149_s16 + $0xb0] sm:$0xff] }
  0xcc   : > { %v2838_v4 = vperm.slane %v2018_v53, %v4636_v35  ;;  %3334 = vmatpush.msra.mxu1 %v2280_v8  ;;  %753 = vmatmul.f32.vlgmr.msrb.gmra.mxu2 %v313_v11  ;;  %v2276_v53 = vld [vmem:[%s6789_s4 + $0xb8] sm:$0xff]  ;;  %v453_v10 = vld [vmem:[%s6787_s2 + $0x390] sm:$0xff]  ;;  %v1044_v11 = vld [vmem:[%s4038_s8 + $0x240] sm:$0xff] }
  0xcd   : > { %1434 = vadd.xlane.f32.xlu2 %v1433_v56  ;;  %1431 = vadd.xlane.f32.xlu1 %v1430_v57  ;;  %v1445_v22 = vsel %vm1228_vm0, %v1044_v11, 0.0 }
  0xce   : > { %1428 = vadd.xlane.f32.xlu0 %v1427_v59  ;;  %v2839_v23 = vsel %vm2787_vm5, %v2838_v4, %v2837_v17  ;;  %768 = vmatpush.msrb.mxu3 %v458_v12  ;;  %v1045_v4 = vld [vmem:[%s4038_s8 + $0x248] sm:$0xff] }
  0xcf   : > { %921 = vmatpush.msrb.mxu2 %v578_v15  ;;  %3335 = vmatpush.msra.mxu1 %v2279_v20  ;;  %v2841_v40 = vsel %vm2791_vm6, %v2840_v16, %v2839_v23  ;;  %v336_v12 = vld [vmem:[%s4149_s16 + $0xe8] sm:$0xff]  ;;  %v573_v16 = vld [vmem:[%s6787_s2 + $0x750] sm:$0xff]  ;;  %v1448_v20 = vsel %vm1228_vm0, %v1045_v4, 0.0 }
  0xd0   : > { %v1309_v18 = vpop.xlane.xlu2 %1308  ;;  %v1306_v19 = vpop.xlane.xlu1 %1305  ;;  %769 = vmatpush.msrb.mxu3 %v457_v25  ;;  %914 = vmatmul.f32.vlgmr.msrb.gmra.mxu1 %v320_v28  ;;  %v2843_v50 = vsel %vm2795_vm7, %v2842_v34, %v2841_v40  ;;  %v2274_v17 = vld [vmem:[%s6789_s4 + $0xa8] sm:$0xff]  ;;  %v2273_v28 = vld [vmem:[%s6789_s4 + $0xa0] sm:$0xff] }
  0xd1   : > { %v1303_v24 = vpop.xlane.xlu0 %1302  ;;  %v2022_v36 = vmul.f32 0.0625, %v1306_v19  ;;  %922 = vmatpush.msrb.mxu2 %v577_v32  ;;  %3336 = vmatpush.msra.mxu1 %v2278_v33  ;;  %v2023_v47 = vmul.f32 0.0625, %v1309_v18  ;;  %v1451_v19 = vsel %vm1228_vm0, %v1046_v2, 0.0  ;;  %v452_v23 = vld [vmem:[%s6787_s2 + $0x388] sm:$0xff]  ;;  %v451_v32 = vld [vmem:[%s6787_s2 + $0x380] sm:$0xff] }
  0xd2   : > { %v2021_v30 = vmul.f32 0.0625, %v1303_v24  ;;  %770 = vmatpush.msrb.mxu3 %v456_v44  ;;  %v317_v44 = vld [vmem:[%s4149_s16 + $0x50] sm:$0xff] }
  0xd3   : > { %v2846_v49 = vperm.slane %v2022_v36, %v4696_v14  ;;  %923 = vmatpush.msrb.mxu2 %v576_v45  ;;  %3337 = vmatpush.msra.mxu1 %v2277_v46  ;;  %v2848_v6 = vperm.slane %v2023_v47, %v4716_v26  ;;  %v571_v36 = vld [vmem:[%s6787_s2 + $0x740] sm:$0xff]  ;;  %v530_v46 = vld [vmem:[%s6787_s2 + $0x5f8] sm:$0xff] }
  0xd4   : > { %v2844_v41 = vperm.slane %v2021_v30, %v4686_v3  ;;  %771 = vmatpush.msrb.mxu3 %v455_v48  ;;  %756 = vmatmul.f32.gmra.mxu2 %v329_v62  ;;  %v570_v47 = vld [vmem:[%s6787_s2 + $0x738] sm:$0xff]  ;;  %v1049_v48 = vld [vmem:[%s4038_s8 + $0x268] sm:$0xff] }
  0xd5   : > { %1443 = vadd.xlane.f32.xlu2 %v1442_v37  ;;  %1440 = vadd.xlane.f32.xlu1 %v1439_v39  ;;  %v2272_v37 = vld [vmem:[%s6789_s4 + $0x98] sm:$0xff]  ;;  %v1460_v62 = vsel %vm1228_vm0, %v1049_v48, 0.0 }
  0xd6   : > { %1437 = vadd.xlane.f32.xlu0 %v1436_v43  ;;  %v2845_v56 = vsel %vm2799_vm8, %v2844_v41, %v2843_v50  ;;  %924 = vmatpush.msrb.mxu2 %v575_v51  ;;  %v310_v43 = vld [vmem:[%s4149_s16 + $0x18] sm:$0xff]  ;;  %v2271_v50 = vld [vmem:[%s6789_s4 + $0x90] sm:$0xff]  ;;  %v1048_v51 = vld [vmem:[%s4038_s8 + $0x260] sm:$0xff] }
  0xd7   : > { %3338 = vmatpush.msra.mxu1 %v2276_v53  ;;  %v2847_v15 = vsel %vm2803_vm9, %v2846_v49, %v2845_v56  ;;  %772 = vmatpush.msrb.mxu3 %v454_v60  ;;  %v1047_v53 = vld [vmem:[%s4038_s8 + $0x258] sm:$0xff] }
  0xd8   : > { %v1318_v57 = vpop.xlane.xlu2 %1317  ;;  %v1315_v59 = vpop.xlane.xlu1 %1314  ;;  %925 = vmatpush.msrb.mxu2 %v574_v61  ;;  %917 = vmatmul.f32.gmra.mxu1 %v336_v12  ;;  %v2849_v25 = vsel %vm2807_vm10, %v2848_v6, %v2847_v15  ;;  %v2270_v61 = vld [vmem:[%s6789_s4 + $0x88] sm:$0xff]  ;;  %v1454_v2 = vsel %vm1228_vm0, %v1047_v53, 0.0  ;;  %v527_v12 = vld [vmem:[%s6787_s2 + $0x5e0] sm:$0xff]  ;;  %v522_v53 = vld [vmem:[%s6787_s2 + $0x5b8] sm:$0xff] }
  0xd9   : > { %v1312_v63 = vpop.xlane.xlu0 %1311  ;;  %v2025_v8 = vmul.f32 0.0625, %v1315_v59  ;;  %3339 = vmatpush.msra.mxu1 %v2275_v0  ;;  %v2026_v21 = vmul.f32 0.0625, %v1318_v57  ;;  %773 = vmatpush.msrb.mxu3 %v453_v10  ;;  %v529_v57 = vld [vmem:[%s6787_s2 + $0x5f0] sm:$0xff]  ;;  %v1457_v0 = vsel %vm1228_vm0, %v1048_v51, 0.0  ;;  %v528_v6 = vld [vmem:[%s6787_s2 + $0x5e8] sm:$0xff]  ;;  %v563_v51 = vld [vmem:[%s6787_s2 + $0x700] sm:$0xff] }
  0xda   : > { %v2024_v9 = vmul.f32 0.0625, %v1312_v63  ;;  %926 = vmatpush.msrb.mxu2 %v573_v16  ;;  %684 = vmatmul.f32.vlgmr.msra.gmra.mxu3 %v310_v43  ;;  %v569_v59 = vld [vmem:[%s6787_s2 + $0x730] sm:$0xff]  ;;  %v564_v43 = vld [vmem:[%s6787_s2 + $0x708] sm:$0xff] }
  0xdb   : > { %v2852_v24 = vperm.slane %v2025_v8, %v4755_v52  ;;  %3340 = vmatpush.msra.mxu1 %v2274_v17  ;;  %774 = vmatpush.msrb.mxu3 %v452_v23  ;;  %v2854_v39 = vperm.slane %v2026_v21, %v4765_v58  ;;  %v568_v8 = vld [vmem:[%s6787_s2 + $0x728] sm:$0xff]  ;;  %v326_v21 = vld [vmem:[%s4149_s16 + $0x98] sm:$0xff] }
  0xdc   : > { %v2850_v18 = vperm.slane %v2024_v9, %v4737_v38  ;;  %927 = vmatpush.msrb.mxu2 %v572_v27  ;;  %v2269_v9 = vld [vmem:[%s6789_s4 + $0x80] sm:$0xff]  ;;  %v1051_v23 = vld [vmem:[%s4038_s8 + $0x278] sm:$0xff]  ;;  %v1050_v27 = vld [vmem:[%s4038_s8 + $0x270] sm:$0xff] }
  0xdd   : > { %1452 = vadd.xlane.f32.xlu2 %v1451_v19  ;;  %1449 = vadd.xlane.f32.xlu1 %v1448_v20  ;;  %v567_v19 = vld [vmem:[%s6787_s2 + $0x720] sm:$0xff] }
  0xde   : > { %v2851_v30 = vsel %vm2811_vm11, %v2850_v18, %v2849_v25  ;;  %1446 = vadd.xlane.f32.xlu0 %v1445_v22  ;;  %3341 = vmatpush.msra.mxu1 %v2273_v28  ;;  %v1052_v20 = vld [vmem:[%s4038_s8 + $0x280] sm:$0xff]  ;;  %v526_v22 = vld [vmem:[%s6787_s2 + $0x5d8] sm:$0xff] }
  0xdf   : > { %775 = vmatpush.msrb.mxu3 %v451_v32  ;;  %v2853_v49 = vsel %vm2815_vm12, %v2852_v24, %v2851_v30  ;;  %928 = vmatpush.msrb.mxu2 %v571_v36  ;;  %v333_v24 = vld [vmem:[%s4149_s16 + $0xd0] sm:$0xff]  ;;  %v566_v25 = vld [vmem:[%s6787_s2 + $0x718] sm:$0xff]  ;;  %v1469_v32 = vsel %vm1228_vm0, %v1052_v20, 0.0 }
  0xe0   : > { %v1327_v33 = vpop.xlane.xlu2 %1326  ;;  %v1324_v34 = vpop.xlane.xlu1 %1323  ;;  %3342 = vmatpush.msra.mxu1 %v2272_v37  ;;  %845 = vmatmul.f32.vlgmr.msra.gmra.mxu2 %v317_v44  ;;  %v2855_v63 = vsel %vm2819_vm13, %v2854_v39, %v2853_v49  ;;  %v525_v30 = vld [vmem:[%s6787_s2 + $0x5d0] sm:$0xff]  ;;  %v1466_v37 = vsel %vm1228_vm0, %v1051_v23, 0.0  ;;  %v1463_v39 = vsel %vm1228_vm0, %v1050_v27, 0.0 }
  0xe1   : > { %v2028_v40 = vmul.f32 0.0625, %v1324_v34  ;;  %v1321_v41 = vpop.xlane.xlu0 %1320  ;;  %852 = vmatpush.msra.mxu3 %v530_v46  ;;  %929 = vmatpush.msrb.mxu2 %v570_v47  ;;  %v2029_v17 = vmul.f32 0.0625, %v1327_v33  ;;  %v565_v36 = vld [vmem:[%s6787_s2 + $0x710] sm:$0xff]  ;;  %v523_v47 = vld [vmem:[%s6787_s2 + $0x5c0] sm:$0xff] }
  0xe2   : > { %v2027_v45 = vmul.f32 0.0625, %v1321_v41  ;;  %3343 = vmatpush.msra.mxu1 %v2271_v50  ;;  %687 = vmatmul.f32.gmra.mxu3 %v326_v21 }
  0xe3   : > { %v2858_v60 = vperm.slane %v2028_v40, %v4815_v31  ;;  %853 = vmatpush.msra.mxu3 %v529_v57  ;;  %930 = vmatpush.msrb.mxu2 %v569_v59  ;;  %v2860_v33 = vperm.slane %v2029_v17, %v4557_v55  ;;  %v524_v40 = vld [vmem:[%s6787_s2 + $0x5c8] sm:$0xff]  ;;  %v2300_v57 = vld [vmem:[%s6789_s4 + $0x178] sm:$0xff] }
  0xe4   : > { %v2856_v56 = vperm.slane %v2027_v45, %v4789_v13  ;;  %3344 = vmatpush.msra.mxu1 %v2270_v61  ;;  %v1055_v59 = vld [vmem:[%s4038_s8 + $0x298] sm:$0xff] }
  0xe5   : > { %1461 = vadd.xlane.f32.xlu2 %v1460_v62  ;;  %1458 = vadd.xlane.f32.xlu1 %v1457_v0  ;;  %v321_v0 = vld [vmem:[%s4149_s16 + $0x70] sm:$0xff] }
  0xe6   : > { %v2857_v4 = vsel %vm2823_vm14, %v2856_v56, %v2855_v63  ;;  %1455 = vadd.xlane.f32.xlu0 %v1454_v2  ;;  %854 = vmatpush.msra.mxu3 %v528_v6  ;;  %v314_v56 = vld [vmem:[%s4149_s16 + $0x38] sm:$0xff]  ;;  %v1053_v63 = vld [vmem:[%s4038_s8 + $0x288] sm:$0xff]  ;;  %v521_v6 = vld [vmem:[%s6787_s2 + $0x5b0] sm:$0xff] }
  0xe7   : > { %v2859_v15 = vsel %vm2827_vm15, %v2858_v60, %v2857_v4  ;;  %931 = vmatpush.msrb.mxu2 %v568_v8  ;;  %3345 = vmatpush.msra.mxu1 %v2269_v9  ;;  %v1054_v60 = vld [vmem:[%s4038_s8 + $0x290] sm:$0xff]  ;;  %v1478_v9 = vsel %vm1228_vm0, %v1055_v59, 0.0 }
  0xe8   : > { %v1336_v10 = vpop.xlane.xlu2 %1335  ;;  %v1333_v11 = vpop.xlane.xlu1 %1332  ;;  %855 = vmatpush.msra.mxu3 %v527_v12  ;;  %3346 = vmatmul.f32.vlgmr.msra.gmra.mxu1 %v2859_v15  ;;  %v2299_v8 = vld [vmem:[%s6789_s4 + $0x170] sm:$0xff]  ;;  %v1472_v12 = vsel %vm1228_vm0, %v1053_v63, 0.0  ;;  %v520_v15 = vld [vmem:[%s6787_s2 + $0x5a8] sm:$0xff]  ;;  %v2293_v63 = vld [vmem:[%s6789_s4 + $0x140] sm:$0xff] }
  0xe9   : > { %v1330_v16 = vpop.xlane.xlu0 %1329  ;;  %v2031_v28 = vmul.f32 0.0625, %v1333_v11  ;;  %932 = vmatpush.msrb.mxu2 %v567_v19  ;;  %v2032_v41 = vmul.f32 0.0625, %v1336_v10  ;;  %v1475_v10 = vsel %vm1228_vm0, %v1054_v60, 0.0 }
  0xea   : > { %v2030_v18 = vmul.f32 0.0625, %v1330_v16  ;;  %856 = vmatpush.msra.mxu3 %v526_v22  ;;  %848 = vmatmul.f32.gmra.mxu2 %v333_v24  ;;  %v519_v22 = vld [vmem:[%s6787_s2 + $0x5a0] sm:$0xff] }
  0xeb   : > { %933 = vmatpush.msrb.mxu2 %v566_v25  ;;  %v2863_v46 = vperm.slane %v2031_v28, %v4582_v5  ;;  %v2865_v61 = vperm.slane %v2032_v41, %v4585_v7  ;;  %776 = vmatmul.f32.vlgmr.msrb.gmra.mxu3 %v314_v56  ;;  %v2297_v24 = vld [vmem:[%s6789_s4 + $0x160] sm:$0xff]  ;;  %v517_v41 = vld [vmem:[%s6787_s2 + $0x590] sm:$0xff]  ;;  %v2294_v56 = vld [vmem:[%s6789_s4 + $0x148] sm:$0xff] }
  0xec   : > { %v2861_v34 = vperm.slane %v2030_v18, %v4572_v1  ;;  %857 = vmatpush.msra.mxu3 %v525_v30  ;;  %v2298_v18 = vld [vmem:[%s6789_s4 + $0x168] sm:$0xff]  ;;  %v518_v30 = vld [vmem:[%s6787_s2 + $0x598] sm:$0xff] }
  0xed   : > { %1470 = vadd.xlane.f32.xlu2 %v1469_v32  ;;  %934 = vmatpush.msrb.mxu2 %v565_v36  ;;  %v1058_v32 = vld [vmem:[%s4038_s8 + $0x2b0] sm:$0xff] }
  0xee   : > { %1467 = vadd.xlane.f32.xlu1 %v1466_v37  ;;  %v2862_v49 = vsel %vm2771_vm1, %v2861_v34, %v2860_v33  ;;  %1464 = vadd.xlane.f32.xlu0 %v1463_v39  ;;  %v330_v33 = vld [vmem:[%s4149_s16 + $0xb8] sm:$0xff]  ;;  %v1057_v39 = vld [vmem:[%s4038_s8 + $0x2a8] sm:$0xff] }
  0xef   : > { %858 = vmatpush.msra.mxu3 %v524_v40  ;;  %935 = vmatpush.msrb.mxu2 %v564_v43  ;;  %v2864_v2 = vsel %vm2775_vm2, %v2863_v46, %v2862_v49  ;;  %v2296_v37 = vld [vmem:[%s6789_s4 + $0x158] sm:$0xff]  ;;  %v1056_v40 = vld [vmem:[%s4038_s8 + $0x2a0] sm:$0xff]  ;;  %v337_v43 = vld [vmem:[%s4149_s16 + $0xf0] sm:$0xff]  ;;  %v1487_v46 = vsel %vm1228_vm0, %v1058_v32, 0.0  ;;  %v1484_v49 = vsel %vm1228_vm0, %v1057_v39, 0.0 }
  0xf0   : > { %v1345_v44 = vpop.xlane.xlu2 %1344  ;;  %v1342_v45 = vpop.xlane.xlu1 %1341  ;;  %v2866_v17 = vsel %vm6793_vm3, %v2865_v61, %v2864_v2  ;;  %v2289_v39 = vld [vmem:[%s6789_s4 + $0x120] sm:$0xff] }
  0xf1   : > { %v1339_v48 = vpop.xlane.xlu0 %1338  ;;  %859 = vmatpush.msra.mxu3 %v523_v47  ;;  %v2034_v62 = vmul.f32 0.0625, %v1342_v45  ;;  %936 = vmatpush.msrb.mxu2 %v563_v51  ;;  %v2035_v11 = vmul.f32 0.0625, %v1345_v44  ;;  %v2295_v45 = vld [vmem:[%s6789_s4 + $0x150] sm:$0xff] }
  0xf2   : > { %v2033_v50 = vmul.f32 0.0625, %v1339_v48  ;;  %937 = vmatmul.f32.vlgmr.msrb.gmra.mxu2 %v321_v0 }
  0xf3   : > { %860 = vmatpush.msra.mxu3 %v522_v53  ;;  %3350 = vmatpush.msra.mxu2 %v2300_v57  ;;  %v2869_v16 = vperm.slane %v2034_v62, %v4636_v35  ;;  %v2871_v27 = vperm.slane %v2035_v11, %v4644_v42  ;;  %v516_v53 = vld [vmem:[%s6787_s2 + $0x588] sm:$0xff]  ;;  %v515_v62 = vld [vmem:[%s6787_s2 + $0x580] sm:$0xff] }
  0xf4   : > { %v2867_v4 = vperm.slane %v2033_v50, %v4624_v29  ;;  %779 = vmatmul.f32.gmra.mxu3 %v330_v33  ;;  %v1481_v50 = vsel %vm1228_vm0, %v1056_v40, 0.0  ;;  %v1060_v11 = vld [vmem:[%s4038_s8 + $0x2c0] sm:$0xff] }
  0xf5   : > { %861 = vmatpush.msra.mxu3 %v521_v6  ;;  %3351 = vmatpush.msra.mxu2 %v2299_v8  ;;  %v594_v6 = vld [vmem:[%s6787_s2 + $0x7f8] sm:$0xff]  ;;  %v1061_v8 = vld [vmem:[%s4038_s8 + $0x2c8] sm:$0xff]  ;;  %v591_v33 = vld [vmem:[%s6787_s2 + $0x7e0] sm:$0xff] }
  0xf6   : > { %v2868_v21 = vsel %vm2783_vm4, %v2867_v4, %v2866_v17  ;;  %1479 = vadd.xlane.f32.xlu2 %v1478_v9  ;;  %1476 = vadd.xlane.f32.xlu1 %v1475_v10  ;;  %v2292_v10 = vld [vmem:[%s6789_s4 + $0x138] sm:$0xff] }
  0xf7   : > { %1473 = vadd.xlane.f32.xlu0 %v1472_v12  ;;  %862 = vmatpush.msra.mxu3 %v520_v15  ;;  %v2870_v34 = vsel %vm2787_vm5, %v2869_v16, %v2868_v21  ;;  %v318_v12 = vld [vmem:[%s4149_s16 + $0x58] sm:$0xff]  ;;  %v593_v16 = vld [vmem:[%s6787_s2 + $0x7f0] sm:$0xff]  ;;  %v1496_v21 = vsel %vm1228_vm0, %v1061_v8, 0.0  ;;  %v587_v8 = vld [vmem:[%s6787_s2 + $0x7c0] sm:$0xff] }
  0xf8   : > { %v1354_v19 = vpop.xlane.xlu2 %1353  ;;  %v1351_v20 = vpop.xlane.xlu1 %1350  ;;  %3352 = vmatpush.msra.mxu2 %v2298_v18  ;;  %v2872_v48 = vsel %vm2791_vm6, %v2871_v27, %v2870_v34  ;;  %v1059_v17 = vld [vmem:[%s4038_s8 + $0x2b8] sm:$0xff]  ;;  %v2290_v27 = vld [vmem:[%s6789_s4 + $0x128] sm:$0xff] }
  0xf9   : > { %v1348_v23 = vpop.xlane.xlu0 %1347  ;;  %v2037_v28 = vmul.f32 0.0625, %v1351_v20  ;;  %863 = vmatpush.msra.mxu3 %v519_v22  ;;  %v2038_v44 = vmul.f32 0.0625, %v1354_v19  ;;  %v2291_v20 = vld [vmem:[%s6789_s4 + $0x130] sm:$0xff] }
  0xfa   : > { %v2036_v25 = vmul.f32 0.0625, %v1348_v23  ;;  %3353 = vmatpush.msra.mxu2 %v2297_v24  ;;  %v592_v23 = vld [vmem:[%s6787_s2 + $0x7e8] sm:$0xff]  ;;  %v1493_v24 = vsel %vm1228_vm0, %v1060_v11, 0.0  ;;  %v586_v11 = vld [vmem:[%s6787_s2 + $0x7b8] sm:$0xff] }
  0xfb   : > { %864 = vmatpush.msra.mxu3 %v518_v30  ;;  %v2875_v47 = vperm.slane %v2037_v28, %v4686_v3  ;;  %940 = vmatmul.f32.gmra.mxu2 %v337_v43  ;;  %v2877_v61 = vperm.slane %v2038_v44, %v4696_v14  ;;  %v590_v43 = vld [vmem:[%s6787_s2 + $0x7d8] sm:$0xff]  ;;  %v1064_v44 = vld [vmem:[%s4038_s8 + $0x2e0] sm:$0xff] }
  0xfc   : > { %v2873_v36 = vperm.slane %v2036_v25, %v4662_v54  ;;  %3354 = vmatpush.msra.mxu2 %v2296_v37  ;;  %v1490_v25 = vsel %vm1228_vm0, %v1059_v17, 0.0  ;;  %v585_v17 = vld [vmem:[%s6787_s2 + $0x7b0] sm:$0xff] }
  0xfd   : > { %865 = vmatpush.msra.mxu3 %v517_v41 }
  0xfe   : > { %v2874_v51 = vsel %vm2795_vm7, %v2873_v36, %v2872_v48  ;;  %3355 = vmatpush.msra.mxu2 %v2295_v45  ;;  %1488 = vadd.xlane.f32.xlu2 %v1487_v46  ;;  %v1063_v48 = vld [vmem:[%s4038_s8 + $0x2d8] sm:$0xff] }
  0xff   : > { %1485 = vadd.xlane.f32.xlu1 %v1484_v49  ;;  %1482 = vadd.xlane.f32.xlu0 %v1481_v50  ;;  %v2876_v4 = vsel %vm2799_vm8, %v2875_v47, %v2874_v51  ;;  %v2288_v47 = vld [vmem:[%s6789_s4 + $0x118] sm:$0xff]  ;;  %v589_v50 = vld [vmem:[%s6787_s2 + $0x7d0] sm:$0xff] }
 0x100   : > { %v1363_v57 = vpop.xlane.xlu2 %1362  ;;  %v1360_v59 = vpop.xlane.xlu1 %1359  ;;  %866 = vmatpush.msra.mxu3 %v516_v53  ;;  %3356 = vmatpush.msra.mxu2 %v2294_v56  ;;  %v2878_v19 = vsel %vm2803_vm9, %v2877_v61, %v2876_v4  ;;  %v334_v49 = vld [vmem:[%s4149_s16 + $0xd8] sm:$0xff]  ;;  %v1062_v51 = vld [vmem:[%s4038_s8 + $0x2d0] sm:$0xff]  ;;  %v588_v61 = vld [vmem:[%s6787_s2 + $0x7c8] sm:$0xff] }
 0x101   : > { %v1357_v60 = vpop.xlane.xlu0 %1356  ;;  %v2040_v0 = vmul.f32 0.0625, %v1360_v59  ;;  %v2041_v15 = vmul.f32 0.0625, %v1363_v57  ;;  %v2287_v56 = vld [vmem:[%s6789_s4 + $0x110] sm:$0xff]  ;;  %v1505_v57 = vsel %vm1228_vm0, %v1064_v44, 0.0 }
 0x102   : > { %v2039_v2 = vmul.f32 0.0625, %v1357_v60  ;;  %867 = vmatpush.msra.mxu3 %v515_v62  ;;  %3357 = vmatpush.msra.mxu2 %v2293_v63  ;;  %v1502_v62 = vsel %vm1228_vm0, %v1063_v48, 0.0  ;;  %v1499_v63 = vsel %vm1228_vm0, %v1062_v51, 0.0 }
 0x103   : > { %v2881_v18 = vperm.slane %v2040_v0, %v4737_v38  ;;  %868 = vmatmul.f32.vlgmr.msra.gmra.mxu3 %v318_v12  ;;  %v2883_v32 = vperm.slane %v2041_v15, %v4755_v52  ;;  %v2286_v0 = vld [vmem:[%s6789_s4 + $0x108] sm:$0xff]  ;;  %v1067_v15 = vld [vmem:[%s4038_s8 + $0x2f8] sm:$0xff] }
 0x104   : > { %v2879_v9 = vperm.slane %v2039_v2, %v4716_v26  ;;  %944 = vmatpush.msrb.mxu3 %v594_v6  ;;  %3358 = vmatpush.msra.mxu2 %v2292_v10  ;;  %v2285_v10 = vld [vmem:[%s6789_s4 + $0x100] sm:$0xff] }
 0x106   : > { %v2880_v22 = vsel %vm2807_vm10, %v2879_v9, %v2878_v19  ;;  %945 = vmatpush.msrb.mxu3 %v593_v16  ;;  %3359 = vmatpush.msra.mxu2 %v2291_v20  ;;  %v1066_v16 = vld [vmem:[%s4038_s8 + $0x2f0] sm:$0xff]  ;;  %v1514_v19 = vsel %vm1228_vm0, %v1067_v15, 0.0  ;;  %v584_v20 = vld [vmem:[%s6787_s2 + $0x7a8] sm:$0xff] }
 0x107   : > { %1497 = vadd.xlane.f32.xlu2 %v1496_v21  ;;  %v2882_v37 = vsel %vm2811_vm11, %v2881_v18, %v2880_v22  ;;  %1494 = vadd.xlane.f32.xlu1 %v1493_v24  ;;  %v1065_v18 = vld [vmem:[%s4038_s8 + $0x2e8] sm:$0xff]  ;;  %v1511_v21 = vsel %vm1228_vm0, %v1066_v16, 0.0 }
 0x108   : > { %v1372_v28 = vpop.xlane.xlu2 %1371  ;;  %v1369_v30 = vpop.xlane.xlu1 %1368  ;;  %946 = vmatpush.msrb.mxu3 %v592_v23  ;;  %1491 = vadd.xlane.f32.xlu0 %v1490_v25  ;;  %v2884_v53 = vsel %vm2815_vm12, %v2883_v32, %v2882_v37  ;;  %v1508_v22 = vsel %vm1228_vm0, %v1065_v18, 0.0  ;;  %v582_v32 = vld [vmem:[%s6787_s2 + $0x798] sm:$0xff] }
 0x109   : > { %v2043_v34 = vmul.f32 0.0625, %v1369_v30  ;;  %v1366_v36 = vpop.xlane.xlu0 %1365  ;;  %3360 = vmatpush.msra.mxu2 %v2290_v27  ;;  %v2044_v41 = vmul.f32 0.0625, %v1372_v28  ;;  %v583_v28 = vld [vmem:[%s6787_s2 + $0x7a0] sm:$0xff] }
 0x10a   : > { %v2042_v40 = vmul.f32 0.0625, %v1366_v36  ;;  %947 = vmatpush.msrb.mxu3 %v591_v33  ;;  %v1070_v33 = vld [vmem:[%s4038_s8 + $0x310] sm:$0xff]  ;;  %v1069_v36 = vld [vmem:[%s4038_s8 + $0x308] sm:$0xff] }
 0x10b   : > { %v2887_v45 = vperm.slane %v2043_v34, %v4789_v13  ;;  %3361 = vmatpush.msra.mxu2 %v2289_v39  ;;  %v2889_v60 = vperm.slane %v2044_v41, %v4815_v31  ;;  %871 = vmatmul.f32.gmra.mxu3 %v334_v49  ;;  %v581_v41 = vld [vmem:[%s6787_s2 + $0x790] sm:$0xff]  ;;  %v1523_v44 = vsel %vm1228_vm0, %v1070_v33, 0.0  ;;  %v1076_v33 = vld [vmem:[%s4038_s8 + $0x340] sm:$0xff] }
 0x10c   : > { %v2885_v46 = vperm.slane %v2042_v40, %v4765_v58  ;;  %948 = vmatpush.msrb.mxu3 %v590_v43  ;;  %v1068_v43 = vld [vmem:[%s4038_s8 + $0x300] sm:$0xff] }
 0x10d   : > { %3362 = vmatpush.msra.mxu2 %v2288_v47  ;;  %v1517_v49 = vsel %vm1228_vm0, %v1068_v43, 0.0 }
 0x10e   : > { %v2886_v59 = vsel %vm2819_vm13, %v2885_v46, %v2884_v53  ;;  %949 = vmatpush.msrb.mxu3 %v589_v50  ;;  %v1520_v46 = vsel %vm1228_vm0, %v1069_v36, 0.0 }
 0x10f   : > { %v2888_v6 = vsel %vm2823_vm14, %v2887_v45, %v2886_v59  ;;  %3363 = vmatpush.msra.mxu2 %v2287_v56  ;;  %1506 = vadd.xlane.f32.xlu2 %v1505_v57  ;;  %v580_v45 = vld [vmem:[%s6787_s2 + $0x788] sm:$0xff]  ;;  %v579_v57 = vld [vmem:[%s6787_s2 + $0x780] sm:$0xff] }
 0x110   : > { %v1381_v2 = vpop.xlane.xlu2 %1380  ;;  %v1378_v4 = vpop.xlane.xlu1 %1377  ;;  %950 = vmatpush.msrb.mxu3 %v588_v61  ;;  %1503 = vadd.xlane.f32.xlu1 %v1502_v62  ;;  %v2890_v12 = vsel %vm2827_vm15, %v2889_v60, %v2888_v6  ;;  %v2316_v60 = vld [vmem:[%s6789_s4 + $0x1f8] sm:$0xff]  ;;  %v1073_v62 = vld [vmem:[%s4038_s8 + $0x328] sm:$0xff]  ;;  %v2315_v6 = vld [vmem:[%s6789_s4 + $0x1f0] sm:$0xff] }
 0x111   : > { %v1375_v9 = vpop.xlane.xlu0 %1374  ;;  %1500 = vadd.xlane.f32.xlu0 %v1499_v63  ;;  %3364 = vmatpush.msra.mxu2 %v2286_v0  ;;  %v2046_v25 = vmul.f32 0.0625, %v1378_v4  ;;  %v2047_v34 = vmul.f32 0.0625, %v1381_v2  ;;  %v322_v63 = vld [vmem:[%s4149_s16 + $0x78] sm:$0xff] }
 0x112   : > { %951 = vmatpush.msrb.mxu3 %v587_v8  ;;  %v2045_v27 = vmul.f32 0.0625, %v1375_v9  ;;  %v1072_v8 = vld [vmem:[%s4038_s8 + $0x320] sm:$0xff] }
 0x113   : > { %3365 = vmatpush.msra.mxu2 %v2285_v10  ;;  %v2892_v37 = vperm.slane %v2046_v25, %v4572_v1  ;;  %v2894_v47 = vperm.slane %v2047_v34, %v4582_v5  ;;  %v1071_v10 = vld [vmem:[%s4038_s8 + $0x318] sm:$0xff] }
 0x114   : > { %952 = vmatpush.msrb.mxu3 %v586_v11  ;;  %3366 = vmatmul.f32.vlgmr.msra.gmra.mxu2 %v2890_v12  ;;  %v2891_v39 = vperm.slane %v2045_v27, %v4557_v55  ;;  %v2314_v11 = vld [vmem:[%s6789_s4 + $0x1e8] sm:$0xff]  ;;  %v1532_v12 = vsel %vm1228_vm0, %v1073_v62, 0.0  ;;  %v2312_v27 = vld [vmem:[%s6789_s4 + $0x1d8] sm:$0xff] }
 0x115   : > { %v338_v34 = vld [vmem:[%s4149_s16 + $0xf8] sm:$0xff] }
 0x116   : > { %953 = vmatpush.msrb.mxu3 %v585_v17  ;;  %v2893_v53 = vsel %vm2771_vm1, %v2892_v37, %v2891_v39  ;;  %v1529_v17 = vsel %vm1228_vm0, %v1072_v8, 0.0  ;;  %v2311_v37 = vld [vmem:[%s6789_s4 + $0x1d0] sm:$0xff]  ;;  %v1075_v39 = vld [vmem:[%s4038_s8 + $0x338] sm:$0xff]  ;;  %v2329_v8 = vld [vmem:[%s6789_s4 + $0x260] sm:$0xff] }
 0x117   : > { %1515 = vadd.xlane.f32.xlu2 %v1514_v19  ;;  %v2895_v2 = vsel %vm2775_vm2, %v2894_v47, %v2893_v53  ;;  %v2309_v53 = vld [vmem:[%s6789_s4 + $0x1c0] sm:$0xff] }
 0x118   : > { %v1390_v23 = vpop.xlane.xlu2 %1389  ;;  %v1387_v24 = vpop.xlane.xlu1 %1386  ;;  %954 = vmatpush.msrb.mxu3 %v584_v20  ;;  %1512 = vadd.xlane.f32.xlu1 %v1511_v21  ;;  %v1526_v20 = vsel %vm1228_vm0, %v1071_v10, 0.0  ;;  %v2313_v21 = vld [vmem:[%s6789_s4 + $0x1e0] sm:$0xff]  ;;  %v1078_v10 = vld [vmem:[%s4038_s8 + $0x350] sm:$0xff] }
 0x119   : > { %v1384_v30 = vpop.xlane.xlu0 %1383  ;;  %1509 = vadd.xlane.f32.xlu0 %v1508_v22  ;;  %v2049_v48 = vmul.f32 0.0625, %v1387_v24  ;;  %v2050_v61 = vmul.f32 0.0625, %v1390_v23 }
 0x11a   : > { %955 = vmatpush.msrb.mxu3 %v583_v28  ;;  %v2048_v40 = vmul.f32 0.0625, %v1384_v30 }
 0x11b   : > { %v2898_v0 = vperm.slane %v2049_v48, %v4624_v29  ;;  %v2900_v15 = vperm.slane %v2050_v61, %v4636_v35 }
 0x11c   : > { %956 = vmatpush.msrb.mxu3 %v582_v32  ;;  %v2896_v56 = vperm.slane %v2048_v40, %v4585_v7  ;;  %v1074_v40 = vld [vmem:[%s4038_s8 + $0x330] sm:$0xff] }
 0x11e   : > { %957 = vmatpush.msrb.mxu3 %v581_v41  ;;  %v2897_v9 = vsel %vm6793_vm3, %v2896_v56, %v2895_v2  ;;  %v2332_v41 = vld [vmem:[%s6789_s4 + $0x278] sm:$0xff] }
 0x11f   : > { %1524 = vadd.xlane.f32.xlu2 %v1523_v44  ;;  %v2899_v18 = vsel %vm2783_vm4, %v2898_v0, %v2897_v9  ;;  %3390 = vmatpush.msrb.mxu0 %v2332_v41  ;;  %v2308_v0 = vld [vmem:[%s6789_s4 + $0x1b8] sm:$0xff]  ;;  %v2307_v9 = vld [vmem:[%s6789_s4 + $0x1b0] sm:$0xff]  ;;  %v2325_v41 = vld [vmem:[%s6789_s4 + $0x240] sm:$0xff] }
 0x120   : > { %v1399_v50 = vpop.xlane.xlu2 %1398  ;;  %v1396_v51 = vpop.xlane.xlu1 %1395  ;;  %958 = vmatpush.msrb.mxu3 %v580_v45  ;;  %1521 = vadd.xlane.f32.xlu1 %v1520_v46  ;;  %v2901_v30 = vsel %vm2787_vm5, %v2900_v15, %v2899_v18  ;;  %v2310_v45 = vld [vmem:[%s6789_s4 + $0x1c8] sm:$0xff]  ;;  %v1541_v46 = vsel %vm1228_vm0, %v1076_v33, 0.0 }
 0x121   : > { %v1393_v59 = vpop.xlane.xlu0 %1392  ;;  %1518 = vadd.xlane.f32.xlu0 %v1517_v49  ;;  %v2052_v16 = vmul.f32 0.0625, %v1396_v51  ;;  %v2053_v25 = vmul.f32 0.0625, %v1399_v50  ;;  %v1538_v49 = vsel %vm1228_vm0, %v1075_v39, 0.0  ;;  %v2331_v50 = vld [vmem:[%s6789_s4 + $0x270] sm:$0xff]  ;;  %v1535_v51 = vsel %vm1228_vm0, %v1074_v40, 0.0  ;;  %v1077_v15 = vld [vmem:[%s4038_s8 + $0x348] sm:$0xff] }
 0x122   : > { %959 = vmatpush.msrb.mxu3 %v579_v57  ;;  %v2051_v4 = vmul.f32 0.0625, %v1393_v59  ;;  %3391 = vmatpush.msrb.mxu0 %v2331_v50  ;;  %v2330_v59 = vld [vmem:[%s6789_s4 + $0x268] sm:$0xff]  ;;  %v1082_v40 = vld [vmem:[%s4038_s8 + $0x370] sm:$0xff] }
 0x123   : > { %960 = vmatmul.f32.vlgmr.msrb.gmra.mxu3 %v322_v63  ;;  %v2904_v28 = vperm.slane %v2052_v16, %v4662_v54  ;;  %v2906_v43 = vperm.slane %v2053_v25, %v4686_v3  ;;  %v2328_v16 = vld [vmem:[%s6789_s4 + $0x258] sm:$0xff]  ;;  %v2305_v25 = vld [vmem:[%s6789_s4 + $0x1a0] sm:$0xff]  ;;  %v2302_v50 = vld [vmem:[%s6789_s4 + $0x188] sm:$0xff] }
 0x124   : > { %3370 = vmatpush.msra.mxu3 %v2316_v60  ;;  %v2902_v19 = vperm.slane %v2051_v4, %v4644_v42  ;;  %3392 = vmatpush.msrb.mxu0 %v2330_v59  ;;  %v2301_v59 = vld [vmem:[%s6789_s4 + $0x180] sm:$0xff] }
 0x126   : > { %3371 = vmatpush.msra.mxu3 %v2315_v6  ;;  %v2903_v36 = vsel %vm2791_vm6, %v2902_v19, %v2901_v30  ;;  %v1079_v6 = vld [vmem:[%s4038_s8 + $0x358] sm:$0xff]  ;;  %3393 = vmatpush.msrb.mxu0 %v2329_v8  ;;  %v2306_v19 = vld [vmem:[%s6789_s4 + $0x1a8] sm:$0xff] }
 0x127   : > { %1533 = vadd.xlane.f32.xlu2 %v1532_v12  ;;  %v2905_v47 = vsel %vm2795_vm7, %v2904_v28, %v2903_v36  ;;  %v1085_v8 = vld [vmem:[%s4038_s8 + $0x388] sm:$0xff] }
 0x128   : > { %v1408_v22 = vpop.xlane.xlu2 %1407  ;;  %v1405_v23 = vpop.xlane.xlu1 %1404  ;;  %3372 = vmatpush.msra.mxu3 %v2314_v11  ;;  %1530 = vadd.xlane.f32.xlu1 %v1529_v17  ;;  %v2907_v63 = vsel %vm2799_vm8, %v2906_v43, %v2905_v47  ;;  %v1080_v47 = vld [vmem:[%s4038_s8 + $0x360] sm:$0xff] }
 0x129   : > { %v1402_v24 = vpop.xlane.xlu0 %1401  ;;  %1527 = vadd.xlane.f32.xlu0 %v1526_v20  ;;  %v2055_v44 = vmul.f32 0.0625, %v1405_v23  ;;  %v2056_v60 = vmul.f32 0.0625, %v1408_v22  ;;  %v1550_v20 = vsel %vm1228_vm0, %v1079_v6, 0.0  ;;  %3394 = vmatpush.msrb.mxu0 %v2328_v16  ;;  %v2327_v22 = vld [vmem:[%s6789_s4 + $0x250] sm:$0xff]  ;;  %v1568_v16 = vsel %vm1228_vm0, %v1085_v8, 0.0 }
 0x12a   : > { %3373 = vmatpush.msra.mxu3 %v2313_v21  ;;  %v2054_v32 = vmul.f32 0.0625, %v1402_v24  ;;  %v1547_v21 = vsel %vm1228_vm0, %v1078_v10, 0.0  ;;  %v1544_v24 = vsel %vm1228_vm0, %v1077_v15, 0.0  ;;  %v1084_v10 = vld [vmem:[%s4038_s8 + $0x380] sm:$0xff] }
 0x12b   : > { %963 = vmatmul.f32.gmra.mxu3 %v338_v34  ;;  %v2910_v62 = vperm.slane %v2055_v44, %v4716_v26  ;;  %v2912_v11 = vperm.slane %v2056_v60, %v4737_v38  ;;  %3395 = vmatpush.msrb.mxu0 %v2327_v22  ;;  %v2326_v34 = vld [vmem:[%s6789_s4 + $0x248] sm:$0xff]  ;;  %v2303_v44 = vld [vmem:[%s6789_s4 + $0x190] sm:$0xff] }
 0x12c   : > { %3374 = vmatpush.msra.mxu3 %v2312_v27  ;;  %v2908_v48 = vperm.slane %v2054_v32, %v4696_v14 }
 0x12d   : > { %3396 = vmatpush.msrb.mxu0 %v2326_v34 }
 0x12e   : > { %3375 = vmatpush.msra.mxu3 %v2311_v37  ;;  %v2909_v4 = vsel %vm2803_vm9, %v2908_v48, %v2907_v63  ;;  %v2304_v37 = vld [vmem:[%s6789_s4 + $0x198] sm:$0xff] }
 0x12f   : > { %1542 = vadd.xlane.f32.xlu2 %v1541_v46  ;;  %v2911_v17 = vsel %vm2807_vm10, %v2910_v62, %v2909_v4  ;;  %3397 = vmatpush.msrb.mxu0 %v2325_v41 }
 0x130   : > { %v1417_v56 = vpop.xlane.xlu2 %1416  ;;  %v1414_v57 = vpop.xlane.xlu1 %1413  ;;  %3376 = vmatpush.msra.mxu3 %v2310_v45  ;;  %1539 = vadd.xlane.f32.xlu1 %v1538_v49  ;;  %v2913_v32 = vsel %vm2811_vm11, %v2912_v11, %v2911_v17  ;;  %v1081_v45 = vld [vmem:[%s4038_s8 + $0x368] sm:$0xff]  ;;  %v2324_v49 = vld [vmem:[%s6789_s4 + $0x238] sm:$0xff] }
 0x131   : > { %v1411_v61 = vpop.xlane.xlu0 %1410  ;;  %1536 = vadd.xlane.f32.xlu0 %v1535_v51  ;;  %v2058_v12 = vmul.f32 0.0625, %v1414_v57  ;;  %v2059_v23 = vmul.f32 0.0625, %v1417_v56  ;;  %v1559_v51 = vsel %vm1228_vm0, %v1082_v40, 0.0  ;;  %3398 = vmatpush.msrb.mxu0 %v2324_v49  ;;  %v2323_v56 = vld [vmem:[%s6789_s4 + $0x230] sm:$0xff]  ;;  %v1553_v57 = vsel %vm1228_vm0, %v1080_v47, 0.0  ;;  %v1083_v11 = vld [vmem:[%s4038_s8 + $0x378] sm:$0xff] }
 0x132   : > { %v2057_v2 = vmul.f32 0.0625, %v1411_v61  ;;  %3377 = vmatpush.msra.mxu3 %v2309_v53  ;;  %v1556_v53 = vsel %vm1228_vm0, %v1081_v45, 0.0  ;;  %v1086_v40 = vld [vmem:[%s4038_s8 + $0x390] sm:$0xff] }
 0x133   : > { %v2916_v30 = vperm.slane %v2058_v12, %v4765_v58  ;;  %v2918_v43 = vperm.slane %v2059_v23, %v4789_v13  ;;  %3399 = vmatpush.msrb.mxu0 %v2323_v56  ;;  %v2320_v12 = vld [vmem:[%s6789_s4 + $0x218] sm:$0xff]  ;;  %v1571_v47 = vsel %vm1228_vm0, %v1086_v40, 0.0 }
 0x134   : > { %3378 = vmatpush.msra.mxu3 %v2308_v0  ;;  %v2914_v18 = vperm.slane %v2057_v2, %v4755_v52  ;;  %v2322_v2 = vld [vmem:[%s6789_s4 + $0x228] sm:$0xff] }
 0x135   : > { %3400 = vmatpush.msrb.mxu0 %v2322_v2 }
 0x136   : > { %3379 = vmatpush.msra.mxu3 %v2307_v9  ;;  %v2915_v36 = vsel %vm2815_vm12, %v2914_v18, %v2913_v32  ;;  %v2321_v9 = vld [vmem:[%s6789_s4 + $0x220] sm:$0xff] }
 0x137   : > { %1551 = vadd.xlane.f32.xlu2 %v1550_v20  ;;  %v2917_v48 = vsel %vm2819_vm13, %v2916_v30, %v2915_v36  ;;  %3401 = vmatpush.msrb.mxu0 %v2321_v9  ;;  %v2319_v20 = vld [vmem:[%s6789_s4 + $0x210] sm:$0xff]  ;;  %v1088_v32 = vld [vmem:[%s4038_s8 + $0x3a0] sm:$0xff]  ;;  %v1087_v36 = vld [vmem:[%s4038_s8 + $0x398] sm:$0xff] }
 0x138   : > { %v1426_v27 = vpop.xlane.xlu2 %1425  ;;  %v1423_v28 = vpop.xlane.xlu1 %1422  ;;  %3380 = vmatpush.msra.mxu3 %v2306_v19  ;;  %1548 = vadd.xlane.f32.xlu1 %v1547_v21  ;;  %v2919_v60 = vsel %vm2823_vm14, %v2918_v43, %v2917_v48  ;;  %v1565_v19 = vsel %vm1228_vm0, %v1084_v10, 0.0  ;;  %v1562_v21 = vsel %vm1228_vm0, %v1083_v11, 0.0  ;;  %v1577_v43 = vsel %vm1228_vm0, %v1088_v32, 0.0 }
 0x139   : > { %v1420_v33 = vpop.xlane.xlu0 %1419  ;;  %1545 = vadd.xlane.f32.xlu0 %v1544_v24  ;;  %v2062_v4 = vmul.f32 0.0625, %v1426_v27  ;;  %v2061_v6 = vmul.f32 0.0625, %v1423_v28  ;;  %3402 = vmatpush.msrb.mxu0 %v2320_v12 }
 0x13a   : > { %v2060_v39 = vmul.f32 0.0625, %v1420_v33  ;;  %3381 = vmatpush.msra.mxu3 %v2305_v25  ;;  %v2318_v25 = vld [vmem:[%s6789_s4 + $0x208] sm:$0xff]  ;;  %v2317_v33 = vld [vmem:[%s6789_s4 + $0x200] sm:$0xff] }
 0x13b   : > { %v2923_v17 = vperm.slane %v2062_v4, %v4572_v1  ;;  %v2922_v18 = vperm.slane %v2061_v6, %v4557_v55  ;;  %3403 = vmatpush.msrb.mxu0 %v2319_v20  ;;  %v2348_v4 = vld [vmem:[%s6789_s4 + $0x2f8] sm:$0xff] }
 0x13c   : > { %3382 = vmatpush.msra.mxu3 %v2304_v37  ;;  %v2920_v46 = vperm.slane %v2060_v39, %v4815_v31  ;;  %3410 = vmatpush.msrb.mxu1 %v2348_v4 }
 0x13d   : > { %3404 = vmatpush.msrb.mxu0 %v2318_v25  ;;  %v2924_v30 = vsel %vm2771_vm1, %v2923_v17, %v2922_v18  ;;  %v2346_v17 = vld [vmem:[%s6789_s4 + $0x2e8] sm:$0xff] }
 0x13e   : > { %3383 = vmatpush.msra.mxu3 %v2303_v44  ;;  %v2921_v63 = vsel %vm2827_vm15, %v2920_v46, %v2919_v60  ;;  %v1574_v44 = vsel %vm1228_vm0, %v1087_v36, 0.0  ;;  %v2344_v36 = vld [vmem:[%s6789_s4 + $0x2d8] sm:$0xff] }
 0x13f   : > { %1560 = vadd.xlane.f32.xlu2 %v1559_v51  ;;  %3405 = vmatpush.msrb.mxu0 %v2317_v33 }
 0x140   : > { %v1435_v61 = vpop.xlane.xlu2 %1434  ;;  %v1432_v62 = vpop.xlane.xlu1 %1431  ;;  %3384 = vmatpush.msra.mxu3 %v2302_v50  ;;  %1557 = vadd.xlane.f32.xlu1 %v1556_v53 }
 0x141   : > { %v1429_v0 = vpop.xlane.xlu0 %1428  ;;  %1554 = vadd.xlane.f32.xlu0 %v1553_v57  ;;  %v2064_v22 = vmul.f32 0.0625, %v1432_v62  ;;  %v2065_v34 = vmul.f32 0.0625, %v1435_v61  ;;  %v1091_v57 = vld [vmem:[%s4038_s8 + $0x3b8] sm:$0xff]  ;;  %v1090_v62 = vld [vmem:[%s4038_s8 + $0x3b0] sm:$0xff] }
 0x142   : > { %3385 = vmatpush.msra.mxu3 %v2301_v59  ;;  %v2063_v15 = vmul.f32 0.0625, %v1429_v0  ;;  %v1089_v0 = vld [vmem:[%s4038_s8 + $0x3a8] sm:$0xff]  ;;  %v1586_v2 = vsel %vm1228_vm0, %v1091_v57, 0.0  ;;  %v1583_v9 = vsel %vm1228_vm0, %v1090_v62, 0.0  ;;  %v1096_v57 = vld [vmem:[%s4038_s8 + $0x3e0] sm:$0xff] }
 0x143   : > { %3386 = vmatmul.f32.vlgmr.msra.gmra.mxu3 %v2921_v63  ;;  %v2927_v37 = vperm.slane %v2064_v22, %v4585_v7  ;;  %v2929_v45 = vperm.slane %v2065_v34, %v4624_v29  ;;  %v1580_v12 = vsel %vm1228_vm0, %v1089_v0, 0.0  ;;  %v2345_v22 = vld [vmem:[%s6789_s4 + $0x2e0] sm:$0xff] }
 0x144   : > { %v2925_v27 = vperm.slane %v2063_v15, %v4582_v5  ;;  %v2347_v15 = vld [vmem:[%s6789_s4 + $0x2f0] sm:$0xff] }
 0x145   : > { %3411 = vmatpush.msrb.mxu1 %v2347_v15  ;;  %v2339_v15 = vld [vmem:[%s6789_s4 + $0x2b0] sm:$0xff] }
 0x146   : > { %v2926_v41 = vsel %vm2775_vm2, %v2925_v27, %v2924_v30  ;;  %v1093_v27 = vld [vmem:[%s4038_s8 + $0x3c8] sm:$0xff]  ;;  %v1092_v30 = vld [vmem:[%s4038_s8 + $0x3c0] sm:$0xff] }
 0x147   : > { %1569 = vadd.xlane.f32.xlu2 %v1568_v16  ;;  %v2928_v48 = vsel %vm6793_vm3, %v2927_v37, %v2926_v41  ;;  %3412 = vmatpush.msrb.mxu1 %v2346_v17  ;;  %v616_v37 = vpop.f32.mrf.mxu0  ;;  %v1592_v41 = vsel %vm1228_vm0, %v1093_v27, 0.0  ;;  %v1099_v27 = vld [vmem:[%s4038_s8 + $0x3f8] sm:$0xff] }
 0x148   : > { %v1444_v23 = vpop.xlane.xlu2 %1443  ;;  %v1441_v24 = vpop.xlane.xlu1 %1440  ;;  %1566 = vadd.xlane.f32.xlu1 %v1565_v19  ;;  %v2930_v60 = vsel %vm2783_vm4, %v2929_v45, %v2928_v48 }
 0x149   : > { %v1438_v28 = vpop.xlane.xlu0 %1437  ;;  %1563 = vadd.xlane.f32.xlu0 %v1562_v21  ;;  %v2067_v46 = vmul.f32 0.0625, %v1441_v24  ;;  %v2068_v53 = vmul.f32 0.0625, %v1444_v23  ;;  %v1094_v21 = vld [vmem:[%s4038_s8 + $0x3d0] sm:$0xff]  ;;  %3413 = vmatpush.msrb.mxu1 %v2345_v22  ;;  %v5533_v45 = vpop.f32.mrf.mxu1 }
 0x14a   : > { %v2066_v39 = vmul.f32 0.0625, %v1438_v28  ;;  %v1595_v34 = vsel %vm1228_vm0, %v1094_v21, 0.0 }
 0x14b   : > { %v2933_v59 = vperm.slane %v2067_v46, %v4644_v42  ;;  %v2935_v6 = vperm.slane %v2068_v53, %v4662_v54  ;;  %3414 = vmatpush.msrb.mxu1 %v2344_v36  ;;  %v1097_v53 = vld [vmem:[%s4038_s8 + $0x3e8] sm:$0xff] }
 0x14c   : > { %v2931_v49 = vperm.slane %v2066_v39, %v4636_v35 }
 0x14e   : > { %v2932_v63 = vsel %vm2787_vm5, %v2931_v49, %v2930_v60  ;;  %v2342_v49 = vld [vmem:[%s6789_s4 + $0x2c8] sm:$0xff] }
 0x14f   : > { %1578 = vadd.xlane.f32.xlu2 %v1577_v43  ;;  %v2934_v10 = vsel %vm2791_vm6, %v2933_v59, %v2932_v63  ;;  %v1589_v43 = vsel %vm1228_vm0, %v1092_v30, 0.0  ;;  %v2341_v59 = vld [vmem:[%s6789_s4 + $0x2c0] sm:$0xff]  ;;  %v1095_v63 = vld [vmem:[%s4038_s8 + $0x3d8] sm:$0xff] }
 0x150   : > { %1575 = vadd.xlane.f32.xlu1 %v1574_v44  ;;  %v1453_v50 = vpop.xlane.xlu2 %1452  ;;  %v1450_v51 = vpop.xlane.xlu1 %1449  ;;  %v2936_v19 = vsel %vm2795_vm7, %v2935_v6, %v2934_v10  ;;  %v2343_v44 = vld [vmem:[%s6789_s4 + $0x2d0] sm:$0xff]  ;;  %v2340_v6 = vld [vmem:[%s6789_s4 + $0x2b8] sm:$0xff]  ;;  %v1601_v10 = vsel %vm1228_vm0, %v1096_v57, 0.0  ;;  %v2333_v57 = vld [vmem:[%s6789_s4 + $0x280] sm:$0xff] }
 0x151   : > { %1572 = vadd.xlane.f32.xlu0 %v1571_v47  ;;  %v1447_v56 = vpop.xlane.xlu0 %1446  ;;  %v2070_v8 = vmul.f32 0.0625, %v1450_v51  ;;  %v2071_v16 = vmul.f32 0.0625, %v1453_v50  ;;  %3415 = vmatpush.msrb.mxu1 %v2343_v44  ;;  %v642_v21 = vpop.f32.mrf.mxu1 }
 0x152   : > { %v2069_v61 = vmul.f32 0.0625, %v1447_v56 }
 0x153   : > { %v2939_v18 = vperm.slane %v2070_v8, %v4696_v14  ;;  %v2941_v32 = vperm.slane %v2071_v16, %v4716_v26  ;;  %3416 = vmatpush.msrb.mxu1 %v2342_v49  ;;  %v662_v8 = vpop.f32.mrf.mxu2  ;;  %v619_v16 = vpop.f32.mrf.mxu0  ;;  %v2334_v49 = vld [vmem:[%s6789_s4 + $0x288] sm:$0xff] }
 0x154   : > { %v2937_v11 = vperm.slane %v2069_v61, %v4686_v3 }
 0x155   : > { %3417 = vmatpush.msrb.mxu1 %v2341_v59  ;;  %v1102_v59 = vld [vmem:[%s4038_s8 + $0x410] sm:$0xff] }
 0x156   : > { %v2938_v23 = vsel %vm2799_vm8, %v2937_v11, %v2936_v19 }
 0x157   : > { %1587 = vadd.xlane.f32.xlu2 %v1586_v2  ;;  %v2940_v39 = vsel %vm2803_vm9, %v2939_v18, %v2938_v23  ;;  %v1604_v2 = vsel %vm1228_vm0, %v1097_v53, 0.0  ;;  %3418 = vmatpush.msrb.mxu1 %v2340_v6  ;;  %v3831_v18 = vld [vmem:[%s6788_s3] ss:$0 sm:$0xff] }
 0x158   : > { %1584 = vadd.xlane.f32.xlu1 %v1583_v9  ;;  %v1462_v20 = vpop.xlane.xlu2 %1461  ;;  %v1459_v24 = vpop.xlane.xlu1 %1458  ;;  %v2942_v48 = vsel %vm2807_vm10, %v2941_v32, %v2940_v39  ;;  %v1100_v23 = vld [vmem:[%s4038_s8 + $0x400] sm:$0xff]  ;;  %v1098_v32 = vld [vmem:[%s4038_s8 + $0x3f0] sm:$0xff]  ;;  %v2336_v39 = vld [vmem:[%s6789_s4 + $0x298] sm:$0xff] }
 0x159   : > { %1581 = vadd.xlane.f32.xlu0 %v1580_v12  ;;  %v1456_v25 = vpop.xlane.xlu0 %1455  ;;  %v2073_v33 = vmul.f32 0.0625, %v1459_v24  ;;  %v2074_v46 = vmul.f32 0.0625, %v1462_v20  ;;  %v1598_v12 = vsel %vm1228_vm0, %v1095_v63, 0.0  ;;  %3419 = vmatpush.msrb.mxu1 %v2339_v15  ;;  %v2338_v20 = vld [vmem:[%s6789_s4 + $0x2a8] sm:$0xff]  ;;  %v1613_v36 = vsel %vm1228_vm0, %v1100_v23, 0.0 }
 0x15a   : > { %v2072_v28 = vmul.f32 0.0625, %v1456_v25  ;;  %v1607_v44 = vsel %vm1228_vm0, %v1098_v32, 0.0 }
 0x15b   : > { %v2945_v47 = vperm.slane %v2073_v33, %v4755_v52  ;;  %v2947_v60 = vperm.slane %v2074_v46, %v4765_v58  ;;  %3420 = vmatpush.msrb.mxu1 %v2338_v20  ;;  %v2335_v46 = vld [vmem:[%s6789_s4 + $0x290] sm:$0xff] }
 0x15c   : > { %v2943_v40 = vperm.slane %v2072_v28, %v4737_v38  ;;  %v2337_v28 = vld [vmem:[%s6789_s4 + $0x2a0] sm:$0xff] }
 0x15d   : > { %v685_v33 = vpop.f32.mrf.mxu3  ;;  %3421 = vmatpush.msrb.mxu1 %v2337_v28  ;;  %v1105_v28 = vld [vmem:[%s4038_s8 + $0x428] sm:$0xff] }
 0x15e   : > { %v2944_v50 = vsel %vm2811_vm11, %v2943_v40, %v2942_v48 }
 0x15f   : > { %1596 = vadd.xlane.f32.xlu2 %v1595_v34  ;;  %v2946_v4 = vsel %vm2815_vm12, %v2945_v47, %v2944_v50  ;;  %v617_v34 = vadd.f32 %v3831_v18, %v616_v37  ;;  %3422 = vmatpush.msrb.mxu1 %v2336_v39  ;;  %v665_v37 = vpop.f32.mrf.mxu2  ;;  %v708_v50 = vpop.f32.mrf.mxu0  ;;  %v1104_v39 = vld [vmem:[%s4038_s8 + $0x420] sm:$0xff] }
 0x160   : > { %1593 = vadd.xlane.f32.xlu1 %v1592_v41  ;;  %v1471_v51 = vpop.xlane.xlu2 %1470  ;;  %v2948_v17 = vsel %vm2819_vm13, %v2947_v60, %v2946_v4  ;;  %v620_v60 = vadd.f32 %v3831_v18, %v619_v16 }
 0x161   : > { %1590 = vadd.xlane.f32.xlu0 %v1589_v43  ;;  %v1468_v56 = vpop.xlane.xlu1 %1467  ;;  %v1465_v62 = vpop.xlane.xlu0 %1464  ;;  %v2077_v40 = vmul.f32 0.0625, %v1471_v51  ;;  %v1610_v43 = vsel %vm1228_vm0, %v1099_v27, 0.0  ;;  %3423 = vmatpush.msrb.mxu1 %v2335_v46  ;;  %v640_v47 = vadd.f32 %v5533_v45, %v617_v34  ;;  %v1628_v46 = vsel %vm1228_vm0, %v1105_v28, 0.0 }
 0x162   : > { %v2076_v61 = vmul.f32 0.0625, %v1468_v56  ;;  %v2075_v0 = vmul.f32 0.0625, %v1465_v62  ;;  %v1103_v56 = vld [vmem:[%s4038_s8 + $0x418] sm:$0xff] }
 0x163   : > { %v2953_v51 = vperm.slane %v2077_v40, %v4557_v55  ;;  %3424 = vmatpush.msrb.mxu1 %v2334_v49  ;;  %v663_v4 = vadd.f32 %v662_v8, %v640_v47  ;;  %v643_v8 = vadd.f32 %v642_v21, %v620_v60 }
 0x164   : > { %v2951_v9 = vperm.slane %v2076_v61, %v4815_v31  ;;  %v2949_v11 = vperm.slane %v2075_v0, %v4789_v13  ;;  %v1101_v0 = vld [vmem:[%s4038_s8 + $0x408] sm:$0xff] }
 0x165   : > { %3425 = vmatpush.msrb.mxu1 %v2333_v57  ;;  %v688_v15 = vpop.f32.mrf.mxu3  ;;  %v1616_v16 = vsel %vm1228_vm0, %v1101_v0, 0.0  ;;  %v666_v21 = vadd.f32 %v665_v37, %v643_v8  ;;  %v2364_v0 = vld [vmem:[%s6789_s4 + $0x378] sm:$0xff] }
 0x166   : > { %v2950_v19 = vsel %vm2823_vm14, %v2949_v11, %v2948_v17  ;;  %3430 = vmatpush.msrb.mxu2 %v2364_v0  ;;  %v2358_v0 = vld [vmem:[%s6789_s4 + $0x348] sm:$0xff] }
 0x167   : > { %1605 = vadd.xlane.f32.xlu2 %v1604_v2  ;;  %v2952_v22 = vsel %vm2827_vm15, %v2951_v9, %v2950_v19  ;;  %v731_v2 = vpop.f32.mrf.mxu1  ;;  %v754_v23 = vpop.f32.mrf.mxu2 }
 0x168   : > { %1602 = vadd.xlane.f32.xlu1 %v1601_v10  ;;  %3406 = vmatmul.f32.vlgmr.msrb.gmra.mxu0 %v2952_v22  ;;  %v1622_v10 = vsel %vm1228_vm0, %v1103_v56, 0.0  ;;  %v686_v22 = vadd.f32 %v685_v33, %v663_v4 }
 0x169   : > { %1599 = vadd.xlane.f32.xlu0 %v1598_v12  ;;  %v1480_v24 = vpop.xlane.xlu2 %1479  ;;  %v1477_v25 = vpop.xlane.xlu1 %1476  ;;  %v1619_v12 = vsel %vm1228_vm0, %v1102_v59, 0.0  ;;  %v1109_v59 = vld [vmem:[%s4038_s8 + $0x448] sm:$0xff] }
 0x16a   : > { %v1474_v30 = vpop.xlane.xlu0 %1473  ;;  %v2079_v48 = vmul.f32 0.0625, %v1477_v25  ;;  %v2080_v61 = vmul.f32 0.0625, %v1480_v24  ;;  %v1106_v24 = vld [vmem:[%s4038_s8 + $0x430] sm:$0xff]  ;;  %v709_v33 = vadd.f32 %v708_v50, %v686_v22  ;;  %v689_v50 = vadd.f32 %v688_v15, %v666_v21 }
 0x16b   : > { %v2078_v41 = vmul.f32 0.0625, %v1474_v30  ;;  %v711_v30 = vpop.f32.mrf.mxu0 }
 0x16c   : > { %v2956_v6 = vperm.slane %v2079_v48, %v4582_v5  ;;  %v2958_v17 = vperm.slane %v2080_v61, %v4585_v7  ;;  %v732_v57 = vadd.f32 %v731_v2, %v709_v33  ;;  %v1111_v33 = vld [vmem:[%s4038_s8 + $0x458] sm:$0xff] }
 0x16d   : > { %v2954_v53 = vperm.slane %v2078_v41, %v4572_v1 }
 0x16e   : > { %v777_v56 = vpop.f32.mrf.mxu3  ;;  %v755_v15 = vadd.f32 %v754_v23, %v732_v57  ;;  %v2362_v23 = vld [vmem:[%s6789_s4 + $0x368] sm:$0xff]  ;;  %v2359_v57 = vld [vmem:[%s6789_s4 + $0x350] sm:$0xff] }
 0x16f   : > { %1614 = vadd.xlane.f32.xlu2 %v1613_v36  ;;  %v2955_v11 = vsel %vm2771_vm1, %v2954_v53, %v2953_v51  ;;  %v734_v47 = vpop.f32.mrf.mxu1  ;;  %v1625_v51 = vsel %vm1228_vm0, %v1104_v39, 0.0  ;;  %v757_v4 = vpop.f32.mrf.mxu2 }
 0x170   : > { %1611 = vadd.xlane.f32.xlu1 %v1610_v43  ;;  %v2957_v19 = vsel %vm2775_vm2, %v2956_v6, %v2955_v11  ;;  %v1631_v43 = vsel %vm1228_vm0, %v1106_v24, 0.0  ;;  %v1640_v11 = vsel %vm1228_vm0, %v1109_v59, 0.0 }
 0x171   : > { %1608 = vadd.xlane.f32.xlu0 %v1607_v44  ;;  %v1489_v45 = vpop.xlane.xlu2 %1488  ;;  %v2959_v34 = vsel %vm6793_vm3, %v2958_v17, %v2957_v19 }
 0x172   : > { %v1486_v62 = vpop.xlane.xlu1 %1485  ;;  %v1483_v63 = vpop.xlane.xlu0 %1482  ;;  %v2083_v25 = vmul.f32 0.0625, %v1489_v45 }
 0x173   : > { %v2081_v9 = vmul.f32 0.0625, %v1483_v63  ;;  %v2082_v18 = vmul.f32 0.0625, %v1486_v62  ;;  %v1108_v63 = vld [vmem:[%s4038_s8 + $0x440] sm:$0xff]  ;;  %v800_v17 = vpop.f32.mrf.mxu0 }
 0x174   : > { %v2964_v48 = vperm.slane %v2083_v25, %v4644_v42 }
 0x175   : > { %v2960_v20 = vperm.slane %v2081_v9, %v4624_v29  ;;  %v2962_v32 = vperm.slane %v2082_v18, %v4636_v35 }
 0x177   : > { %1623 = vadd.xlane.f32.xlu2 %v1622_v10  ;;  %v2961_v40 = vsel %vm2783_vm4, %v2960_v20, %v2959_v34  ;;  %v1107_v10 = vld [vmem:[%s4038_s8 + $0x438] sm:$0xff]  ;;  %v1637_v20 = vsel %vm1228_vm0, %v1108_v63, 0.0 }
 0x178   : > { %1620 = vadd.xlane.f32.xlu1 %v1619_v12  ;;  %v2963_v53 = vsel %vm2787_vm5, %v2962_v32, %v2961_v40  ;;  %v712_v12 = vadd.f32 %v711_v30, %v689_v50  ;;  %v1634_v24 = vsel %vm1228_vm0, %v1107_v10, 0.0  ;;  %v1112_v30 = vld [vmem:[%s4038_s8 + $0x460] sm:$0xff]  ;;  %v778_v32 = vadd.f32 %v777_v56, %v755_v15  ;;  %v780_v40 = vpop.f32.mrf.mxu3 }
 0x179   : > { %1617 = vadd.xlane.f32.xlu0 %v1616_v16  ;;  %v2965_v61 = vsel %vm2791_vm6, %v2964_v48, %v2963_v53  ;;  %v2363_v16 = vld [vmem:[%s6789_s4 + $0x370] sm:$0xff]  ;;  %v1649_v48 = vsel %vm1228_vm0, %v1112_v30, 0.0 }
 0x17a   : > { %v1498_v27 = vpop.xlane.xlu2 %1497  ;;  %v1495_v36 = vpop.xlane.xlu1 %1494  ;;  %3431 = vmatpush.msrb.mxu2 %v2363_v16  ;;  %v735_v34 = vadd.f32 %v734_v47, %v712_v12  ;;  %v801_v56 = vadd.f32 %v800_v17, %v778_v32  ;;  %v2357_v12 = vld [vmem:[%s6789_s4 + $0x340] sm:$0xff]  ;;  %v1115_v16 = vld [vmem:[%s4038_s8 + $0x478] sm:$0xff] }
 0x17b   : > { %v1492_v41 = vpop.xlane.xlu0 %1491  ;;  %v2085_v49 = vmul.f32 0.0625, %v1495_v36  ;;  %v2086_v45 = vmul.f32 0.0625, %v1498_v27  ;;  %v823_v27 = vpop.f32.mrf.mxu1  ;;  %v2361_v36 = vld [vmem:[%s6789_s4 + $0x360] sm:$0xff] }
 0x17c   : > { %v2084_v44 = vmul.f32 0.0625, %v1492_v41  ;;  %3432 = vmatpush.msrb.mxu2 %v2362_v23  ;;  %v758_v50 = vadd.f32 %v757_v4, %v735_v34  ;;  %v803_v4 = vpop.f32.mrf.mxu0  ;;  %v1113_v23 = vld [vmem:[%s4038_s8 + $0x468] sm:$0xff]  ;;  %v2355_v34 = vld [vmem:[%s6789_s4 + $0x330] sm:$0xff] }
 0x17d   : > { %v2968_v60 = vperm.slane %v2085_v49, %v4686_v3  ;;  %v2970_v18 = vperm.slane %v2086_v45, %v4696_v14  ;;  %v1110_v49 = vld [vmem:[%s4038_s8 + $0x450] sm:$0xff]  ;;  %v846_v45 = vpop.f32.mrf.mxu2 }
 0x17e   : > { %v2966_v37 = vperm.slane %v2084_v44, %v4662_v54  ;;  %3433 = vmatpush.msrb.mxu2 %v2361_v36  ;;  %v2360_v44 = vld [vmem:[%s6789_s4 + $0x358] sm:$0xff]  ;;  %v1643_v63 = vsel %vm1228_vm0, %v1110_v49, 0.0 }
 0x17f   : > { %1632 = vadd.xlane.f32.xlu2 %v1631_v43  ;;  %v2352_v49 = vld [vmem:[%s6789_s4 + $0x318] sm:$0xff] }
 0x180   : > { %1629 = vadd.xlane.f32.xlu1 %v1628_v46  ;;  %v2967_v6 = vsel %vm2795_vm7, %v2966_v37, %v2965_v61  ;;  %3434 = vmatpush.msrb.mxu2 %v2360_v44  ;;  %v1646_v61 = vsel %vm1228_vm0, %v1111_v33, 0.0  ;;  %v2353_v33 = vld [vmem:[%s6789_s4 + $0x320] sm:$0xff] }
 0x181   : > { %1626 = vadd.xlane.f32.xlu0 %v1625_v51  ;;  %v2969_v22 = vsel %vm2799_vm8, %v2968_v60, %v2967_v6 }
 0x182   : > { %v1507_v62 = vpop.xlane.xlu2 %1506  ;;  %v2971_v21 = vsel %vm2803_vm9, %v2970_v18, %v2969_v22  ;;  %3435 = vmatpush.msrb.mxu2 %v2359_v57 }
 0x183   : > { %v1504_v9 = vpop.xlane.xlu1 %1503  ;;  %v2089_v28 = vmul.f32 0.0625, %v1507_v62  ;;  %v826_v17 = vpop.f32.mrf.mxu1 }
 0x184   : > { %v1501_v2 = vpop.xlane.xlu0 %1500  ;;  %v2088_v8 = vmul.f32 0.0625, %v1504_v9  ;;  %3436 = vmatpush.msrb.mxu2 %v2358_v0  ;;  %v892_v44 = vpop.f32.mrf.mxu0 }
 0x185   : > { %v2087_v19 = vmul.f32 0.0625, %v1501_v2  ;;  %v2976_v51 = vperm.slane %v2089_v28, %v4755_v52  ;;  %v781_v2 = vadd.f32 %v780_v40, %v758_v50  ;;  %v1658_v28 = vsel %vm1228_vm0, %v1115_v16, 0.0  ;;  %v849_v40 = vpop.f32.mrf.mxu2 }
 0x186   : > { %v2974_v39 = vperm.slane %v2088_v8, %v4737_v38  ;;  %3437 = vmatpush.msrb.mxu2 %v2357_v12 }
 0x187   : > { %v2972_v25 = vperm.slane %v2087_v19, %v4716_v26  ;;  %1641 = vadd.xlane.f32.xlu2 %v1640_v11  ;;  %v824_v11 = vadd.f32 %v823_v27, %v801_v56  ;;  %v1114_v19 = vld [vmem:[%s4038_s8 + $0x470] sm:$0xff]  ;;  %v804_v30 = vadd.f32 %v803_v4, %v781_v2  ;;  %v1116_v56 = vld [vmem:[%s4038_s8 + $0x480] sm:$0xff]  ;;  %v2350_v2 = vld [vmem:[%s6789_s4 + $0x308] sm:$0xff] }
 0x188   : > { %1638 = vadd.xlane.f32.xlu1 %v1637_v20  ;;  %v2356_v20 = vld [vmem:[%s6789_s4 + $0x338] sm:$0xff]  ;;  %v1655_v36 = vsel %vm1228_vm0, %v1114_v19, 0.0 }
 0x189   : > { %1635 = vadd.xlane.f32.xlu0 %v1634_v24  ;;  %v2973_v41 = vsel %vm2807_vm10, %v2972_v25, %v2971_v21  ;;  %v869_v25 = vpop.f32.mrf.mxu3  ;;  %3438 = vmatpush.msrb.mxu2 %v2356_v20  ;;  %v847_v32 = vadd.f32 %v846_v45, %v824_v11  ;;  %v2354_v21 = vld [vmem:[%s6789_s4 + $0x328] sm:$0xff] }
 0x18a   : > { %v1516_v43 = vpop.xlane.xlu2 %1515  ;;  %v2975_v59 = vsel %vm2811_vm11, %v2974_v39, %v2973_v41  ;;  %v1652_v39 = vsel %vm1228_vm0, %v1113_v23, 0.0 }
 0x18b   : > { %v2092_v46 = vmul.f32 0.0625, %v1516_v43  ;;  %v1513_v47 = vpop.xlane.xlu1 %1512  ;;  %v2977_v10 = vsel %vm2815_vm12, %v2976_v51, %v2975_v59  ;;  %3439 = vmatpush.msrb.mxu2 %v2355_v34  ;;  %v870_v41 = vadd.f32 %v869_v25, %v847_v32  ;;  %v827_v43 = vadd.f32 %v826_v17, %v804_v30  ;;  %v1119_v30 = vld [vmem:[%s4038_s8 + $0x498] sm:$0xff] }
 0x18c   : > { %v2091_v53 = vmul.f32 0.0625, %v1513_v47  ;;  %v1510_v37 = vpop.xlane.xlu0 %1509  ;;  %v895_v23 = vpop.f32.mrf.mxu0 }
 0x18d   : > { %v2090_v60 = vmul.f32 0.0625, %v1510_v37  ;;  %v2982_v6 = vperm.slane %v2092_v46, %v4815_v31  ;;  %3440 = vmatpush.msrb.mxu2 %v2354_v21  ;;  %v893_v59 = vadd.f32 %v892_v44, %v870_v41 }
 0x18e   : > { %v2980_v62 = vperm.slane %v2091_v53, %v4789_v13  ;;  %v1117_v53 = vld [vmem:[%s4038_s8 + $0x488] sm:$0xff] }
 0x18f   : > { %v2978_v9 = vperm.slane %v2090_v60, %v4765_v58  ;;  %1650 = vadd.xlane.f32.xlu2 %v1649_v48  ;;  %v1118_v48 = vld [vmem:[%s4038_s8 + $0x490] sm:$0xff]  ;;  %3441 = vmatpush.msrb.mxu2 %v2353_v33  ;;  %v850_v60 = vadd.f32 %v849_v40, %v827_v43  ;;  %v1670_v33 = vsel %vm1228_vm0, %v1119_v30, 0.0 }
 0x190   : > { %1647 = vadd.xlane.f32.xlu1 %v1646_v61  ;;  %v1667_v45 = vsel %vm1228_vm0, %v1118_v48, 0.0  ;;  %v2351_v61 = vld [vmem:[%s6789_s4 + $0x310] sm:$0xff] }
 0x191   : > { %1644 = vadd.xlane.f32.xlu0 %v1643_v63  ;;  %v2979_v15 = vsel %vm2819_vm13, %v2978_v9, %v2977_v10  ;;  %3442 = vmatpush.msrb.mxu2 %v2352_v49  ;;  %v872_v9 = vpop.f32.mrf.mxu3  ;;  %v1661_v10 = vsel %vm1228_vm0, %v1116_v56, 0.0  ;;  %v1124_v56 = vld [vmem:[%s4038_s8 + $0x4c0] sm:$0xff] }
 0x192   : > { %v1525_v18 = vpop.xlane.xlu2 %1524  ;;  %v2981_v8 = vsel %vm2823_vm14, %v2980_v62, %v2979_v15  ;;  %v915_v62 = vpop.f32.mrf.mxu1  ;;  %v1121_v15 = vld [vmem:[%s4038_s8 + $0x4a8] sm:$0xff]  ;;  %v873_v16 = vadd.f32 %v872_v9, %v850_v60 }
 0x193   : > { %v1522_v22 = vpop.xlane.xlu1 %1521  ;;  %v2983_v24 = vsel %vm2827_vm15, %v2982_v6, %v2981_v8  ;;  %v2095_v50 = vmul.f32 0.0625, %v1525_v18  ;;  %v1664_v6 = vsel %vm1228_vm0, %v1117_v53, 0.0  ;;  %3443 = vmatpush.msrb.mxu2 %v2351_v61  ;;  %v916_v17 = vadd.f32 %v915_v62, %v893_v59  ;;  %v2349_v18 = vld [vmem:[%s6789_s4 + $0x300] sm:$0xff]  ;;  %v938_v8 = vpop.f32.mrf.mxu2 }
 0x194   : > { %v1519_v27 = vpop.xlane.xlu0 %1518  ;;  %3426 = vmatmul.f32.vlgmr.msrb.gmra.mxu1 %v2983_v24  ;;  %v2094_v46 = vmul.f32 0.0625, %v1522_v22  ;;  %v1120_v24 = vld [vmem:[%s4038_s8 + $0x4a0] sm:$0xff] }
 0x195   : > { %v2093_v47 = vmul.f32 0.0625, %v1519_v27  ;;  %3444 = vmatpush.msrb.mxu2 %v2350_v2  ;;  %v2987_v11 = vperm.slane %v2095_v50, %v4582_v5  ;;  %v939_v21 = vadd.f32 %v938_v8, %v916_v17  ;;  %v1673_v43 = vsel %vm1228_vm0, %v1120_v24, 0.0 }
 0x196   : > { %v2985_v63 = vperm.slane %v2094_v46, %v4572_v1 }
 0x197   : > { %1659 = vadd.xlane.f32.xlu2 %v1658_v28  ;;  %v2984_v0 = vperm.slane %v2093_v47, %v4557_v55  ;;  %3445 = vmatpush.msrb.mxu2 %v2349_v18  ;;  %v1676_v28 = vsel %vm1228_vm0, %v1121_v15, 0.0  ;;  %v2379_v15 = vld [vmem:[%s6789_s4 + $0x3f0] sm:$0xff] }
 0x198   : > { %1656 = vadd.xlane.f32.xlu1 %v1655_v36 }
 0x199   : > { %1653 = vadd.xlane.f32.xlu0 %v1652_v39  ;;  %v2986_v19 = vsel %vm2771_vm1, %v2985_v63, %v2984_v0  ;;  %v896_v39 = vadd.f32 %v895_v23, %v873_v16  ;;  %v1122_v0 = vld [vmem:[%s4038_s8 + $0x4b0] sm:$0xff] }
 0x19a   : > { %v1534_v51 = vpop.xlane.xlu2 %1533  ;;  %v2988_v34 = vsel %vm2775_vm2, %v2987_v11, %v2986_v19  ;;  %v918_v44 = vpop.f32.mrf.mxu1  ;;  %v1679_v18 = vsel %vm1228_vm0, %v1122_v0, 0.0 }
 0x19b   : > { %v1531_v37 = vpop.xlane.xlu1 %1530  ;;  %v2098_v25 = vmul.f32 0.0625, %v1534_v51  ;;  %v941_v60 = vpop.f32.mrf.mxu2 }
 0x19c   : > { %v1528_v57 = vpop.xlane.xlu0 %1527  ;;  %v2097_v12 = vmul.f32 0.0625, %v1531_v37  ;;  %v919_v37 = vadd.f32 %v918_v44, %v896_v39 }
 0x19d   : > { %v2096_v4 = vmul.f32 0.0625, %v1528_v57  ;;  %v2993_v46 = vperm.slane %v2098_v25, %v4636_v35  ;;  %v1127_v25 = vld [vmem:[%s4038_s8 + $0x4d8] sm:$0xff] }
 0x19e   : > { %v2991_v32 = vperm.slane %v2097_v12, %v4624_v29  ;;  %v942_v2 = vadd.f32 %v941_v60, %v919_v37  ;;  %v2373_v60 = vld [vmem:[%s6789_s4 + $0x3c0] sm:$0xff] }
 0x19f   : > { %1668 = vadd.xlane.f32.xlu2 %v1667_v45  ;;  %v2989_v20 = vperm.slane %v2096_v4, %v4585_v7  ;;  %v1123_v45 = vld [vmem:[%s4038_s8 + $0x4b8] sm:$0xff] }
 0x1a0   : > { %1665 = vadd.xlane.f32.xlu1 %v1664_v6  ;;  %v2380_v4 = vld [vmem:[%s6789_s4 + $0x3f8] sm:$0xff]  ;;  %v1682_v12 = vsel %vm1228_vm0, %v1123_v45, 0.0 }
 0x1a1   : > { %1662 = vadd.xlane.f32.xlu0 %v1661_v10  ;;  %v2990_v40 = vsel %vm6793_vm3, %v2989_v20, %v2988_v34  ;;  %vm969_vm3 = vcmask 261120   ;;  %v1685_v10 = vsel %vm1228_vm0, %v1124_v56, 0.0  ;;  %3450 = vmatpush.msrb.mxu3 %v2380_v4  ;;  %v1126_v34 = vld [vmem:[%s4038_s8 + $0x4d0] sm:$0xff]  ;;  %v2374_v56 = vld [vmem:[%s6789_s4 + $0x3c8] sm:$0xff]  ;;  %v1128_v4 = vld [vmem:[%s4038_s8 + $0x4e0] sm:$0xff] }
 0x1a2   : > { %v1543_v22 = vpop.xlane.xlu2 %1542  ;;  %v2992_v49 = vsel %vm2783_vm4, %v2991_v32, %v2990_v40  ;;  %v1125_v40 = vld [vmem:[%s4038_s8 + $0x4c8] sm:$0xff] }
 0x1a3   : > { %v1540_v27 = vpop.xlane.xlu1 %1539  ;;  %v2101_v50 = vmul.f32 0.0625, %v1543_v22  ;;  %v2994_v62 = vsel %vm2787_vm5, %v2993_v46, %v2992_v49  ;;  %3451 = vmatpush.msrb.mxu3 %v2379_v15  ;;  %v2378_v22 = vld [vmem:[%s6789_s4 + $0x3e8] sm:$0xff]  ;;  %v2375_v49 = vld [vmem:[%s6789_s4 + $0x3d0] sm:$0xff] }
 0x1a4   : > { %v1537_v36 = vpop.xlane.xlu0 %1536  ;;  %v2100_v47 = vmul.f32 0.0625, %v1540_v27  ;;  %v2377_v27 = vld [vmem:[%s6789_s4 + $0x3e0] sm:$0xff] }
 0x1a5   : > { %v2099_v41 = vmul.f32 0.0625, %v1537_v36  ;;  %v2999_v16 = vperm.slane %v2101_v50, %v4686_v3  ;;  %3452 = vmatpush.msrb.mxu3 %v2378_v22  ;;  %v1133_v22 = vld [vmem:[%s4038_s8 + $0x508] sm:$0xff] }
 0x1a6   : > { %v961_v48 = vpop.f32.mrf.mxu3  ;;  %v2997_v61 = vperm.slane %v2100_v47, %v4662_v54 }
 0x1a7   : > { %1677 = vadd.xlane.f32.xlu2 %v1676_v28  ;;  %v2995_v51 = vperm.slane %v2099_v41, %v4644_v42  ;;  %v962_v53 = vadd.f32 %v961_v48, %v939_v21  ;;  %3453 = vmatpush.msrb.mxu3 %v2377_v27  ;;  %v2376_v41 = vld [vmem:[%s6789_s4 + $0x3d8] sm:$0xff]  ;;  %v1691_v48 = vsel %vm1228_vm0, %v1126_v34, 0.0 }
 0x1a8   : > { %1674 = vadd.xlane.f32.xlu1 %v1673_v43  ;;  %v2368_v34 = vld [vmem:[%s6789_s4 + $0x398] sm:$0xff] }
 0x1a9   : > { %1671 = vadd.xlane.f32.xlu0 %v1670_v33  ;;  %v967_v59 = vmax.f32 %v962_v53, 0.0  ;;  %v2996_v6 = vsel %vm2791_vm6, %v2995_v51, %v2994_v62  ;;  %v1694_v33 = vsel %vm1228_vm0, %v1127_v25, 0.0  ;;  %3454 = vmatpush.msrb.mxu3 %v2376_v41  ;;  %v1688_v53 = vsel %vm1228_vm0, %v1125_v40, 0.0  ;;  %v2367_v41 = vld [vmem:[%s6789_s4 + $0x390] sm:$0xff] }
 0x1aa   : > { %v1552_v57 = vpop.xlane.xlu2 %1551  ;;  %v2998_v8 = vsel %vm2795_vm7, %v2997_v61, %v2996_v6  ;;  %v2372_v6 = vld [vmem:[%s6789_s4 + $0x3b8] sm:$0xff] }
 0x1ab   : > { %v1549_v63 = vpop.xlane.xlu1 %1548  ;;  %970 = vst.msk [vmem:[%s5737_s20] sm:$0xff] %vm969_vm3, %v967_v59  ;;  %v2104_v23 = vmul.f32 0.0625, %v1552_v57  ;;  %v3000_v30 = vsel %vm2799_vm8, %v2999_v16, %v2998_v8  ;;  %3455 = vmatpush.msrb.mxu3 %v2375_v49  ;;  %v1130_v59 = vld [vmem:[%s4038_s8 + $0x4f0] sm:$0xff]  ;;  %v2370_v8 = vld [vmem:[%s6789_s4 + $0x3a8] sm:$0xff]  ;;  %v1136_v49 = vld [vmem:[%s4038_s8 + $0x520] sm:$0xff] }
 0x1ac   : > { %v1546_v9 = vpop.xlane.xlu0 %1545  ;;  %v2103_v17 = vmul.f32 0.0625, %v1549_v63  ;;  %v1129_v63 = vld [vmem:[%s4038_s8 + $0x4e8] sm:$0xff]  ;;  %v2371_v16 = vld [vmem:[%s6789_s4 + $0x3b0] sm:$0xff] }
 0x1ad   : > { %v2102_v11 = vmul.f32 0.0625, %v1546_v9  ;;  %v3005_v44 = vperm.slane %v2104_v23, %v4737_v38  ;;  %3456 = vmatpush.msrb.mxu3 %v2374_v56  ;;  %v1135_v56 = vld [vmem:[%s4038_s8 + $0x518] sm:$0xff] }
 0x1ae   : > { %v964_v20 = vpop.f32.mrf.mxu3  ;;  %v3003_v28 = vperm.slane %v2103_v17, %v4716_v26  ;;  %v1697_v17 = vsel %vm1228_vm0, %v1128_v4, 0.0 }
 0x1af   : > { %v3001_v19 = vperm.slane %v2102_v11, %v4696_v14  ;;  %1686 = vadd.xlane.f32.xlu2 %v1685_v10  ;;  %v965_v24 = vadd.f32 %v964_v20, %v942_v2  ;;  %3457 = vmatpush.msrb.mxu3 %v2373_v60  ;;  %v1703_v2 = vsel %vm1228_vm0, %v1130_v59, 0.0 }
 0x1b0   : > { %1683 = vadd.xlane.f32.xlu1 %v1682_v12  ;;  %v1700_v12 = vsel %vm1228_vm0, %v1129_v63, 0.0 }
 0x1b1   : > { %1680 = vadd.xlane.f32.xlu0 %v1679_v18  ;;  %v968_v36 = vmax.f32 %v965_v24, 0.0  ;;  %v3002_v39 = vsel %vm2803_vm9, %v3001_v19, %v3000_v30  ;;  %3458 = vmatpush.msrb.mxu3 %v2372_v6  ;;  %v2369_v24 = vld [vmem:[%s6789_s4 + $0x3a0] sm:$0xff] }
 0x1b2   : > { %v1561_v32 = vpop.xlane.xlu2 %1560  ;;  %v3004_v51 = vsel %vm2807_vm10, %v3003_v28, %v3002_v39  ;;  %v1132_v28 = vld [vmem:[%s4038_s8 + $0x500] sm:$0xff]  ;;  %v1712_v39 = vsel %vm1228_vm0, %v1133_v22, 0.0 }
 0x1b3   : > { %v1558_v21 = vpop.xlane.xlu1 %1557  ;;  %971 = vst.msk [vmem:[%s5737_s20 + $0x8] sm:$0xff] %vm969_vm3, %v968_v36  ;;  %v2107_v50 = vmul.f32 0.0625, %v1561_v32  ;;  %v3006_v45 = vsel %vm2811_vm11, %v3005_v44, %v3004_v51  ;;  %3459 = vmatpush.msrb.mxu3 %v2371_v16  ;;  %v1131_v32 = vld [vmem:[%s4038_s8 + $0x4f8] sm:$0xff]  ;;  %v1709_v40 = vsel %vm1228_vm0, %v1132_v28, 0.0  ;;  %v2365_v51 = vld [vmem:[%s6789_s4 + $0x380] sm:$0xff]  ;;  %vm6798_vm3 = vcmask 261312  }
 0x1b4   : > { %v1555_v43 = vpop.xlane.xlu0 %1554  ;;  %v2106_v46 = vmul.f32 0.0625, %v1558_v21  ;;  %v1706_v44 = vsel %vm1228_vm0, %v1131_v32, 0.0  ;;  %v1138_v16 = vld [vmem:[%s4038_s8 + $0x530] sm:$0xff]  ;;  %s3852_s20 = scalar_lea.hbm %s6791_s6, 32 }
 0x1b5   : > { %v2105_v47 = vmul.f32 0.0625, %v1555_v43  ;;  %v3011_v9 = vperm.slane %v2107_v50, %v4789_v13  ;;  %3460 = vmatpush.msrb.mxu3 %v2370_v8 }
 0x1b6   : > { %v3009_v57 = vperm.slane %v2106_v46, %v4765_v58  ;;  %v2366_v46 = vld [vmem:[%s6789_s4 + $0x388] sm:$0xff] }
 0x1b7   : > { %v3007_v37 = vperm.slane %v2105_v47, %v4755_v52  ;;  %1695 = vadd.xlane.f32.xlu2 %v1694_v33  ;;  %3461 = vmatpush.msrb.mxu3 %v2369_v24 }
 0x1b8   : > { %1692 = vadd.xlane.f32.xlu1 %v1691_v48 }
 0x1b9   : > { %1689 = vadd.xlane.f32.xlu0 %v1688_v53  ;;  %v3008_v61 = vsel %vm2815_vm12, %v3007_v37, %v3006_v45  ;;  %3462 = vmatpush.msrb.mxu3 %v2368_v34  ;;  %v1134_v45 = vld [vmem:[%s4038_s8 + $0x510] sm:$0xff] }
 0x1ba   : > { %v1570_v62 = vpop.xlane.xlu2 %1569  ;;  %v3010_v15 = vsel %vm2819_vm13, %v3009_v57, %v3008_v61  ;;  %v1721_v61 = vsel %vm1228_vm0, %v1136_v49, 0.0  ;;  %v1715_v4 = vsel %vm1228_vm0, %v1134_v45, 0.0  ;;  %v2395_v34 = vld [vmem:[%s6789_s4 + $0x470] sm:$0xff] }
 0x1bb   : > { %v1567_v0 = vpop.xlane.xlu1 %1566  ;;  %v3012_v19 = vsel %vm2823_vm14, %v3011_v9, %v3010_v15  ;;  %v2110_v23 = vmul.f32 0.0625, %v1570_v62  ;;  %3463 = vmatpush.msrb.mxu3 %v2367_v41  ;;  %v1142_v41 = vld [vmem:[%s4038_s8 + $0x550] sm:$0xff] }
 0x1bc   : > { %v1564_v10 = vpop.xlane.xlu0 %1563  ;;  %v2109_v25 = vmul.f32 0.0625, %v1567_v0  ;;  %v1718_v0 = vsel %vm1228_vm0, %v1135_v56, 0.0  ;;  %v2392_v56 = vld [vmem:[%s6789_s4 + $0x458] sm:$0xff] }
 0x1bd   : > { %v2108_v11 = vmul.f32 0.0625, %v1564_v10  ;;  %v3016_v43 = vperm.slane %v2110_v23, %v4572_v1  ;;  %3464 = vmatpush.msrb.mxu3 %v2366_v46  ;;  %v2396_v23 = vld [vmem:[%s6789_s4 + $0x478] sm:$0xff]  ;;  %v1141_v46 = vld [vmem:[%s4038_s8 + $0x548] sm:$0xff] }
 0x1be   : > { %v3015_v33 = vperm.slane %v2109_v25, %v4557_v55  ;;  %3470 = vmatpush.msra.mxu0 %v2396_v23 }
 0x1bf   : > { %v3013_v18 = vperm.slane %v2108_v11, %v4815_v31  ;;  %1704 = vadd.xlane.f32.xlu2 %v1703_v2  ;;  %3465 = vmatpush.msrb.mxu3 %v2365_v51  ;;  %v1139_v11 = vld [vmem:[%s4038_s8 + $0x538] sm:$0xff]  ;;  %v1140_v51 = vld [vmem:[%s4038_s8 + $0x540] sm:$0xff] }
 0x1c0   : > { %1701 = vadd.xlane.f32.xlu1 %v1700_v12  ;;  %v3017_v53 = vsel %vm2771_vm1, %v3016_v43, %v3015_v33  ;;  %v1730_v24 = vsel %vm1228_vm0, %v1139_v11, 0.0  ;;  %3471 = vmatpush.msra.mxu0 %v2395_v34 }
 0x1c1   : > { %1698 = vadd.xlane.f32.xlu0 %v1697_v17  ;;  %v3014_v20 = vsel %vm2827_vm15, %v3013_v18, %v3012_v19  ;;  %v1137_v19 = vld [vmem:[%s4038_s8 + $0x528] sm:$0xff] }
 0x1c2   : > { %3446 = vmatmul.f32.vlgmr.msrb.gmra.mxu2 %v3014_v20  ;;  %v1579_v27 = vpop.xlane.xlu2 %1578  ;;  %v1724_v32 = vsel %vm1228_vm0, %v1137_v19, 0.0 }
 0x1c3   : > { %v1576_v30 = vpop.xlane.xlu1 %1575  ;;  %v2113_v50 = vmul.f32 0.0625, %v1579_v27  ;;  %v1727_v27 = vsel %vm1228_vm0, %v1138_v16, 0.0 }
 0x1c4   : > { %v1573_v36 = vpop.xlane.xlu0 %1572  ;;  %v2112_v47 = vmul.f32 0.0625, %v1576_v30 }
 0x1c5   : > { %v2111_v21 = vmul.f32 0.0625, %v1573_v36  ;;  %v3022_v6 = vperm.slane %v2113_v50, %v4624_v29 }
 0x1c6   : > { %v3020_v59 = vperm.slane %v2112_v47, %v4585_v7  ;;  %v2393_v47 = vld [vmem:[%s6789_s4 + $0x460] sm:$0xff] }
 0x1c7   : > { %1713 = vadd.xlane.f32.xlu2 %v1712_v39  ;;  %v3018_v48 = vperm.slane %v2111_v21, %v4582_v5  ;;  %v2394_v21 = vld [vmem:[%s6789_s4 + $0x468] sm:$0xff] }
 0x1c8   : > { %1710 = vadd.xlane.f32.xlu1 %v1709_v40  ;;  %3472 = vmatpush.msra.mxu0 %v2394_v21  ;;  %v1148_v21 = vld [vmem:[%s4038_s8 + $0x580] sm:$0xff] }
 0x1c9   : > { %1707 = vadd.xlane.f32.xlu0 %v1706_v44  ;;  %v3019_v62 = vsel %vm2775_vm2, %v3018_v48, %v3017_v53 }
 0x1ca   : > { %v1588_v37 = vpop.xlane.xlu2 %1587  ;;  %v3021_v10 = vsel %vm6798_vm3, %v3020_v59, %v3019_v62  ;;  %3473 = vmatpush.msra.mxu0 %v2393_v47  ;;  %v1736_v59 = vsel %vm1228_vm0, %v1141_v46, 0.0  ;;  %v2391_v62 = vld [vmem:[%s6789_s4 + $0x450] sm:$0xff] }
 0x1cb   : > { %v1585_v57 = vpop.xlane.xlu1 %1584  ;;  %v2116_v12 = vmul.f32 0.0625, %v1588_v37  ;;  %v3023_v18 = vsel %vm2783_vm4, %v3022_v6, %v3021_v10  ;;  %v1739_v37 = vsel %vm1228_vm0, %v1142_v41, 0.0  ;;  %v1145_v10 = vld [vmem:[%s4038_s8 + $0x568] sm:$0xff]  ;;  %v1146_v46 = vld [vmem:[%s4038_s8 + $0x570] sm:$0xff] }
 0x1cc   : > { %v1582_v60 = vpop.xlane.xlu0 %1581  ;;  %v2115_v9 = vmul.f32 0.0625, %v1585_v57  ;;  %3474 = vmatpush.msra.mxu0 %v2392_v56  ;;  %v1751_v56 = vsel %vm1228_vm0, %v1146_v46, 0.0 }
 0x1cd   : > { %v2114_v63 = vmul.f32 0.0625, %v1582_v60  ;;  %v3028_v28 = vperm.slane %v2116_v12, %v4662_v54  ;;  %v1144_v12 = vld [vmem:[%s4038_s8 + $0x560] sm:$0xff] }
 0x1ce   : > { %v3026_v17 = vperm.slane %v2115_v9, %v4644_v42  ;;  %3475 = vmatpush.msra.mxu0 %v2391_v62 }
 0x1cf   : > { %1722 = vadd.xlane.f32.xlu2 %v1721_v61  ;;  %v3024_v2 = vperm.slane %v2114_v63, %v4636_v35  ;;  %v1733_v61 = vsel %vm1228_vm0, %v1140_v51, 0.0 }
 0x1d0   : > { %1719 = vadd.xlane.f32.xlu1 %v1718_v0 }
 0x1d1   : > { %1716 = vadd.xlane.f32.xlu0 %v1715_v4  ;;  %v3025_v20 = vsel %vm2787_vm5, %v3024_v2, %v3023_v18  ;;  %v2390_v4 = vld [vmem:[%s6789_s4 + $0x448] sm:$0xff] }
 0x1d2   : > { %v1597_v15 = vpop.xlane.xlu2 %1596  ;;  %v3027_v36 = vsel %vm2791_vm6, %v3026_v17, %v3025_v20  ;;  %3476 = vmatpush.msra.mxu0 %v2390_v4  ;;  %v1143_v17 = vld [vmem:[%s4038_s8 + $0x558] sm:$0xff]  ;;  %v1748_v20 = vsel %vm1228_vm0, %v1145_v10, 0.0 }
 0x1d3   : > { %v1594_v8 = vpop.xlane.xlu1 %1593  ;;  %v2119_v40 = vmul.f32 0.0625, %v1597_v15  ;;  %v3029_v33 = vsel %vm2795_vm7, %v3028_v28, %v3027_v36  ;;  %v2389_v15 = vld [vmem:[%s6789_s4 + $0x440] sm:$0xff]  ;;  %v1742_v28 = vsel %vm1228_vm0, %v1143_v17, 0.0  ;;  %v2386_v36 = vld [vmem:[%s6789_s4 + $0x428] sm:$0xff] }
 0x1d4   : > { %v1591_v22 = vpop.xlane.xlu0 %1590  ;;  %v2118_v30 = vmul.f32 0.0625, %v1594_v8  ;;  %3477 = vmatpush.msra.mxu0 %v2389_v15 }
 0x1d5   : > { %v2117_v25 = vmul.f32 0.0625, %v1591_v22  ;;  %v3034_v50 = vperm.slane %v2119_v40, %v4716_v26  ;;  %v2388_v22 = vld [vmem:[%s6789_s4 + $0x438] sm:$0xff] }
 0x1d6   : > { %v3032_v43 = vperm.slane %v2118_v30, %v4696_v14  ;;  %3478 = vmatpush.msra.mxu0 %v2388_v22  ;;  %v2387_v30 = vld [vmem:[%s6789_s4 + $0x430] sm:$0xff] }
 0x1d7   : > { %v3030_v39 = vperm.slane %v2117_v25, %v4686_v3  ;;  %1731 = vadd.xlane.f32.xlu2 %v1730_v24  ;;  %v1745_v25 = vsel %vm1228_vm0, %v1144_v12, 0.0  ;;  %v1154_v22 = vld [vmem:[%s4038_s8 + $0x5b0] sm:$0xff] }
 0x1d8   : > { %1728 = vadd.xlane.f32.xlu1 %v1727_v27  ;;  %3479 = vmatpush.msra.mxu0 %v2387_v30 }
 0x1d9   : > { %1725 = vadd.xlane.f32.xlu0 %v1724_v32  ;;  %v3031_v48 = vsel %vm2799_vm8, %v3030_v39, %v3029_v33  ;;  %v2385_v33 = vld [vmem:[%s6789_s4 + $0x420] sm:$0xff] }
 0x1da   : > { %v1606_v44 = vpop.xlane.xlu2 %1605  ;;  %v3033_v60 = vsel %vm2803_vm9, %v3032_v43, %v3031_v48  ;;  %3480 = vmatpush.msra.mxu0 %v2386_v36  ;;  %v1147_v43 = vld [vmem:[%s4038_s8 + $0x578] sm:$0xff]  ;;  %v1757_v48 = vsel %vm1228_vm0, %v1148_v21, 0.0 }
 0x1db   : > { %v1603_v49 = vpop.xlane.xlu1 %1602  ;;  %v2122_v0 = vmul.f32 0.0625, %v1606_v44  ;;  %v3035_v9 = vsel %vm2807_vm10, %v3034_v50, %v3033_v60  ;;  %v2383_v50 = vld [vmem:[%s6789_s4 + $0x410] sm:$0xff] }
 0x1dc   : > { %v1600_v53 = vpop.xlane.xlu0 %1599  ;;  %v2121_v57 = vmul.f32 0.0625, %v1603_v49  ;;  %3481 = vmatpush.msra.mxu0 %v2385_v33  ;;  %v2384_v49 = vld [vmem:[%s6789_s4 + $0x418] sm:$0xff] }
 0x1dd   : > { %v2120_v45 = vmul.f32 0.0625, %v1600_v53  ;;  %v3040_v18 = vperm.slane %v2122_v0, %v4765_v58  ;;  %v2381_v0 = vld [vmem:[%s6789_s4 + $0x400] sm:$0xff] }
 0x1de   : > { %v3038_v6 = vperm.slane %v2121_v57, %v4755_v52  ;;  %3482 = vmatpush.msra.mxu0 %v2384_v49 }
 0x1df   : > { %v3036_v63 = vperm.slane %v2120_v45, %v4737_v38  ;;  %1740 = vadd.xlane.f32.xlu2 %v1739_v37  ;;  %v1754_v37 = vsel %vm1228_vm0, %v1147_v43, 0.0  ;;  %v2382_v45 = vld [vmem:[%s6789_s4 + $0x408] sm:$0xff] }
 0x1e0   : > { %1737 = vadd.xlane.f32.xlu1 %v1736_v59  ;;  %3483 = vmatpush.msra.mxu0 %v2383_v50 }
 0x1e1   : > { %1734 = vadd.xlane.f32.xlu0 %v1733_v61  ;;  %v3037_v2 = vsel %vm2811_vm11, %v3036_v63, %v3035_v9  ;;  %v1151_v61 = vld [vmem:[%s4038_s8 + $0x598] sm:$0xff]  ;;  %v1150_v63 = vld [vmem:[%s4038_s8 + $0x590] sm:$0xff]  ;;  %v1149_v9 = vld [vmem:[%s4038_s8 + $0x588] sm:$0xff] }
 0x1e2   : > { %v1615_v11 = vpop.xlane.xlu2 %1614  ;;  %v3039_v24 = vsel %vm2815_vm12, %v3038_v6, %v3037_v2  ;;  %3484 = vmatpush.msra.mxu0 %v2382_v45  ;;  %v1760_v17 = vsel %vm1228_vm0, %v1149_v9, 0.0  ;;  %v1155_v45 = vld [vmem:[%s4038_s8 + $0x5b8] sm:$0xff] }
 0x1e3   : > { %v1612_v16 = vpop.xlane.xlu1 %1611  ;;  %v3041_v34 = vsel %vm2819_vm13, %v3040_v18, %v3039_v24  ;;  %v2125_v51 = vmul.f32 0.0625, %v1615_v11  ;;  %v1766_v11 = vsel %vm1228_vm0, %v1151_v61, 0.0  ;;  %v2411_v61 = vld [vmem:[%s6789_s4 + $0x4f0] sm:$0xff]  ;;  %v1778_v9 = vsel %vm1228_vm0, %v1155_v45, 0.0 }
 0x1e4   : > { %v2124_v8 = vmul.f32 0.0625, %v1612_v16  ;;  %v1609_v19 = vpop.xlane.xlu0 %1608  ;;  %3485 = vmatpush.msra.mxu0 %v2381_v0  ;;  %v1763_v16 = vsel %vm1228_vm0, %v1150_v63, 0.0 }
 0x1e5   : > { %v2123_v23 = vmul.f32 0.0625, %v1609_v19  ;;  %v3046_v59 = vperm.slane %v2125_v51, %v4557_v55 }
 0x1e6   : > { %v3044_v27 = vperm.slane %v2124_v8, %v4815_v31 }
 0x1e7   : > { %v3042_v32 = vperm.slane %v2123_v23, %v4789_v13  ;;  %1749 = vadd.xlane.f32.xlu2 %v1748_v20 }
 0x1e8   : > { %1746 = vadd.xlane.f32.xlu1 %v1745_v25  ;;  %v1153_v25 = vld [vmem:[%s4038_s8 + $0x5a8] sm:$0xff] }
 0x1e9   : > { %1743 = vadd.xlane.f32.xlu0 %v1742_v28  ;;  %v3043_v39 = vsel %vm2823_vm14, %v3042_v32, %v3041_v34  ;;  %v1152_v32 = vld [vmem:[%s4038_s8 + $0x5a0] sm:$0xff] }
 0x1ea   : > { %v3045_v40 = vsel %vm2827_vm15, %v3044_v27, %v3043_v39  ;;  %v1624_v41 = vpop.xlane.xlu2 %1623  ;;  %v1775_v39 = vsel %vm1228_vm0, %v1154_v22, 0.0  ;;  %v1769_v33 = vsel %vm1228_vm0, %v1152_v32, 0.0  ;;  %v2407_v32 = vld [vmem:[%s6789_s4 + $0x4d0] sm:$0xff] }
 0x1eb   : > { %3466 = vmatmul.f32.vlgmr.msrb.gmra.mxu3 %v3045_v40  ;;  %v1621_v44 = vpop.xlane.xlu1 %1620  ;;  %v2128_v4 = vmul.f32 0.0625, %v1624_v41  ;;  %v1772_v40 = vsel %vm1228_vm0, %v1153_v25, 0.0 }
 0x1ec   : > { %v1618_v47 = vpop.xlane.xlu0 %1617  ;;  %v2127_v57 = vmul.f32 0.0625, %v1621_v44 }
 0x1ed   : > { %v2126_v53 = vmul.f32 0.0625, %v1618_v47  ;;  %v3051_v18 = vperm.slane %v2128_v4, %v4585_v7 }
 0x1ee   : > { %v3049_v10 = vperm.slane %v2127_v57, %v4582_v5 }
 0x1ef   : > { %1758 = vadd.xlane.f32.xlu2 %v1757_v48  ;;  %v3047_v60 = vperm.slane %v2126_v53, %v4572_v1  ;;  %v1157_v48 = vld [vmem:[%s4038_s8 + $0x5c8] sm:$0xff] }
 0x1f0   : > { %1755 = vadd.xlane.f32.xlu1 %v1754_v37  ;;  %v1156_v37 = vld [vmem:[%s4038_s8 + $0x5c0] sm:$0xff] }
 0x1f1   : > { %1752 = vadd.xlane.f32.xlu0 %v1751_v56  ;;  %v3048_v12 = vsel %vm2771_vm1, %v3047_v60, %v3046_v59  ;;  %v2412_v56 = vld [vmem:[%s6789_s4 + $0x4f8] sm:$0xff]  ;;  %v1784_v60 = vsel %vm1228_vm0, %v1157_v48, 0.0  ;;  %v1781_v4 = vsel %vm1228_vm0, %v1156_v37, 0.0  ;;  %v1197_v48 = vld [vmem:[%s4038_s8 + $0x708] sm:$0xff] }
 0x1f2   : > { %v1633_v62 = vpop.xlane.xlu2 %1632  ;;  %v3050_v19 = vsel %vm2775_vm2, %v3049_v10, %v3048_v12  ;;  %3490 = vmatpush.msra.mxu1 %v2412_v56  ;;  %v2410_v10 = vld [vmem:[%s6789_s4 + $0x4e8] sm:$0xff]  ;;  %v2409_v12 = vld [vmem:[%s6789_s4 + $0x4e0] sm:$0xff]  ;;  %v2404_v37 = vld [vmem:[%s6789_s4 + $0x4b8] sm:$0xff] }
 0x1f3   : > { %v1630_v6 = vpop.xlane.xlu1 %1629  ;;  %v2131_v24 = vmul.f32 0.0625, %v1633_v62  ;;  %v3052_v28 = vsel %vm6798_vm3, %v3051_v18, %v3050_v19  ;;  %v1159_v19 = vld [vmem:[%s4038_s8 + $0x5d8] sm:$0xff] }
 0x1f4   : > { %v1627_v2 = vpop.xlane.xlu0 %1626  ;;  %v2130_v8 = vmul.f32 0.0625, %v1630_v6  ;;  %3491 = vmatpush.msra.mxu1 %v2411_v61 }
 0x1f5   : > { %v2129_v15 = vmul.f32 0.0625, %v1627_v2  ;;  %v3057_v41 = vperm.slane %v2131_v24, %v4644_v42 }
 0x1f6   : > { %v3055_v27 = vperm.slane %v2130_v8, %v4636_v35  ;;  %3492 = vmatpush.msra.mxu1 %v2410_v10  ;;  %v2400_v10 = vld [vmem:[%s6789_s4 + $0x498] sm:$0xff] }
 0x1f7   : > { %1767 = vadd.xlane.f32.xlu2 %v1766_v11  ;;  %v3053_v20 = vperm.slane %v2129_v15, %v4624_v29 }
 0x1f8   : > { %1764 = vadd.xlane.f32.xlu1 %v1763_v16  ;;  %3493 = vmatpush.msra.mxu1 %v2409_v12 }
 0x1f9   : > { %1761 = vadd.xlane.f32.xlu0 %v1760_v17  ;;  %v3054_v34 = vsel %vm2783_vm4, %v3053_v20, %v3052_v28  ;;  %v1160_v17 = vld [vmem:[%s4038_s8 + $0x5e0] sm:$0xff]  ;;  %v2408_v20 = vld [vmem:[%s6789_s4 + $0x4d8] sm:$0xff] }
 0x1fa   : > { %v1642_v23 = vpop.xlane.xlu2 %1641  ;;  %v3056_v44 = vsel %vm2787_vm5, %v3055_v27, %v3054_v34  ;;  %3494 = vmatpush.msra.mxu1 %v2408_v20 }
 0x1fb   : > { %v1639_v30 = vpop.xlane.xlu1 %1638  ;;  %v2134_v47 = vmul.f32 0.0625, %v1642_v23  ;;  %v3058_v51 = vsel %vm2791_vm6, %v3057_v41, %v3056_v44  ;;  %v1158_v23 = vld [vmem:[%s4038_s8 + $0x5d0] sm:$0xff]  ;;  %v2406_v41 = vld [vmem:[%s6789_s4 + $0x4c8] sm:$0xff] }
 0x1fc   : > { %v1636_v36 = vpop.xlane.xlu0 %1635  ;;  %v2133_v43 = vmul.f32 0.0625, %v1639_v30  ;;  %v1793_v30 = vsel %vm1228_vm0, %v1160_v17, 0.0  ;;  %3495 = vmatpush.msra.mxu1 %v2407_v32 }
 0x1fd   : > { %v2132_v21 = vmul.f32 0.0625, %v1636_v36  ;;  %v3063_v62 = vperm.slane %v2134_v47, %v4696_v14 }
 0x1fe   : > { %v3061_v49 = vperm.slane %v2133_v43, %v4686_v3  ;;  %3496 = vmatpush.msra.mxu1 %v2406_v41 }
 0x1ff   : > { %v3059_v46 = vperm.slane %v2132_v21, %v4662_v54  ;;  %1776 = vadd.xlane.f32.xlu2 %v1775_v39  ;;  %v1790_v39 = vsel %vm1228_vm0, %v1159_v19, 0.0 }
 0x200   : > { %1773 = vadd.xlane.f32.xlu1 %v1772_v40  ;;  %v1787_v40 = vsel %vm1228_vm0, %v1158_v23, 0.0 }
 0x201   : > { %1770 = vadd.xlane.f32.xlu0 %v1769_v33  ;;  %v3060_v50 = vsel %vm2795_vm7, %v3059_v46, %v3058_v51  ;;  %v2405_v46 = vld [vmem:[%s6789_s4 + $0x4c0] sm:$0xff] }
 0x202   : > { %v1651_v53 = vpop.xlane.xlu2 %1650  ;;  %v3062_v6 = vsel %vm2799_vm8, %v3061_v49, %v3060_v50  ;;  %3497 = vmatpush.msra.mxu1 %v2405_v46 }
 0x203   : > { %v1648_v57 = vpop.xlane.xlu1 %1647  ;;  %v2137_v11 = vmul.f32 0.0625, %v1651_v53  ;;  %v3064_v16 = vsel %vm2803_vm9, %v3063_v62, %v3062_v6  ;;  %v1196_v53 = vld [vmem:[%s4038_s8 + $0x700] sm:$0xff] }
 0x204   : > { %v1645_v59 = vpop.xlane.xlu0 %1644  ;;  %v2136_v63 = vmul.f32 0.0625, %v1648_v57  ;;  %v1161_v57 = vld [vmem:[%s4038_s8 + $0x5e8] sm:$0xff]  ;;  %3498 = vmatpush.msra.mxu1 %v2404_v37  ;;  %v1901_v61 = vsel %vm1228_vm0, %v1196_v53, 0.0 }
 0x205   : > { %v2135_v0 = vmul.f32 0.0625, %v1645_v59  ;;  %v3069_v25 = vperm.slane %v2137_v11, %v4755_v52  ;;  %v1904_v59 = vsel %vm1228_vm0, %v1197_v48, 0.0  ;;  %v1796_v62 = vsel %vm1228_vm0, %v1161_v57, 0.0  ;;  %v1164_v11 = vld [vmem:[%s4038_s8 + $0x600] sm:$0xff] }
 0x206   : > { %v3067_v15 = vperm.slane %v2136_v63, %v4737_v38  ;;  %v2402_v63 = vld [vmem:[%s6789_s4 + $0x4a8] sm:$0xff] }
 0x207   : > { %v3065_v2 = vperm.slane %v2135_v0, %v4716_v26  ;;  %1785 = vadd.xlane.f32.xlu2 %v1784_v60  ;;  %v2403_v60 = vld [vmem:[%s6789_s4 + $0x4b0] sm:$0xff]  ;;  %v2401_v0 = vld [vmem:[%s6789_s4 + $0x4a0] sm:$0xff] }
 0x208   : > { %1782 = vadd.xlane.f32.xlu1 %v1781_v4  ;;  %3499 = vmatpush.msra.mxu1 %v2403_v60 }
 0x209   : > { %1779 = vadd.xlane.f32.xlu0 %v1778_v9  ;;  %v3066_v18 = vsel %vm2807_vm10, %v3065_v2, %v3064_v16  ;;  %v1165_v9 = vld [vmem:[%s4038_s8 + $0x608] sm:$0xff] }
 0x20a   : > { %v1660_v8 = vpop.xlane.xlu2 %1659  ;;  %v3068_v34 = vsel %vm2811_vm11, %v3067_v15, %v3066_v18  ;;  %3500 = vmatpush.msra.mxu1 %v2402_v63  ;;  %v1198_v15 = vld [vmem:[%s4038_s8 + $0x710] sm:$0xff]  ;;  %v1808_v18 = vsel %vm1228_vm0, %v1165_v9, 0.0 }
 0x20b   : > { %v2140_v22 = vmul.f32 0.0625, %v1660_v8  ;;  %v1657_v24 = vpop.xlane.xlu1 %1656  ;;  %v3070_v44 = vsel %vm2815_vm12, %v3069_v25, %v3068_v34  ;;  %v2399_v8 = vld [vmem:[%s6789_s4 + $0x490] sm:$0xff]  ;;  %v1907_v23 = vsel %vm1228_vm0, %v1198_v15, 0.0  ;;  %v2398_v25 = vld [vmem:[%s6789_s4 + $0x488] sm:$0xff] }
 0x20c   : > { %v2139_v27 = vmul.f32 0.0625, %v1657_v24  ;;  %v1654_v28 = vpop.xlane.xlu0 %1653  ;;  %3501 = vmatpush.msra.mxu1 %v2401_v0  ;;  %v1805_v24 = vsel %vm1228_vm0, %v1164_v11, 0.0  ;;  %v2427_v15 = vld [vmem:[%s6789_s4 + $0x570] sm:$0xff] }
 0x20d   : > { %v2138_v36 = vmul.f32 0.0625, %v1654_v28  ;;  %v3075_v43 = vperm.slane %v2140_v22, %v4815_v31 }
 0x20e   : > { %v3073_v21 = vperm.slane %v2139_v27, %v4789_v13  ;;  %3502 = vmatpush.msra.mxu1 %v2400_v10 }
 0x20f   : > { %v3071_v33 = vperm.slane %v2138_v36, %v4765_v58  ;;  %1794 = vadd.xlane.f32.xlu2 %v1793_v30  ;;  %v2397_v30 = vld [vmem:[%s6789_s4 + $0x480] sm:$0xff]  ;;  %v1213_v36 = vld [vmem:[%s4038_s8 + $0x788] sm:$0xff] }
 0x210   : > { %1791 = vadd.xlane.f32.xlu1 %v1790_v39  ;;  %3503 = vmatpush.msra.mxu1 %v2399_v8 }
 0x211   : > { %v3072_v47 = vsel %vm2819_vm13, %v3071_v33, %v3070_v44  ;;  %1788 = vadd.xlane.f32.xlu0 %v1787_v40 }
 0x212   : > { %v1669_v49 = vpop.xlane.xlu2 %1668  ;;  %v3074_v51 = vsel %vm2823_vm14, %v3073_v21, %v3072_v47  ;;  %3504 = vmatpush.msra.mxu1 %v2398_v25  ;;  %v1212_v21 = vld [vmem:[%s4038_s8 + $0x780] sm:$0xff]  ;;  %v1952_v47 = vsel %vm1228_vm0, %v1213_v36, 0.0  ;;  %v1167_v36 = vld [vmem:[%s4038_s8 + $0x618] sm:$0xff] }
 0x213   : > { %v1666_v56 = vpop.xlane.xlu1 %1665  ;;  %v3076_v50 = vsel %vm2827_vm15, %v3075_v43, %v3074_v51  ;;  %v2143_v16 = vmul.f32 0.0625, %v1669_v49  ;;  %v1199_v43 = vld [vmem:[%s4038_s8 + $0x718] sm:$0xff]  ;;  %v1949_v51 = vsel %vm1228_vm0, %v1212_v21, 0.0 }
 0x214   : > { %v1663_v45 = vpop.xlane.xlu0 %1662  ;;  %3486 = vmatmul.f32.vlgmr.msra.gmra.mxu0 %v3076_v50  ;;  %v2142_v4 = vmul.f32 0.0625, %v1666_v56  ;;  %3505 = vmatpush.msra.mxu1 %v2397_v30  ;;  %v1910_v53 = vsel %vm1228_vm0, %v1199_v43, 0.0  ;;  %v1180_v30 = vld [vmem:[%s4038_s8 + $0x680] sm:$0xff] }
 0x215   : > { %v2141_v6 = vmul.f32 0.0625, %v1663_v45  ;;  %v3080_v27 = vperm.slane %v2143_v16, %v4582_v5  ;;  %v1214_v45 = vld [vmem:[%s4038_s8 + $0x790] sm:$0xff] }
 0x216   : > { %v3078_v19 = vperm.slane %v2142_v4, %v4572_v1  ;;  %v1166_v4 = vld [vmem:[%s4038_s8 + $0x610] sm:$0xff] }
 0x217   : > { %1905 = vadd.xlane.f32.xlu2 %v1904_v59  ;;  %v3077_v20 = vperm.slane %v2141_v6, %v4557_v55  ;;  %v2428_v6 = vld [vmem:[%s6789_s4 + $0x578] sm:$0xff] }
 0x218   : > { %1902 = vadd.xlane.f32.xlu1 %v1901_v61  ;;  %v1200_v61 = vld [vmem:[%s4038_s8 + $0x720] sm:$0xff]  ;;  %3510 = vmatpush.msra.mxu2 %v2428_v6 }
 0x219   : > { %1797 = vadd.xlane.f32.xlu0 %v1796_v62  ;;  %v3079_v32 = vsel %vm2771_vm1, %v3078_v19, %v3077_v20  ;;  %v2426_v20 = vld [vmem:[%s6789_s4 + $0x568] sm:$0xff] }
 0x21a   : > { %v1678_v2 = vpop.xlane.xlu2 %1677  ;;  %v3081_v44 = vsel %vm2775_vm2, %v3080_v27, %v3079_v32  ;;  %3511 = vmatpush.msra.mxu2 %v2427_v15 }
 0x21b   : > { %v1675_v12 = vpop.xlane.xlu1 %1674  ;;  %v2146_v40 = vmul.f32 0.0625, %v1678_v2  ;;  %v1955_v2 = vsel %vm1228_vm0, %v1214_v45, 0.0 }
 0x21c   : > { %v1672_v17 = vpop.xlane.xlu0 %1671  ;;  %v2145_v28 = vmul.f32 0.0625, %v1675_v12  ;;  %v1913_v12 = vsel %vm1228_vm0, %v1200_v61, 0.0  ;;  %3512 = vmatpush.msra.mxu2 %v2426_v20 }
 0x21d   : > { %v2144_v22 = vmul.f32 0.0625, %v1672_v17  ;;  %v3086_v37 = vperm.slane %v2146_v40, %v4636_v35 }
 0x21e   : > { %v3084_v33 = vperm.slane %v2145_v28, %v4624_v29 }
 0x21f   : > { %1809 = vadd.xlane.f32.xlu2 %v1808_v18  ;;  %v3082_v34 = vperm.slane %v2144_v22, %v4585_v7  ;;  %v1811_v18 = vsel %vm1228_vm0, %v1166_v4, 0.0 }
 0x220   : > { %1806 = vadd.xlane.f32.xlu1 %v1805_v24  ;;  %v1181_v24 = vld [vmem:[%s4038_s8 + $0x688] sm:$0xff] }
 0x221   : > { %1908 = vadd.xlane.f32.xlu0 %v1907_v23  ;;  %v3083_v48 = vsel %vm6798_vm3, %v3082_v34, %v3081_v44  ;;  %v2425_v23 = vld [vmem:[%s6789_s4 + $0x560] sm:$0xff]  ;;  %v1856_v40 = vsel %vm1228_vm0, %v1181_v24, 0.0  ;;  %v1853_v44 = vsel %vm1228_vm0, %v1180_v30, 0.0 }
 0x222   : > { %v1687_v39 = vpop.xlane.xlu2 %1686  ;;  %v3085_v50 = vsel %vm2783_vm4, %v3084_v33, %v3083_v48  ;;  %3513 = vmatpush.msra.mxu2 %v2425_v23  ;;  %v1814_v48 = vsel %vm1228_vm0, %v1167_v36, 0.0  ;;  %v1202_v23 = vld [vmem:[%s4038_s8 + $0x730] sm:$0xff] }
 0x223   : > { %v1684_v41 = vpop.xlane.xlu1 %1683  ;;  %v2149_v59 = vmul.f32 0.0625, %v1687_v39  ;;  %v3087_v63 = vsel %vm2787_vm5, %v3086_v37, %v3085_v50  ;;  %v2424_v39 = vld [vmem:[%s6789_s4 + $0x558] sm:$0xff]  ;;  %v1168_v50 = vld [vmem:[%s4038_s8 + $0x620] sm:$0xff]  ;;  %v1919_v36 = vsel %vm1228_vm0, %v1202_v23, 0.0 }
 0x224   : > { %v1681_v46 = vpop.xlane.xlu0 %1680  ;;  %v2148_v56 = vmul.f32 0.0625, %v1684_v41  ;;  %3514 = vmatpush.msra.mxu2 %v2424_v39  ;;  %v1817_v6 = vsel %vm1228_vm0, %v1168_v50, 0.0  ;;  %v2415_v39 = vld [vmem:[%s6789_s4 + $0x510] sm:$0xff] }
 0x225   : > { %v2147_v49 = vmul.f32 0.0625, %v1681_v46  ;;  %v3092_v16 = vperm.slane %v2149_v59, %v4686_v3  ;;  %v2423_v46 = vld [vmem:[%s6789_s4 + $0x550] sm:$0xff] }
 0x226   : > { %v3090_v62 = vperm.slane %v2148_v56, %v4662_v54  ;;  %3515 = vmatpush.msra.mxu2 %v2423_v46  ;;  %v1203_v46 = vld [vmem:[%s4038_s8 + $0x738] sm:$0xff] }
 0x227   : > { %1953 = vadd.xlane.f32.xlu2 %v1952_v47  ;;  %v3088_v57 = vperm.slane %v2147_v49, %v4644_v42 }
 0x228   : > { %1950 = vadd.xlane.f32.xlu1 %v1949_v51  ;;  %v2422_v51 = vld [vmem:[%s6789_s4 + $0x548] sm:$0xff] }
 0x229   : > { %1911 = vadd.xlane.f32.xlu0 %v1910_v53  ;;  %v3089_v9 = vsel %vm2791_vm6, %v3088_v57, %v3087_v63  ;;  %3516 = vmatpush.msra.mxu2 %v2422_v51  ;;  %v2421_v57 = vld [vmem:[%s6789_s4 + $0x540] sm:$0xff]  ;;  %v2420_v63 = vld [vmem:[%s6789_s4 + $0x538] sm:$0xff] }
 0x22a   : > { %v1696_v60 = vpop.xlane.xlu2 %1695  ;;  %v3091_v8 = vsel %vm2795_vm7, %v3090_v62, %v3089_v9  ;;  %v1201_v62 = vld [vmem:[%s4038_s8 + $0x728] sm:$0xff]  ;;  %v1183_v51 = vld [vmem:[%s4038_s8 + $0x698] sm:$0xff] }
 0x22b   : > { %v1693_v0 = vpop.xlane.xlu1 %1692  ;;  %v2152_v22 = vmul.f32 0.0625, %v1696_v60  ;;  %v3093_v27 = vsel %vm2799_vm8, %v3092_v16, %v3091_v8  ;;  %v1215_v60 = vld [vmem:[%s4038_s8 + $0x798] sm:$0xff]  ;;  %3517 = vmatpush.msra.mxu2 %v2421_v57  ;;  %v2418_v16 = vld [vmem:[%s6789_s4 + $0x528] sm:$0xff]  ;;  %v1216_v8 = vld [vmem:[%s4038_s8 + $0x7a0] sm:$0xff] }
 0x22c   : > { %v1690_v10 = vpop.xlane.xlu0 %1689  ;;  %v2151_v17 = vmul.f32 0.0625, %v1693_v0 }
 0x22d   : > { %v2150_v11 = vmul.f32 0.0625, %v1690_v10  ;;  %v3098_v41 = vperm.slane %v2152_v22, %v4737_v38  ;;  %3518 = vmatpush.msra.mxu2 %v2420_v63  ;;  %v1958_v10 = vsel %vm1228_vm0, %v1215_v60, 0.0 }
 0x22e   : > { %v3096_v25 = vperm.slane %v2151_v17, %v4716_v26 }
 0x22f   : > { %v3094_v19 = vperm.slane %v2150_v11, %v4696_v14  ;;  %1956 = vadd.xlane.f32.xlu2 %v1955_v2  ;;  %v2419_v11 = vld [vmem:[%s6789_s4 + $0x530] sm:$0xff] }
 0x230   : > { %1914 = vadd.xlane.f32.xlu1 %v1913_v12  ;;  %v1916_v12 = vsel %vm1228_vm0, %v1201_v62, 0.0  ;;  %3519 = vmatpush.msra.mxu2 %v2419_v11  ;;  %v1162_v11 = vld [vmem:[%s4038_s8 + $0x5f0] sm:$0xff] }
 0x231   : > { %1812 = vadd.xlane.f32.xlu0 %v1811_v18  ;;  %v3095_v32 = vsel %vm2803_vm9, %v3094_v19, %v3093_v27  ;;  %v2417_v19 = vld [vmem:[%s6789_s4 + $0x520] sm:$0xff]  ;;  %v1182_v27 = vld [vmem:[%s4038_s8 + $0x690] sm:$0xff] }
 0x232   : > { %v1705_v28 = vpop.xlane.xlu2 %1704  ;;  %v3097_v47 = vsel %vm2807_vm10, %v3096_v25, %v3095_v32  ;;  %3520 = vmatpush.msra.mxu2 %v2418_v16  ;;  %v1961_v32 = vsel %vm1228_vm0, %v1216_v8, 0.0 }
 0x233   : > { %v1702_v34 = vpop.xlane.xlu1 %1701  ;;  %v2155_v53 = vmul.f32 0.0625, %v1705_v28  ;;  %v3099_v56 = vsel %vm2811_vm11, %v3098_v41, %v3097_v47  ;;  %v2416_v28 = vld [vmem:[%s6789_s4 + $0x518] sm:$0xff]  ;;  %v1859_v41 = vsel %vm1228_vm0, %v1182_v27, 0.0  ;;  %v2413_v47 = vld [vmem:[%s6789_s4 + $0x500] sm:$0xff] }
 0x234   : > { %v1699_v21 = vpop.xlane.xlu0 %1698  ;;  %v2154_v43 = vmul.f32 0.0625, %v1702_v34  ;;  %3521 = vmatpush.msra.mxu2 %v2417_v19 }
 0x235   : > { %v2153_v33 = vmul.f32 0.0625, %v1699_v21  ;;  %v3104_v0 = vperm.slane %v2155_v53, %v4789_v13 }
 0x236   : > { %v3102_v37 = vperm.slane %v2154_v43, %v4765_v58  ;;  %3522 = vmatpush.msra.mxu2 %v2416_v28  ;;  %v2414_v43 = vld [vmem:[%s6789_s4 + $0x508] sm:$0xff] }
 0x237   : > { %v3100_v49 = vperm.slane %v2153_v33, %v4755_v52  ;;  %1857 = vadd.xlane.f32.xlu2 %v1856_v40 }
 0x238   : > { %1854 = vadd.xlane.f32.xlu1 %v1853_v44  ;;  %3523 = vmatpush.msra.mxu2 %v2415_v39 }
 0x239   : > { %1815 = vadd.xlane.f32.xlu0 %v1814_v48  ;;  %v3101_v45 = vsel %vm2815_vm12, %v3100_v49, %v3099_v56  ;;  %v1169_v56 = vld [vmem:[%s4038_s8 + $0x628] sm:$0xff] }
 0x23a   : > { %v1714_v59 = vpop.xlane.xlu2 %1713  ;;  %v3103_v2 = vsel %vm2819_vm13, %v3102_v37, %v3101_v45  ;;  %3524 = vmatpush.msra.mxu2 %v2414_v43  ;;  %v1922_v45 = vsel %vm1228_vm0, %v1203_v46, 0.0  ;;  %v1820_v62 = vsel %vm1228_vm0, %v1169_v56, 0.0  ;;  %v1184_v43 = vld [vmem:[%s4038_s8 + $0x6a0] sm:$0xff] }
 0x23b   : > { %v1711_v61 = vpop.xlane.xlu1 %1710  ;;  %v3105_v17 = vsel %vm2823_vm14, %v3104_v0, %v3103_v2  ;;  %v2158_v20 = vmul.f32 0.0625, %v1714_v59 }
 0x23c   : > { %v1708_v4 = vpop.xlane.xlu0 %1707  ;;  %v2157_v22 = vmul.f32 0.0625, %v1711_v61  ;;  %3525 = vmatpush.msra.mxu2 %v2413_v47  ;;  %v1862_v61 = vsel %vm1228_vm0, %v1183_v51, 0.0 }
 0x23d   : > { %v2156_v9 = vmul.f32 0.0625, %v1708_v4  ;;  %v3109_v21 = vperm.slane %v2158_v20, %v4572_v1 }
 0x23e   : > { %v3108_v40 = vperm.slane %v2157_v22, %v4557_v55  ;;  %v1799_v22 = vsel %vm1228_vm0, %v1162_v11, 0.0 }
 0x23f   : > { %v3106_v15 = vperm.slane %v2156_v9, %v4815_v31  ;;  %1818 = vadd.xlane.f32.xlu2 %v1817_v6  ;;  %v1170_v9 = vld [vmem:[%s4038_s8 + $0x630] sm:$0xff] }
 0x240   : > { %1959 = vadd.xlane.f32.xlu1 %v1958_v10  ;;  %v3110_v48 = vsel %vm2771_vm1, %v3109_v21, %v3108_v40  ;;  %v1823_v19 = vsel %vm1228_vm0, %v1170_v9, 0.0  ;;  %v1204_v21 = vld [vmem:[%s4038_s8 + $0x740] sm:$0xff] }
 0x241   : > { %1917 = vadd.xlane.f32.xlu0 %v1916_v12  ;;  %v3107_v18 = vsel %vm2827_vm15, %v3106_v15, %v3105_v17  ;;  %v1217_v17 = vld [vmem:[%s4038_s8 + $0x7a8] sm:$0xff] }
 0x242   : > { %3506 = vmatmul.f32.vlgmr.msra.gmra.mxu1 %v3107_v18  ;;  %v1723_v24 = vpop.xlane.xlu2 %1722 }
 0x243   : > { %v1720_v25 = vpop.xlane.xlu1 %1719  ;;  %v2161_v53 = vmul.f32 0.0625, %v1723_v24 }
 0x244   : > { %v1717_v30 = vpop.xlane.xlu0 %1716  ;;  %v2160_v33 = vmul.f32 0.0625, %v1720_v25  ;;  %v1964_v25 = vsel %vm1228_vm0, %v1217_v17, 0.0 }
 0x245   : > { %v2159_v34 = vmul.f32 0.0625, %v1717_v30  ;;  %v3115_v63 = vperm.slane %v2161_v53, %v4624_v29  ;;  %v1865_v53 = vsel %vm1228_vm0, %v1184_v43, 0.0 }
 0x246   : > { %v3113_v50 = vperm.slane %v2160_v33, %v4585_v7 }
 0x247   : > { %1962 = vadd.xlane.f32.xlu2 %v1961_v32  ;;  %v3111_v44 = vperm.slane %v2159_v34, %v4582_v5  ;;  %v1218_v32 = vld [vmem:[%s4038_s8 + $0x7b0] sm:$0xff] }
 0x248   : > { %1920 = vadd.xlane.f32.xlu1 %v1919_v36 }
 0x249   : > { %1860 = vadd.xlane.f32.xlu0 %v1859_v41  ;;  %v3112_v59 = vsel %vm2775_vm2, %v3111_v44, %v3110_v48  ;;  %v1967_v44 = vsel %vm1228_vm0, %v1218_v32, 0.0 }
 0x24a   : > { %v1732_v49 = vpop.xlane.xlu2 %1731  ;;  %v3114_v4 = vsel %vm6798_vm3, %v3113_v50, %v3112_v59 }
 0x24b   : > { %v1729_v37 = vpop.xlane.xlu1 %1728  ;;  %v2164_v10 = vmul.f32 0.0625, %v1732_v49  ;;  %v3116_v15 = vsel %vm2783_vm4, %v3115_v63, %v3114_v4  ;;  %v1925_v49 = vsel %vm1228_vm0, %v1204_v21, 0.0  ;;  %v1163_v63 = vld [vmem:[%s4038_s8 + $0x5f8] sm:$0xff] }
 0x24c   : > { %v1726_v57 = vpop.xlane.xlu0 %1725  ;;  %v2163_v0 = vmul.f32 0.0625, %v1729_v37 }
 0x24d   : > { %v2162_v60 = vmul.f32 0.0625, %v1726_v57  ;;  %v3121_v24 = vperm.slane %v2164_v10, %v4662_v54 }
 0x24e   : > { %v3119_v12 = vperm.slane %v2163_v0, %v4644_v42 }
 0x24f   : > { %1923 = vadd.xlane.f32.xlu2 %v1922_v45  ;;  %v3117_v6 = vperm.slane %v2162_v60, %v4636_v35  ;;  %v1185_v45 = vld [vmem:[%s4038_s8 + $0x6a8] sm:$0xff] }
 0x250   : > { %1863 = vadd.xlane.f32.xlu1 %v1862_v61  ;;  %v1171_v61 = vld [vmem:[%s4038_s8 + $0x638] sm:$0xff]  ;;  %v1868_v9 = vsel %vm1228_vm0, %v1185_v45, 0.0 }
 0x251   : > { %1821 = vadd.xlane.f32.xlu0 %v1820_v62  ;;  %v3118_v18 = vsel %vm2787_vm5, %v3117_v6, %v3116_v15  ;;  %v1826_v11 = vsel %vm1228_vm0, %v1171_v61, 0.0  ;;  %v1802_v15 = vsel %vm1228_vm0, %v1163_v63, 0.0 }
 0x252   : > { %v1741_v2 = vpop.xlane.xlu2 %1740  ;;  %v3120_v27 = vsel %vm2791_vm6, %v3119_v12, %v3118_v18 }
 0x253   : > { %v1738_v16 = vpop.xlane.xlu1 %1737  ;;  %v2167_v30 = vmul.f32 0.0625, %v1741_v2  ;;  %v3122_v36 = vsel %vm2795_vm7, %v3121_v24, %v3120_v27  ;;  %v1219_v24 = vld [vmem:[%s4038_s8 + $0x7b8] sm:$0xff]  ;;  %v1205_v27 = vld [vmem:[%s4038_s8 + $0x748] sm:$0xff] }
 0x254   : > { %v1735_v8 = vpop.xlane.xlu0 %1734  ;;  %v2166_v23 = vmul.f32 0.0625, %v1738_v16 }
 0x255   : > { %v2165_v20 = vmul.f32 0.0625, %v1735_v8  ;;  %v3127_v46 = vperm.slane %v2167_v30, %v4716_v26 }
 0x256   : > { %v3125_v34 = vperm.slane %v2166_v23, %v4696_v14 }
 0x257   : > { %v3123_v28 = vperm.slane %v2165_v20, %v4686_v3  ;;  %1824 = vadd.xlane.f32.xlu2 %v1823_v19  ;;  %v1172_v19 = vld [vmem:[%s4038_s8 + $0x640] sm:$0xff] }
 0x258   : > { %1800 = vadd.xlane.f32.xlu1 %v1799_v22  ;;  %v1829_v32 = vsel %vm1228_vm0, %v1172_v19, 0.0 }
 0x259   : > { %1965 = vadd.xlane.f32.xlu0 %v1964_v25  ;;  %v3124_v40 = vsel %vm2799_vm8, %v3123_v28, %v3122_v36 }
 0x25a   : > { %v1750_v39 = vpop.xlane.xlu2 %1749  ;;  %v3126_v51 = vsel %vm2803_vm9, %v3125_v34, %v3124_v40  ;;  %v1928_v40 = vsel %vm1228_vm0, %v1205_v27, 0.0  ;;  %v1188_v27 = vld [vmem:[%s4038_s8 + $0x6c0] sm:$0xff] }
 0x25b   : > { %v1747_v41 = vpop.xlane.xlu1 %1746  ;;  %v2170_v56 = vmul.f32 0.0625, %v1750_v39  ;;  %v3128_v57 = vsel %vm2807_vm10, %v3127_v46, %v3126_v51  ;;  %v1970_v39 = vsel %vm1228_vm0, %v1219_v24, 0.0 }
 0x25c   : > { %v1744_v33 = vpop.xlane.xlu0 %1743  ;;  %v2169_v47 = vmul.f32 0.0625, %v1747_v41 }
 0x25d   : > { %v2168_v48 = vmul.f32 0.0625, %v1744_v33  ;;  %v3133_v0 = vperm.slane %v2170_v56, %v4765_v58 }
 0x25e   : > { %v3131_v50 = vperm.slane %v2169_v47, %v4755_v52 }
 0x25f   : > { %v3129_v37 = vperm.slane %v2168_v48, %v4737_v38  ;;  %1968 = vadd.xlane.f32.xlu2 %v1967_v44  ;;  %v1220_v44 = vld [vmem:[%s4038_s8 + $0x7c0] sm:$0xff]  ;;  %v1206_v48 = vld [vmem:[%s4038_s8 + $0x750] sm:$0xff] }
 0x260   : > { %1926 = vadd.xlane.f32.xlu1 %v1925_v49 }
 0x261   : > { %1866 = vadd.xlane.f32.xlu0 %v1865_v53  ;;  %v3130_v59 = vsel %vm2811_vm11, %v3129_v37, %v3128_v57  ;;  %v1186_v37 = vld [vmem:[%s4038_s8 + $0x6b0] sm:$0xff]  ;;  %v1973_v57 = vsel %vm1228_vm0, %v1220_v44, 0.0 }
 0x262   : > { %v1759_v60 = vpop.xlane.xlu2 %1758  ;;  %v3132_v10 = vsel %vm2815_vm12, %v3131_v50, %v3130_v59  ;;  %v1931_v59 = vsel %vm1228_vm0, %v1206_v48, 0.0  ;;  %v1871_v61 = vsel %vm1228_vm0, %v1186_v37, 0.0 }
 0x263   : > { %v1756_v62 = vpop.xlane.xlu1 %1755  ;;  %v3134_v17 = vsel %vm2819_vm13, %v3133_v0, %v3132_v10  ;;  %v2173_v18 = vmul.f32 0.0625, %v1759_v60  ;;  %v1187_v10 = vld [vmem:[%s4038_s8 + $0x6b8] sm:$0xff] }
 0x264   : > { %v2172_v4 = vmul.f32 0.0625, %v1756_v62  ;;  %v1753_v6 = vpop.xlane.xlu0 %1752  ;;  %v1874_v19 = vsel %vm1228_vm0, %v1187_v10, 0.0 }
 0x265   : > { %v2171_v2 = vmul.f32 0.0625, %v1753_v6  ;;  %v3139_v34 = vperm.slane %v2173_v18, %v4557_v55 }
 0x266   : > { %v3137_v12 = vperm.slane %v2172_v4, %v4815_v31  ;;  %v1207_v4 = vld [vmem:[%s4038_s8 + $0x758] sm:$0xff] }
 0x267   : > { %v3135_v16 = vperm.slane %v2171_v2, %v4789_v13  ;;  %1869 = vadd.xlane.f32.xlu2 %v1868_v9  ;;  %v1934_v18 = vsel %vm1228_vm0, %v1207_v4, 0.0 }
 0x268   : > { %1827 = vadd.xlane.f32.xlu1 %v1826_v11 }
 0x269   : > { %1803 = vadd.xlane.f32.xlu0 %v1802_v15  ;;  %v3136_v8 = vsel %vm2823_vm14, %v3135_v16, %v3134_v17  ;;  %v1173_v15 = vld [vmem:[%s4038_s8 + $0x648] sm:$0xff] }
 0x26a   : > { %v3138_v20 = vsel %vm2827_vm15, %v3137_v12, %v3136_v8  ;;  %v1768_v22 = vpop.xlane.xlu2 %1767 }
 0x26b   : > { %3526 = vmatmul.f32.vlgmr.msra.gmra.mxu2 %v3138_v20  ;;  %v2176_v23 = vmul.f32 0.0625, %v1768_v22  ;;  %v1765_v25 = vpop.xlane.xlu1 %1764  ;;  %v1832_v22 = vsel %vm1228_vm0, %v1173_v15, 0.0  ;;  %v1223_v15 = vld [vmem:[%s4038_s8 + $0x7d8] sm:$0xff] }
 0x26c   : > { %v2175_v28 = vmul.f32 0.0625, %v1765_v25  ;;  %v1762_v30 = vpop.xlane.xlu0 %1761 }
 0x26d   : > { %v2174_v36 = vmul.f32 0.0625, %v1762_v30  ;;  %v3144_v41 = vperm.slane %v2176_v23, %v4585_v7 }
 0x26e   : > { %v3142_v21 = vperm.slane %v2175_v28, %v4582_v5 }
 0x26f   : > { %v3140_v43 = vperm.slane %v2174_v36, %v4572_v1  ;;  %1830 = vadd.xlane.f32.xlu2 %v1829_v32  ;;  %v1174_v32 = vld [vmem:[%s4038_s8 + $0x650] sm:$0xff] }
 0x270   : > { %1971 = vadd.xlane.f32.xlu1 %v1970_v39  ;;  %v1835_v44 = vsel %vm1228_vm0, %v1174_v32, 0.0 }
 0x271   : > { %v3141_v33 = vsel %vm2771_vm1, %v3140_v43, %v3139_v34  ;;  %1929 = vadd.xlane.f32.xlu0 %v1928_v40  ;;  %v1877_v43 = vsel %vm1228_vm0, %v1188_v27, 0.0 }
 0x272   : > { %v3143_v46 = vsel %vm2775_vm2, %v3142_v21, %v3141_v33  ;;  %v1777_v47 = vpop.xlane.xlu2 %1776  ;;  %v1221_v21 = vld [vmem:[%s4038_s8 + $0x7c8] sm:$0xff] }
 0x273   : > { %v2179_v49 = vmul.f32 0.0625, %v1777_v47  ;;  %v1774_v51 = vpop.xlane.xlu1 %1773  ;;  %v3145_v53 = vsel %vm6798_vm3, %v3144_v41, %v3143_v46  ;;  %v1976_v47 = vsel %vm1228_vm0, %v1221_v21, 0.0 }
 0x274   : > { %v2178_v56 = vmul.f32 0.0625, %v1774_v51  ;;  %v1771_v50 = vpop.xlane.xlu0 %1770 }
 0x275   : > { %v2177_v45 = vmul.f32 0.0625, %v1771_v50  ;;  %v3150_v62 = vperm.slane %v2179_v49, %v4644_v42  ;;  %v1222_v50 = vld [vmem:[%s4038_s8 + $0x7d0] sm:$0xff] }
 0x276   : > { %v3148_v60 = vperm.slane %v2178_v56, %v4636_v35 }
 0x277   : > { %v3146_v63 = vperm.slane %v2177_v45, %v4624_v29  ;;  %1974 = vadd.xlane.f32.xlu2 %v1973_v57 }
 0x278   : > { %1932 = vadd.xlane.f32.xlu1 %v1931_v59 }
 0x279   : > { %v3147_v0 = vsel %vm2783_vm4, %v3146_v63, %v3145_v53  ;;  %1872 = vadd.xlane.f32.xlu0 %v1871_v61  ;;  %v1175_v53 = vld [vmem:[%s4038_s8 + $0x658] sm:$0xff] }
 0x27a   : > { %v3149_v6 = vsel %vm2787_vm5, %v3148_v60, %v3147_v0  ;;  %v1786_v9 = vpop.xlane.xlu2 %1785  ;;  %v1208_v60 = vld [vmem:[%s4038_s8 + $0x760] sm:$0xff]  ;;  %v1838_v63 = vsel %vm1228_vm0, %v1175_v53, 0.0 }
 0x27b   : > { %v2182_v2 = vmul.f32 0.0625, %v1786_v9  ;;  %v1783_v11 = vpop.xlane.xlu1 %1782  ;;  %v3151_v12 = vsel %vm2791_vm6, %v3150_v62, %v3149_v6  ;;  %v1979_v6 = vsel %vm1228_vm0, %v1222_v50, 0.0  ;;  %v1937_v10 = vsel %vm1228_vm0, %v1208_v60, 0.0 }
 0x27c   : > { %v2181_v16 = vmul.f32 0.0625, %v1783_v11  ;;  %v1780_v17 = vpop.xlane.xlu0 %1779 }
 0x27d   : > { %v2180_v8 = vmul.f32 0.0625, %v1780_v17  ;;  %v3156_v24 = vperm.slane %v2182_v2, %v4696_v14  ;;  %v1209_v17 = vld [vmem:[%s4038_s8 + $0x768] sm:$0xff] }
 0x27e   : > { %v3154_v20 = vperm.slane %v2181_v16, %v4686_v3  ;;  %v1940_v27 = vsel %vm1228_vm0, %v1209_v17, 0.0 }
 0x27f   : > { %v3152_v23 = vperm.slane %v2180_v8, %v4662_v54  ;;  %1935 = vadd.xlane.f32.xlu2 %v1934_v18 }
 0x280   : > { %1875 = vadd.xlane.f32.xlu1 %v1874_v19  ;;  %v1189_v19 = vld [vmem:[%s4038_s8 + $0x6c8] sm:$0xff] }
 0x281   : > { %v3153_v25 = vsel %vm2795_vm7, %v3152_v23, %v3151_v12  ;;  %1833 = vadd.xlane.f32.xlu0 %v1832_v22 }
 0x282   : > { %v3155_v28 = vsel %vm2799_vm8, %v3154_v20, %v3153_v25  ;;  %v1795_v30 = vpop.xlane.xlu2 %1794 }
 0x283   : > { %v2185_v34 = vmul.f32 0.0625, %v1795_v30  ;;  %v1792_v36 = vpop.xlane.xlu1 %1791  ;;  %v3157_v39 = vsel %vm2803_vm9, %v3156_v24, %v3155_v28  ;;  %v1982_v24 = vsel %vm1228_vm0, %v1223_v15, 0.0  ;;  %v1880_v30 = vsel %vm1228_vm0, %v1189_v19, 0.0 }
 0x284   : > { %v2184_v40 = vmul.f32 0.0625, %v1792_v36  ;;  %v1789_v41 = vpop.xlane.xlu0 %1788 }
 0x285   : > { %v2183_v33 = vmul.f32 0.0625, %v1789_v41  ;;  %v3162_v48 = vperm.slane %v2185_v34, %v4755_v52 }
 0x286   : > { %v3160_v46 = vperm.slane %v2184_v40, %v4737_v38  ;;  %v1190_v40 = vld [vmem:[%s4038_s8 + $0x6d0] sm:$0xff] }
 0x287   : > { %v3158_v49 = vperm.slane %v2183_v33, %v4716_v26  ;;  %1878 = vadd.xlane.f32.xlu2 %v1877_v43  ;;  %v1176_v33 = vld [vmem:[%s4038_s8 + $0x660] sm:$0xff] }
 0x288   : > { %1836 = vadd.xlane.f32.xlu1 %v1835_v44 }
 0x289   : > { %v3159_v51 = vsel %vm2807_vm10, %v3158_v49, %v3157_v39  ;;  %1977 = vadd.xlane.f32.xlu0 %v1976_v47  ;;  %v1210_v39 = vld [vmem:[%s4038_s8 + $0x770] sm:$0xff] }
 0x28a   : > { %v3161_v37 = vsel %vm2811_vm11, %v3160_v46, %v3159_v51  ;;  %v1906_v56 = vpop.xlane.xlu2 %1905  ;;  %v1943_v47 = vsel %vm1228_vm0, %v1210_v39, 0.0  ;;  %v1883_v51 = vsel %vm1228_vm0, %v1190_v40, 0.0 }
 0x28b   : > { %v2222_v57 = vmul.f32 0.0625, %v1906_v56  ;;  %v1903_v45 = vpop.xlane.xlu1 %1902  ;;  %v3163_v59 = vsel %vm2815_vm12, %v3162_v48, %v3161_v37  ;;  %v1841_v37 = vsel %vm1228_vm0, %v1176_v33, 0.0 }
 0x28c   : > { %v2221_v61 = vmul.f32 0.0625, %v1903_v45  ;;  %v1798_v62 = vpop.xlane.xlu0 %1797  ;;  %v1191_v45 = vld [vmem:[%s4038_s8 + $0x6d8] sm:$0xff] }
 0x28d   : > { %v3233_v0 = vperm.slane %v2222_v57, %v4572_v1  ;;  %v2186_v4 = vmul.f32 0.0625, %v1798_v62 }
 0x28e   : > { %v3232_v9 = vperm.slane %v2221_v61, %v4557_v55  ;;  %v1177_v61 = vld [vmem:[%s4038_s8 + $0x668] sm:$0xff] }
 0x28f   : > { %v3164_v2 = vperm.slane %v2186_v4, %v4765_v58  ;;  %1839 = vadd.xlane.f32.xlu2 %v1838_v63  ;;  %v1844_v15 = vsel %vm1228_vm0, %v1177_v61, 0.0 }
 0x290   : > { %v3234_v11 = vsel %vm2771_vm1, %v3233_v0, %v3232_v9  ;;  %1980 = vadd.xlane.f32.xlu1 %v1979_v6  ;;  %v1224_v0 = vld [vmem:[%s4038_s8 + $0x7e0] sm:$0xff]  ;;  %v1886_v9 = vsel %vm1228_vm0, %v1191_v45, 0.0 }
 0x291   : > { %v6273_v12 = vsel %vm2819_vm13, %v3164_v2, %v3163_v59  ;;  %1938 = vadd.xlane.f32.xlu0 %v1937_v10  ;;  %v2444_v59 = vld [vmem:[%s6789_s4 + $0x5f8] sm:$0xff]  ;;  %v2443_v10 = vld [vmem:[%s6789_s4 + $0x5f0] sm:$0xff]  ;;  %v1985_v17 = vsel %vm1228_vm0, %v1224_v0, 0.0  ;;  %v1192_v45 = vld [vmem:[%s4038_s8 + $0x6e0] sm:$0xff] }
 0x292   : > { %v1810_v16 = vpop.xlane.xlu2 %1809  ;;  %3530 = vmatpush.msra.mxu3 %v2444_v59 }
 0x293   : > { %v2190_v18 = vmul.f32 0.0625, %v1810_v16  ;;  %v1807_v8 = vpop.xlane.xlu1 %1806 }
 0x294   : > { %v2189_v20 = vmul.f32 0.0625, %v1807_v8  ;;  %v1909_v22 = vpop.xlane.xlu0 %1908  ;;  %3531 = vmatpush.msra.mxu3 %v2443_v10  ;;  %v2434_v10 = vld [vmem:[%s6789_s4 + $0x5a8] sm:$0xff] }
 0x295   : > { %v3171_v23 = vperm.slane %v2190_v18, %v4572_v1  ;;  %v2223_v25 = vmul.f32 0.0625, %v1909_v22  ;;  %v2442_v18 = vld [vmem:[%s6789_s4 + $0x5e8] sm:$0xff]  ;;  %v2441_v22 = vld [vmem:[%s6789_s4 + $0x5e0] sm:$0xff] }
 0x296   : > { %v3170_v28 = vperm.slane %v2189_v20, %v4557_v55  ;;  %3532 = vmatpush.msra.mxu3 %v2442_v18  ;;  %v1194_v18 = vld [vmem:[%s4038_s8 + $0x6f0] sm:$0xff] }
 0x297   : > { %v3235_v32 = vperm.slane %v2223_v25, %v4582_v5  ;;  %1983 = vadd.xlane.f32.xlu2 %v1982_v24  ;;  %v2440_v25 = vld [vmem:[%s6789_s4 + $0x5d8] sm:$0xff] }
 0x298   : > { %v3172_v34 = vsel %vm2771_vm1, %v3171_v23, %v3170_v28  ;;  %1941 = vadd.xlane.f32.xlu1 %v1940_v27  ;;  %v1178_v23 = vld [vmem:[%s4038_s8 + $0x670] sm:$0xff]  ;;  %3533 = vmatpush.msra.mxu3 %v2441_v22  ;;  %v1225_v28 = vld [vmem:[%s4038_s8 + $0x7e8] sm:$0xff] }
 0x299   : > { %v3236_v36 = vsel %vm2775_vm2, %v3235_v32, %v3234_v11  ;;  %1881 = vadd.xlane.f32.xlu0 %v1880_v30  ;;  %v1847_v40 = vsel %vm1228_vm0, %v1178_v23, 0.0  ;;  %v1988_v33 = vsel %vm1228_vm0, %v1225_v28, 0.0 }
 0x29a   : > { %v1954_v21 = vpop.xlane.xlu2 %1953  ;;  %3534 = vmatpush.msra.mxu3 %v2440_v25 }
 0x29b   : > { %v2238_v41 = vmul.f32 0.0625, %v1954_v21  ;;  %v1951_v43 = vpop.xlane.xlu1 %1950 }
 0x29c   : > { %v2237_v44 = vmul.f32 0.0625, %v1951_v43  ;;  %v1912_v46 = vpop.xlane.xlu0 %1911 }
 0x29d   : > { %v3264_v48 = vperm.slane %v2238_v41, %v4572_v1  ;;  %v2224_v49 = vmul.f32 0.0625, %v1912_v46 }
 0x29e   : > { %v3263_v53 = vperm.slane %v2237_v44, %v4557_v55 }
 0x29f   : > { %v3237_v56 = vperm.slane %v2224_v49, %v4585_v7  ;;  %1944 = vadd.xlane.f32.xlu2 %v1943_v47  ;;  %v2438_v47 = vld [vmem:[%s6789_s4 + $0x5c8] sm:$0xff]  ;;  %v2437_v49 = vld [vmem:[%s6789_s4 + $0x5c0] sm:$0xff] }
 0x2a0   : > { %v3265_v50 = vsel %vm2771_vm1, %v3264_v48, %v3263_v53  ;;  %1884 = vadd.xlane.f32.xlu1 %v1883_v51  ;;  %v1179_v51 = vld [vmem:[%s4038_s8 + $0x678] sm:$0xff] }
 0x2a1   : > { %v3238_v57 = vsel %vm6798_vm3, %v3237_v56, %v3236_v36  ;;  %1842 = vadd.xlane.f32.xlu0 %v1841_v37  ;;  %v1211_v36 = vld [vmem:[%s4038_s8 + $0x778] sm:$0xff]  ;;  %v1226_v56 = vld [vmem:[%s4038_s8 + $0x7f0] sm:$0xff]  ;;  %v1850_v61 = vsel %vm1228_vm0, %v1179_v51, 0.0 }
 0x2a2   : > { %v1957_v60 = vpop.xlane.xlu2 %1956  ;;  %v1946_v46 = vsel %vm1228_vm0, %v1211_v36, 0.0  ;;  %v2436_v53 = vld [vmem:[%s6789_s4 + $0x5b8] sm:$0xff] }
 0x2a3   : > { %v2239_v62 = vmul.f32 0.0625, %v1957_v60  ;;  %v1915_v63 = vpop.xlane.xlu1 %1914 }
 0x2a4   : > { %v2225_v4 = vmul.f32 0.0625, %v1915_v63  ;;  %v1813_v6 = vpop.xlane.xlu0 %1812 }
 0x2a5   : > { %v3266_v2 = vperm.slane %v2239_v62, %v4582_v5  ;;  %v2191_v11 = vmul.f32 0.0625, %v1813_v6  ;;  %v2435_v62 = vld [vmem:[%s6789_s4 + $0x5b0] sm:$0xff] }
 0x2a6   : > { %v3239_v16 = vperm.slane %v2225_v4, %v4624_v29  ;;  %v1991_v4 = vsel %vm1228_vm0, %v1226_v56, 0.0 }
 0x2a7   : > { %v3267_v8 = vsel %vm2775_vm2, %v3266_v2, %v3265_v50  ;;  %v3173_v19 = vperm.slane %v2191_v11, %v4582_v5  ;;  %1887 = vadd.xlane.f32.xlu2 %v1886_v9  ;;  %v1889_v9 = vsel %vm1228_vm0, %v1192_v45, 0.0 }
 0x2a8   : > { %v3240_v20 = vsel %vm2783_vm4, %v3239_v16, %v3238_v57  ;;  %1845 = vadd.xlane.f32.xlu1 %v1844_v15  ;;  %v2433_v16 = vld [vmem:[%s6789_s4 + $0x5a0] sm:$0xff] }
 0x2a9   : > { %v3174_v24 = vsel %vm2775_vm2, %v3173_v19, %v3172_v34  ;;  %1986 = vadd.xlane.f32.xlu0 %v1985_v17  ;;  %v2439_v34 = vld [vmem:[%s6789_s4 + $0x5d0] sm:$0xff]  ;;  %v2432_v19 = vld [vmem:[%s6789_s4 + $0x598] sm:$0xff] }
 0x2aa   : > { %v1858_v27 = vpop.xlane.xlu2 %1857  ;;  %3535 = vmatpush.msra.mxu3 %v2439_v34  ;;  %v2430_v34 = vld [vmem:[%s6789_s4 + $0x588] sm:$0xff] }
 0x2ab   : > { %v2206_v30 = vmul.f32 0.0625, %v1858_v27  ;;  %v1855_v32 = vpop.xlane.xlu1 %1854  ;;  %v1193_v27 = vld [vmem:[%s4038_s8 + $0x6e8] sm:$0xff] }
 0x2ac   : > { %v2205_v39 = vmul.f32 0.0625, %v1855_v32  ;;  %v1816_v21 = vpop.xlane.xlu0 %1815  ;;  %3536 = vmatpush.msra.mxu3 %v2438_v47 }
 0x2ad   : > { %v3202_v41 = vperm.slane %v2206_v30, %v4572_v1  ;;  %v2192_v43 = vmul.f32 0.0625, %v1816_v21  ;;  %v1895_v30 = vsel %vm1228_vm0, %v1194_v18, 0.0 }
 0x2ae   : > { %v3201_v44 = vperm.slane %v2205_v39, %v4557_v55  ;;  %3537 = vmatpush.msra.mxu3 %v2437_v49 }
 0x2af   : > { %v3175_v48 = vperm.slane %v2192_v43, %v4585_v7  ;;  %1848 = vadd.xlane.f32.xlu2 %v1847_v40  ;;  %v1892_v40 = vsel %vm1228_vm0, %v1193_v27, 0.0 }
 0x2b0   : > { %v3203_v1 = vsel %vm2771_vm1, %v3202_v41, %v3201_v44  ;;  %1989 = vadd.xlane.f32.xlu1 %v1988_v33  ;;  %3538 = vmatpush.msra.mxu3 %v2436_v53  ;;  %vm6799_vm1 = vmmov %vm6798_vm3  ;;  %v2429_v44 = vld [vmem:[%s6789_s4 + $0x580] sm:$0xff] }
 0x2b1   : > { %v3176_v55 = vsel %vm6798_vm3, %v3175_v48, %v3174_v24  ;;  %1947 = vadd.xlane.f32.xlu0 %v1946_v46  ;;  %v1227_v24 = vld [vmem:[%s4038_s8 + $0x7f8] sm:$0xff] }
 0x2b2   : > { %v1819_v37 = vpop.xlane.xlu2 %1818  ;;  %3539 = vmatpush.msra.mxu3 %v2435_v62  ;;  %v1994_v39 = vsel %vm1228_vm0, %v1227_v24, 0.0 }
 0x2b3   : > { %v2193_v50 = vmul.f32 0.0625, %v1819_v37  ;;  %v1960_v57 = vpop.xlane.xlu1 %1959 }
 0x2b4   : > { %v2240_v59 = vmul.f32 0.0625, %v1960_v57  ;;  %v1918_v60 = vpop.xlane.xlu0 %1917  ;;  %3540 = vmatpush.msra.mxu3 %v2434_v10 }
 0x2b5   : > { %v3177_v63 = vperm.slane %v2193_v50, %v4624_v29  ;;  %v2226_v0 = vmul.f32 0.0625, %v1918_v60 }
 0x2b6   : > { %v3268_v6 = vperm.slane %v2240_v59, %v4585_v7  ;;  %3541 = vmatpush.msra.mxu3 %v2433_v16 }
 0x2b7   : > { %v3178_v2 = vsel %vm2783_vm4, %v3177_v63, %v3176_v55  ;;  %v3241_v11 = vperm.slane %v2226_v0, %v4636_v35  ;;  %1851 = vadd.xlane.f32.xlu2 %v1850_v61  ;;  %v1195_v55 = vld [vmem:[%s4038_s8 + $0x6f8] sm:$0xff]  ;;  %s3649_s8 = scalar_lea.hbm %s6791_s6, %s3784_s22 }
 0x2b8   : > { %v3269_v15 = vsel %vm6799_vm1, %v3268_v6, %v3267_v8  ;;  %1992 = vadd.xlane.f32.xlu1 %v1991_v4  ;;  %3542 = vmatpush.msra.mxu3 %v2432_v19  ;;  %v1898_v50 = vsel %vm1228_vm0, %v1195_v55, 0.0  ;;  %s3652_s9 = sshll.u32 %s3649_s8, 4  ;;  %s3653_s9 = int_to_ptr.hbm [resolvable:$true] %s3652_s9 }
 0x2b9   : > { %v3242_v17 = vsel %vm2787_vm5, %v3241_v11, %v3240_v20  ;;  %1890 = vadd.xlane.f32.xlu0 %v1889_v9  ;;  %v2431_v20 = vld [vmem:[%s6789_s4 + $0x590] sm:$0xff]  ;;  %s3846_s14 = sshra.s32 %s3653_s9, 4  ;;  %s3847_s14 = int_to_ptr.hbm [resolvable:$true] %s3846_s14 }
 0x2ba   : > { %v1963_v22 = vpop.xlane.xlu2 %1962  ;;  %3543 = vmatpush.msra.mxu3 %v2431_v20  ;;  %s3848_s17 = scalar_lea.hbm %s3847_s14, 16  ;;  %p3853_p0 = scmp.lt.s32.totalorder %s3847_s14, %s6791_s6 }
 0x2bb   : > { %v2241_v23 = vmul.f32 0.0625, %v1963_v22  ;;  %v1921_v25 = vpop.xlane.xlu1 %1920  ;;  %p3849_p11 = scmp.ne.s32.totalorder %s3847_s14, %s3848_s17  ;;  %p3854_p1 = scmp.lt.s32.totalorder %s3852_s20, %s3848_s17 }
 0x2bc   : > { %v2227_v8 = vmul.f32 0.0625, %v1921_v25  ;;  %v1861_v28 = vpop.xlane.xlu0 %1860  ;;  %3544 = vmatpush.msra.mxu3 %v2430_v34 }
 0x2bd   : > { %v3270_v32 = vperm.slane %v2241_v23, %v4624_v29  ;;  %v2207_v36 = vmul.f32 0.0625, %v1861_v28  ;;  %p3850_p12 = pnand %p3849_p11, %p4008_p5  ;;  %p3855_p2 = por %p3854_p1, %p3853_p0 }
 0x2be   : > { %v3243_v21 = vperm.slane %v2227_v8, %v4644_v42  ;;  %3545 = vmatpush.msra.mxu3 %v2429_v44 }
 0x2bf   : > { %v3271_v41 = vsel %vm2783_vm4, %v3270_v32, %v3269_v15  ;;  %v3204_v43 = vperm.slane %v2207_v36, %v4582_v5  ;;  %1896 = vadd.xlane.f32.xlu2 %v1895_v30  ;;  %p3851_p13 = pneg %p3850_p12 }
 0x2c0   : > { %v3244_v33 = vsel %vm2791_vm6, %v3243_v21, %v3242_v17  ;;  %1995 = vadd.xlane.f32.xlu1 %v1994_v39 }
 0x2c1   : > { %v3205_v46 = vsel %vm2775_vm2, %v3204_v43, %v3203_v1  ;;  %1893 = vadd.xlane.f32.xlu0 %v1892_v40  ;;  %vm6800_vm2 = vmmov %vm6799_vm1  ;;  %p3856_p3 = pnand %p3855_p2, %p3851_p13 }
 0x2c2   : > { %v1924_v47 = vpop.xlane.xlu2 %1923 }
 0x2c3   : > { %v2228_v48 = vmul.f32 0.0625, %v1924_v47  ;;  %v1864_v49 = vpop.xlane.xlu1 %1863 }
 0x2c4   : > { %v2208_v51 = vmul.f32 0.0625, %v1864_v49  ;;  %v1822_v53 = vpop.xlane.xlu0 %1821 }
 0x2c5   : > { %v3245_v5 = vperm.slane %v2228_v48, %v4662_v54  ;;  %v2194_v37 = vmul.f32 0.0625, %v1822_v53 }
 0x2c6   : > { %v3206_v56 = vperm.slane %v2208_v51, %v4585_v7 }
 0x2c7   : > { %v3246_v57 = vsel %vm2795_vm7, %v3245_v5, %v3244_v33  ;;  %v3179_v45 = vperm.slane %v2194_v37, %v4636_v35 }
 0x2c8   : > { %v3207_v1 = vsel %vm6800_vm2, %v3206_v56, %v3205_v46 }
 0x2c9   : > { %v3180_v59 = vsel %vm2787_vm5, %v3179_v45, %v3178_v2  ;;  %1899 = vadd.xlane.f32.xlu0 %v1898_v50 }
 0x2ca   : > { %v1825_v60 = vpop.xlane.xlu2 %1824 }
 0x2cb   : > { %v2195_v61 = vmul.f32 0.0625, %v1825_v60  ;;  %v1801_v62 = vpop.xlane.xlu1 %1800 }
 0x2cc   : > { %v1966_v63 = vpop.xlane.xlu0 %1965  ;;  %v2187_v23 = vmul.f32 0.0625, %v1801_v62  ;;  %v2489_v62 = vld [vmem:[%s6789_s4 + $0x760] sm:$0xff] }
 0x2cd   : > { %v3181_v0 = vperm.slane %v2195_v61, %v4644_v42  ;;  %v2242_v4 = vmul.f32 0.0625, %v1966_v63 }
 0x2ce   : > { %v3166_v20 = vperm.slane %v2187_v23, %v4789_v13 }
 0x2cf   : > { %v3182_v7 = vsel %vm2791_vm6, %v3181_v0, %v3180_v59  ;;  %v3272_v6 = vperm.slane %v2242_v4, %v4636_v35  ;;  %v2490_v59 = vld [vmem:[%s6789_s4 + $0x768] sm:$0xff]  ;;  %v2460_v0 = vld [vmem:[%s6789_s4 + $0x678] sm:$0xff] }
 0x2d0   : > { %v3167_v43 = vsel %vm2823_vm14, %v3166_v20, %v6273_v12  ;;  %v2492_v12 = vld [vmem:[%s6789_s4 + $0x778] sm:$0xff]  ;;  %3550 = vmatpush.msrb.mxu0 %v2460_v0  ;;  %v2507_v20 = vld [vmem:[%s6789_s4 + $0x7f0] sm:$0xff] }
 0x2d1   : > { %v3273_v9 = vsel %vm2787_vm5, %v3272_v6, %v3271_v41  ;;  %3590 = vmatpush.msrb.mxu2 %v2492_v12  ;;  %v2488_v4 = vld [vmem:[%s6789_s4 + $0x758] sm:$0xff]  ;;  %v2450_v12 = vld [vmem:[%s6789_s4 + $0x628] sm:$0xff] }
 0x2d2   : > { %v1969_v10 = vpop.xlane.xlu2 %1968  ;;  %v2500_v0 = vld [vmem:[%s6789_s4 + $0x7b8] sm:$0xff] }
 0x2d3   : > { %v2243_v11 = vmul.f32 0.0625, %v1969_v10  ;;  %v1927_v15 = vpop.xlane.xlu1 %1926  ;;  %v2459_v10 = vld [vmem:[%s6789_s4 + $0x670] sm:$0xff] }
 0x2d4   : > { %v2229_v16 = vmul.f32 0.0625, %v1927_v15  ;;  %v1867_v17 = vpop.xlane.xlu0 %1866  ;;  %3551 = vmatpush.msrb.mxu0 %v2459_v10  ;;  %v2471_v10 = vld [vmem:[%s6789_s4 + $0x6d0] sm:$0xff] }
 0x2d5   : > { %v3274_v2 = vperm.slane %v2243_v11, %v4644_v42  ;;  %v2209_v18 = vmul.f32 0.0625, %v1867_v17  ;;  %v2487_v11 = vld [vmem:[%s6789_s4 + $0x750] sm:$0xff]  ;;  %v2486_v17 = vld [vmem:[%s6789_s4 + $0x748] sm:$0xff] }
 0x2d6   : > { %v3247_v19 = vperm.slane %v2229_v16, %v4686_v3  ;;  %v2458_v16 = vld [vmem:[%s6789_s4 + $0x668] sm:$0xff] }
 0x2d7   : > { %v3275_v22 = vsel %vm2791_vm6, %v3274_v2, %v3273_v9  ;;  %v3208_v24 = vperm.slane %v2209_v18, %v4624_v29  ;;  %3552 = vmatpush.msrb.mxu0 %v2458_v16  ;;  %v2457_v18 = vld [vmem:[%s6789_s4 + $0x660] sm:$0xff]  ;;  %v2470_v16 = vld [vmem:[%s6789_s4 + $0x6c8] sm:$0xff] }
 0x2d8   : > { %v6409_v25 = vsel %vm2799_vm8, %v3247_v19, %v3246_v57  ;;  %v2491_v57 = vld [vmem:[%s6789_s4 + $0x770] sm:$0xff]  ;;  %v2456_v19 = vld [vmem:[%s6789_s4 + $0x658] sm:$0xff] }
 0x2d9   : > { %v3209_v27 = vsel %vm2783_vm4, %v3208_v24, %v3207_v1  ;;  %3591 = vmatpush.msrb.mxu2 %v2491_v57  ;;  %3553 = vmatpush.msrb.mxu0 %v2457_v18  ;;  %v2508_v24 = vld [vmem:[%s6789_s4 + $0x7f8] sm:$0xff]  ;;  %v2449_v57 = vld [vmem:[%s6789_s4 + $0x620] sm:$0xff] }
 0x2da   : > { %v1870_v8 = vpop.xlane.xlu2 %1869  ;;  %3610 = vmatpush.msrb.mxu3 %v2508_v24  ;;  %v2445_v18 = vld [vmem:[%s6789_s4 + $0x600] sm:$0xff]  ;;  %v2496_v24 = vld [vmem:[%s6789_s4 + $0x798] sm:$0xff] }
 0x2db   : > { %v2210_v28 = vmul.f32 0.0625, %v1870_v8  ;;  %v1828_v30 = vpop.xlane.xlu1 %1827  ;;  %3592 = vmatpush.msrb.mxu2 %v2490_v59  ;;  %3554 = vmatpush.msrb.mxu0 %v2456_v19  ;;  %v2501_v59 = vld [vmem:[%s6789_s4 + $0x7c0] sm:$0xff] }
 0x2dc   : > { %v2196_v32 = vmul.f32 0.0625, %v1828_v30  ;;  %v1804_v36 = vpop.xlane.xlu0 %1803  ;;  %v2483_v30 = vld [vmem:[%s6789_s4 + $0x730] sm:$0xff]  ;;  %3611 = vmatpush.msrb.mxu3 %v2507_v20  ;;  %v2497_v19 = vld [vmem:[%s6789_s4 + $0x7a0] sm:$0xff] }
 0x2dd   : > { %v3210_v39 = vperm.slane %v2210_v28, %v4636_v35  ;;  %v2188_v21 = vmul.f32 0.0625, %v1804_v36  ;;  %3593 = vmatpush.msrb.mxu2 %v2489_v62  ;;  %v2455_v28 = vld [vmem:[%s6789_s4 + $0x650] sm:$0xff]  ;;  %v2482_v36 = vld [vmem:[%s6789_s4 + $0x728] sm:$0xff]  ;;  %v2448_v62 = vld [vmem:[%s6789_s4 + $0x618] sm:$0xff] }
 0x2de   : > { %v3183_v40 = vperm.slane %v2196_v32, %v4662_v54  ;;  %3555 = vmatpush.msrb.mxu0 %v2455_v28  ;;  %v2454_v32 = vld [vmem:[%s6789_s4 + $0x648] sm:$0xff] }
 0x2df   : > { %v3211_v29 = vsel %vm2787_vm5, %v3210_v39, %v3209_v27  ;;  %v3168_v34 = vperm.slane %v2188_v21, %v4815_v31  ;;  %3594 = vmatpush.msrb.mxu2 %v2488_v4  ;;  %v2506_v39 = vld [vmem:[%s6789_s4 + $0x7e8] sm:$0xff]  ;;  %v2453_v21 = vld [vmem:[%s6789_s4 + $0x640] sm:$0xff] }
 0x2e0   : > { %v3184_v41 = vsel %vm2795_vm7, %v3183_v40, %v3182_v7  ;;  %3556 = vmatpush.msrb.mxu0 %v2454_v32  ;;  %3612 = vmatpush.msrb.mxu3 %v2506_v39  ;;  %v2481_v40 = vld [vmem:[%s6789_s4 + $0x720] sm:$0xff]  ;;  %v2467_v32 = vld [vmem:[%s6789_s4 + $0x6b0] sm:$0xff]  ;;  %v2466_v39 = vld [vmem:[%s6789_s4 + $0x6a8] sm:$0xff] }
 0x2e1   : > { %v3169_v33 = vsel %vm2827_vm15, %v3168_v34, %v3167_v43  ;;  %3595 = vmatpush.msrb.mxu2 %v2487_v11  ;;  %v2452_v34 = vld [vmem:[%s6789_s4 + $0x638] sm:$0xff]  ;;  %v2499_v11 = vld [vmem:[%s6789_s4 + $0x7b0] sm:$0xff] }
 0x2e2   : > { %3546 = vmatmul.f32.vlgmr.msra.gmra.mxu3 %v3169_v33  ;;  %v1831_v44 = vpop.xlane.xlu2 %1830  ;;  %3557 = vmatpush.msrb.mxu0 %v2453_v21  ;;  %v2480_v43 = vld [vmem:[%s6789_s4 + $0x718] sm:$0xff]  ;;  %v2494_v21 = vld [vmem:[%s6789_s4 + $0x788] sm:$0xff] }
 0x2e3   : > { %v2197_v46 = vmul.f32 0.0625, %v1831_v44  ;;  %v1972_v47 = vpop.xlane.xlu1 %1971  ;;  %3596 = vmatpush.msrb.mxu2 %v2486_v17  ;;  %v2504_v44 = vld [vmem:[%s6789_s4 + $0x7d8] sm:$0xff]  ;;  %v2498_v17 = vld [vmem:[%s6789_s4 + $0x7a8] sm:$0xff] }
 0x2e4   : > { %v2244_v48 = vmul.f32 0.0625, %v1972_v47  ;;  %v6421_v35 = vpop.xlane.xlu0 %1929  ;;  %3558 = vmatpush.msrb.mxu0 %v2452_v34  ;;  %v2464_v34 = vld [vmem:[%s6789_s4 + $0x698] sm:$0xff] }
 0x2e5   : > { %v3185_v49 = vperm.slane %v2197_v46, %v4686_v3 }
 0x2e6   : > { %v3276_v55 = vperm.slane %v2244_v48, %v4662_v54  ;;  %v2451_v48 = vld [vmem:[%s6789_s4 + $0x630] sm:$0xff] }
 0x2e7   : > { %v6426_v51 = vsel %vm2799_vm8, %v3185_v49, %v3184_v41  ;;  %v2476_v41 = vld [vmem:[%s6789_s4 + $0x6f8] sm:$0xff]  ;;  %v2475_v49 = vld [vmem:[%s6789_s4 + $0x6f0] sm:$0xff]  ;;  %3559 = vmatpush.msrb.mxu0 %v2451_v48 }
 0x2e8   : > { %v3277_v53 = vsel %vm2795_vm7, %v3276_v55, %v3275_v22  ;;  %v2484_v22 = vld [vmem:[%s6789_s4 + $0x738] sm:$0xff]  ;;  %3570 = vmatpush.msrb.mxu1 %v2476_v41  ;;  %v2479_v55 = vld [vmem:[%s6789_s4 + $0x710] sm:$0xff] }
 0x2e9   : > { %3560 = vmatpush.msrb.mxu0 %v2450_v12 }
 0x2ea   : > { %v1975_v5 = vpop.xlane.xlu2 %1974  ;;  %3571 = vmatpush.msrb.mxu1 %v2475_v49 }
 0x2eb   : > { %v2245_v37 = vmul.f32 0.0625, %v1975_v5  ;;  %v6432_v56 = vpop.xlane.xlu1 %1932  ;;  %v2474_v5 = vld [vmem:[%s6789_s4 + $0x6e8] sm:$0xff]  ;;  %3561 = vmatpush.msrb.mxu0 %v2449_v57 }
 0x2ec   : > { %v1873_v50 = vpop.xlane.xlu0 %1872  ;;  %3572 = vmatpush.msrb.mxu1 %v2474_v5  ;;  %v2231_v48 = vmul.f32 0.0625, %v6432_v56  ;;  %v2462_v5 = vld [vmem:[%s6789_s4 + $0x688] sm:$0xff]  ;;  %v2461_v56 = vld [vmem:[%s6789_s4 + $0x680] sm:$0xff] }
 0x2ed   : > { %v3278_v45 = vperm.slane %v2245_v37, %v4686_v3  ;;  %v2211_v1 = vmul.f32 0.0625, %v1873_v50  ;;  %v2478_v37 = vld [vmem:[%s6789_s4 + $0x708] sm:$0xff]  ;;  %3562 = vmatpush.msrb.mxu0 %v2448_v62 }
 0x2ee   : > { %v2502_v50 = vld [vmem:[%s6789_s4 + $0x7c8] sm:$0xff] }
 0x2ef   : > { %v6442_v60 = vsel %vm2799_vm8, %v3278_v45, %v3277_v53  ;;  %v3212_v61 = vperm.slane %v2211_v1, %v4644_v42  ;;  %v2503_v53 = vld [vmem:[%s6789_s4 + $0x7d0] sm:$0xff]  ;;  %v2473_v45 = vld [vmem:[%s6789_s4 + $0x6e0] sm:$0xff] }
 0x2f0   : > { %v2477_v1 = vld [vmem:[%s6789_s4 + $0x700] sm:$0xff]  ;;  %3573 = vmatpush.msrb.mxu1 %v2473_v45 }
 0x2f1   : > { %v3213_v63 = vsel %vm2791_vm6, %v3212_v61, %v3211_v29  ;;  %v2505_v29 = vld [vmem:[%s6789_s4 + $0x7e0] sm:$0xff] }
 0x2f2   : > { %v6455_v7 = vpop.xlane.xlu2 %1935  ;;  %3613 = vmatpush.msrb.mxu3 %v2505_v29  ;;  %v2493_v29 = vld [vmem:[%s6789_s4 + $0x780] sm:$0xff] }
 0x2f3   : > { %v1876_v42 = vpop.xlane.xlu1 %1875 }
 0x2f4   : > { %v2212_v6 = vmul.f32 0.0625, %v1876_v42  ;;  %v6457_v9 = vpop.xlane.xlu0 %1833  ;;  %3614 = vmatpush.msrb.mxu3 %v2504_v44 }
 0x2f5   : > { %v2198_v45 = vmul.f32 0.0625, %v6457_v9 }
 0x2f6   : > { %v3214_v15 = vperm.slane %v2212_v6, %v4662_v54  ;;  %v2485_v54 = vld [vmem:[%s6789_s4 + $0x740] sm:$0xff]  ;;  %3615 = vmatpush.msrb.mxu3 %v2503_v53  ;;  %v2447_v6 = vld [vmem:[%s6789_s4 + $0x610] sm:$0xff]  ;;  %v2232_v53 = vmul.f32 0.0625, %v6455_v7 }
 0x2f7   : > { %3597 = vmatpush.msrb.mxu2 %v2485_v54  ;;  %3563 = vmatpush.msrb.mxu0 %v2447_v6  ;;  %v2469_v54 = vld [vmem:[%s6789_s4 + $0x6c0] sm:$0xff] }
 0x2f8   : > { %v6473_v2 = vsel %vm2795_vm7, %v3214_v15, %v3213_v63  ;;  %3616 = vmatpush.msrb.mxu3 %v2502_v50  ;;  %v2472_v63 = vld [vmem:[%s6789_s4 + $0x6d8] sm:$0xff]  ;;  %v2446_v15 = vld [vmem:[%s6789_s4 + $0x608] sm:$0xff]  ;;  %v3251_v50 = vperm.slane %v2231_v48, %v4716_v26  ;;  %v3253_v7 = vperm.slane %v2232_v53, %v4737_v38 }
 0x2f9   : > { %3598 = vmatpush.msrb.mxu2 %v2484_v22  ;;  %3574 = vmatpush.msrb.mxu1 %v2472_v63  ;;  %v2468_v22 = vld [vmem:[%s6789_s4 + $0x6b8] sm:$0xff] }
 0x2fa   : > { %v6490_v23 = vpop.xlane.xlu2 %1878  ;;  %3617 = vmatpush.msrb.mxu3 %v2501_v59  ;;  %3564 = vmatpush.msrb.mxu0 %v2446_v15 }
 0x2fb   : > { %v6492_v27 = vpop.xlane.xlu1 %1836  ;;  %3599 = vmatpush.msrb.mxu2 %v2483_v30  ;;  %3575 = vmatpush.msrb.mxu1 %v2471_v10 }
 0x2fc   : > { %v6494_v8 = vpop.xlane.xlu0 %1977  ;;  %3618 = vmatpush.msrb.mxu3 %v2500_v0  ;;  %3565 = vmatpush.msrb.mxu0 %v2445_v18 }
 0x2fd   : > { %3600 = vmatpush.msrb.mxu2 %v2482_v36  ;;  %3576 = vmatpush.msrb.mxu1 %v2470_v16  ;;  %v2495_v36 = vld [vmem:[%s6789_s4 + $0x790] sm:$0xff] }
 0x2fe   : > { %3619 = vmatpush.msrb.mxu3 %v2499_v11 }
 0x2ff   : > { %3601 = vmatpush.msrb.mxu2 %v2481_v40  ;;  %3577 = vmatpush.msrb.mxu1 %v2469_v54  ;;  %v2465_v40 = vld [vmem:[%s6789_s4 + $0x6a0] sm:$0xff] }
 0x300   : > { %3620 = vmatpush.msrb.mxu3 %v2498_v17 }
 0x301   : > { %3602 = vmatpush.msrb.mxu2 %v2480_v43  ;;  %3578 = vmatpush.msrb.mxu1 %v2468_v22  ;;  %v2230_v43 = vmul.f32 0.0625, %v6421_v35 }
 0x302   : > { %v6532_v33 = vpop.xlane.xlu2 %1839  ;;  %3621 = vmatpush.msrb.mxu3 %v2497_v19 }
 0x303   : > { %v6537_v46 = vpop.xlane.xlu1 %1980  ;;  %3603 = vmatpush.msrb.mxu2 %v2479_v55  ;;  %3579 = vmatpush.msrb.mxu1 %v2467_v32  ;;  %v2463_v55 = vld [vmem:[%s6789_s4 + $0x690] sm:$0xff]  ;;  %v3249_v35 = vperm.slane %v2230_v43, %v4696_v14  ;;  %v2200_v63 = vmul.f32 0.0625, %v6532_v33 }
 0x304   : > { %v6539_v47 = vpop.xlane.xlu0 %1938  ;;  %3622 = vmatpush.msrb.mxu3 %v2496_v24  ;;  %v2247_v43 = vmul.f32 0.0625, %v6537_v46 }
 0x305   : > { %3604 = vmatpush.msrb.mxu2 %v2478_v37  ;;  %3580 = vmatpush.msrb.mxu1 %v2466_v39  ;;  %v2233_v12 = vmul.f32 0.0625, %v6539_v47  ;;  %v2199_v47 = vmul.f32 0.0625, %v6492_v27  ;;  %v3250_v62 = vsel %vm2803_vm9, %v3249_v35, %v6409_v25  ;;  %v3187_v27 = vperm.slane %v2198_v45, %v4696_v14 }
 0x306   : > { %3623 = vmatpush.msrb.mxu3 %v2495_v36  ;;  %v3252_v6 = vsel %vm2807_vm10, %v3251_v50, %v3250_v62  ;;  %v3191_v54 = vperm.slane %v2200_v63, %v4737_v38  ;;  %v3282_v50 = vperm.slane %v2247_v43, %v4716_v26 }
 0x307   : > { %3605 = vmatpush.msrb.mxu2 %v2477_v1  ;;  %3581 = vmatpush.msrb.mxu1 %v2465_v40  ;;  %v3255_v1 = vperm.slane %v2233_v12, %v4755_v52  ;;  %v3254_v15 = vsel %vm2811_vm11, %v3253_v7, %v3252_v6  ;;  %v3189_v18 = vperm.slane %v2199_v47, %v4716_v26 }
 0x308   : > { %3624 = vmatpush.msrb.mxu3 %v2494_v21  ;;  %v2246_v21 = vmul.f32 0.0625, %v6494_v8 }
 0x309   : > { %3582 = vmatpush.msrb.mxu1 %v2464_v34  ;;  %v3256_v25 = vsel %vm2815_vm12, %v3255_v1, %v3254_v15 }
 0x30a   : > { %v6577_v61 = vpop.xlane.xlu2 %1983  ;;  %3625 = vmatpush.msrb.mxu3 %v2493_v29  ;;  %v3280_v35 = vperm.slane %v2246_v21, %v4696_v14 }
 0x30b   : > { %v1942_v4 = vpop.xlane.xlu1 %1941  ;;  %3583 = vmatpush.msrb.mxu1 %v2463_v55 }
 0x30c   : > { %v6588_v42 = vpop.xlane.xlu0 %1881  ;;  %v2234_v37 = vmul.f32 0.0625, %v1942_v4  ;;  %v3281_v47 = vsel %vm2803_vm9, %v3280_v35, %v6442_v60 }
 0x30d   : > { %3584 = vmatpush.msrb.mxu1 %v2462_v5  ;;  %v2214_v45 = vmul.f32 0.0625, %v6588_v42  ;;  %v3283_v62 = vsel %vm2807_vm10, %v3282_v50, %v3281_v47 }
 0x30e   : > { %v3257_v0 = vperm.slane %v2234_v37, %v4765_v58 }
 0x30f   : > { %3585 = vmatpush.msrb.mxu1 %v2461_v56  ;;  %v3218_v60 = vperm.slane %v2214_v45, %v4696_v14 }
 0x310   : > { %v3258_v19 = vsel %vm2819_vm13, %v3257_v0, %v3256_v25 }
 0x312   : > { %v1945_v28 = vpop.xlane.xlu2 %1944 }
 0x313   : > { %v6623_v30 = vpop.xlane.xlu1 %1884  ;;  %v2235_v57 = vmul.f32 0.0625, %v1945_v28 }
 0x314   : > { %v1843_v20 = vpop.xlane.xlu0 %1842  ;;  %v2215_v1 = vmul.f32 0.0625, %v6623_v30 }
 0x315   : > { %v3259_v10 = vperm.slane %v2235_v57, %v4789_v13  ;;  %v2201_v11 = vmul.f32 0.0625, %v1843_v20  ;;  %v3188_v20 = vsel %vm2803_vm9, %v3187_v27, %v6426_v51  ;;  %v2248_v51 = vmul.f32 0.0625, %v6577_v61 }
 0x316   : > { %v3190_v39 = vsel %vm2807_vm10, %v3189_v18, %v3188_v20  ;;  %v2213_v61 = vmul.f32 0.0625, %v6490_v23  ;;  %v3220_v27 = vperm.slane %v2215_v1, %v4716_v26 }
 0x317   : > { %v3193_v24 = vperm.slane %v2201_v11, %v4755_v52  ;;  %v3260_v28 = vsel %vm2823_vm14, %v3259_v10, %v3258_v19  ;;  %v3192_v34 = vsel %vm2811_vm11, %v3191_v54, %v3190_v39  ;;  %v3284_v7 = vperm.slane %v2248_v51, %v4737_v38 }
 0x319   : > { %v3194_v55 = vsel %vm2815_vm12, %v3193_v24, %v3192_v34  ;;  %v3285_v42 = vsel %vm2811_vm11, %v3284_v7, %v3283_v62 }
 0x31a   : > { %v6646_v41 = vpop.xlane.xlu2 %1887 }
 0x31b   : > { %v1846_v44 = vpop.xlane.xlu1 %1845  ;;  %v2216_v63 = vmul.f32 0.0625, %v6646_v41 }
 0x31c   : > { %v1987_v49 = vpop.xlane.xlu0 %1986  ;;  %v2202_v16 = vmul.f32 0.0625, %v1846_v44 }
 0x31d   : > { %v2249_v5 = vmul.f32 0.0625, %v1987_v49 }
 0x31e   : > { %v3195_v32 = vperm.slane %v2202_v16, %v4765_v58 }
 0x31f   : > { %v3286_v49 = vperm.slane %v2249_v5, %v4755_v52 }
 0x320   : > { %v3196_v12 = vsel %vm2819_vm13, %v3195_v32, %v3194_v55 }
 0x321   : > { %v3287_v30 = vsel %vm2815_vm12, %v3286_v49, %v3285_v42 }
 0x322   : > { %v1849_v59 = vpop.xlane.xlu2 %1848 }
 0x323   : > { %v1990_v4 = vpop.xlane.xlu1 %1989  ;;  %v2203_v33 = vmul.f32 0.0625, %v1849_v59 }
 0x324   : > { %v1948_v9 = vpop.xlane.xlu0 %1947  ;;  %v2250_v37 = vmul.f32 0.0625, %v1990_v4  ;;  %v3216_v4 = vperm.slane %v2213_v61, %v4686_v3 }
 0x325   : > { %v2236_v17 = vmul.f32 0.0625, %v1948_v9  ;;  %v3197_v40 = vperm.slane %v2203_v33, %v4789_v13 }
 0x326   : > { %v3288_v59 = vperm.slane %v2250_v37, %v4765_v58  ;;  %v3217_v18 = vsel %vm2799_vm8, %v3216_v4, %v6473_v2 }
 0x327   : > { %v3261_v22 = vperm.slane %v2236_v17, %v4815_v31  ;;  %v3198_v56 = vsel %vm2823_vm14, %v3197_v40, %v3196_v12  ;;  %v3222_v17 = vperm.slane %v2216_v63, %v4737_v38  ;;  %v3219_v54 = vsel %vm2803_vm9, %v3218_v60, %v3217_v18 }
 0x328   : > { %v3289_v41 = vsel %vm2819_vm13, %v3288_v59, %v3287_v30  ;;  %v3221_v19 = vsel %vm2807_vm10, %v3220_v27, %v3219_v54 }
 0x329   : > { %v3262_v36 = vsel %vm2827_vm15, %v3261_v22, %v3260_v28  ;;  %v3223_v38 = vsel %vm2811_vm11, %v3222_v17, %v3221_v19 }
 0x32a   : > { %3606 = vmatmul.f32.vlgmr.msrb.gmra.mxu2 %v3262_v36  ;;  %v1852_v29 = vpop.xlane.xlu2 %1851 }
 0x32b   : > { %v2204_v44 = vmul.f32 0.0625, %v1852_v29  ;;  %v1993_v48 = vpop.xlane.xlu1 %1992 }
 0x32c   : > { %v1891_v53 = vpop.xlane.xlu0 %1890  ;;  %v2251_v46 = vmul.f32 0.0625, %v1993_v48 }
 0x32d   : > { %v3199_v8 = vperm.slane %v2204_v44, %v4815_v31  ;;  %v2217_v6 = vmul.f32 0.0625, %v1891_v53 }
 0x32e   : > { %v3290_v23 = vperm.slane %v2251_v46, %v4789_v13 }
 0x32f   : > { %v3200_v57 = vsel %vm2827_vm15, %v3199_v8, %v3198_v56  ;;  %v3224_v25 = vperm.slane %v2217_v6, %v4755_v52 }
 0x330   : > { %3566 = vmatmul.f32.vlgmr.msrb.gmra.mxu0 %v3200_v57  ;;  %v3291_v3 = vsel %vm2823_vm14, %v3290_v23, %v3289_v41 }
 0x331   : > { %v3225_v22 = vsel %vm2815_vm12, %v3224_v25, %v3223_v38 }
 0x332   : > { %v1897_v15 = vpop.xlane.xlu2 %1896 }
 0x333   : > { %v1996_v0 = vpop.xlane.xlu1 %1995  ;;  %v2219_v14 = vmul.f32 0.0625, %v1897_v15 }
 0x334   : > { %v2252_v10 = vmul.f32 0.0625, %v1996_v0  ;;  %v1894_v11 = vpop.xlane.xlu0 %1893 }
 0x335   : > { %v2218_v9 = vmul.f32 0.0625, %v1894_v11  ;;  %v3228_v2 = vperm.slane %v2219_v14, %v4789_v13 }
 0x336   : > { %v3292_v16 = vperm.slane %v2252_v10, %v4815_v31 }
 0x337   : > { %v3226_v26 = vperm.slane %v2218_v9, %v4765_v58 }
 0x338   : > { %v3293_v33 = vsel %vm2827_vm15, %v3292_v16, %v3291_v3 }
 0x339   : > { %3626 = vmatmul.f32.vlgmr.msrb.gmra.mxu3 %v3293_v33  ;;  %v3227_v24 = vsel %vm2819_vm13, %v3226_v26, %v3225_v22 }
 0x33a   : > { %v3229_v32 = vsel %vm2823_vm14, %v3228_v2, %v3227_v24 }
 0x33c   : > { %v1900_v52 = vpop.xlane.xlu0 %1899 }
 0x33d   : > { %v2220_v28 = vmul.f32 0.0625, %v1900_v52 }
 0x33f   : > { %v3230_v20 = vperm.slane %v2220_v28, %v4815_v31 }
 0x341   : > { %v3231_v58 = vsel %vm2827_vm15, %v3230_v20, %v3229_v32 }
 0x342   : > { %3586 = vmatmul.f32.vlgmr.msrb.gmra.mxu1 %v3231_v58 }
 0x343   : > { %3859 = shalt.err (!%p3856_p3)
}
 0x344   : > { %s3928_s22 = smov 128   ;;  %s3929_s29 = smov 8   ;;  %v2509_v13 = vld [vmem:[%s6790_s5] sm:$0x1]  ;;  %v3327_v31 = vpop.f32.mrf.mxu0  ;;  %v3347_v36 = vpop.f32.mrf.mxu1  ;;  %vm3631_vm0 = vcmask 253952  }
 0x345   : > { %3785 = dma.vmem_to_hbm [thread:$0]  (%p4008_p5), %s3651_s21, 256, %s3653_s9, %s3634_s13, %s3928_s22, %s3928_s22, %s3929_s29   ;;  %v3328_v39 = vadd.f32 %v3327_v31, %v2509_v13  ;;  %v3367_v21 = vpop.f32.mrf.mxu2  ;;  %v3387_v29 = vpop.f32.mrf.mxu3 }
 0x346   : > { %s3664_s9 = scalar_lea.hbm %s6792_s7, %s3991_s28  ;;  %s296_s13 = scalar_lea.vmem [#allocation4], %s5716_s15 }
 0x347   : > { %v3348_v40 = vadd.f32 %v3347_v36, %v3328_v39  ;;  %s3666_s14 = sshll.u32 %s296_s13, 4  ;;  %s3668_s17 = sshll.u32 %s3664_s9, 4  ;;  %s3667_s14 = int_to_ptr.vmem [resolvable:$true] %s3666_s14  ;;  %s3669_s17 = int_to_ptr.hbm [resolvable:$true] %s3668_s17 }
 0x348   : > { %s3639_s18 = scalar_lea.sflag [#allocation5], %s5716_s15  ;;  %s3874_s19 = sshra.s32 %s3669_s17, 4  ;;  %s3875_s19 = int_to_ptr.hbm [resolvable:$true] %s3874_s19 }
 0x349   : > { %v3368_v34 = vadd.f32 %v3367_v21, %v3348_v40  ;;  %s3876_s20 = scalar_lea.hbm %s3875_s19, 1  ;;  %s3880_s22 = scalar_lea.hbm %s6792_s7, 2 }
 0x34a   : > { %p3877_p4 = scmp.ne.s32.totalorder %s3875_s19, %s3876_s20  ;;  %p3881_p9 = scmp.lt.s32.totalorder %s3875_s19, %s6792_s7 }
 0x34b   : > { %v3388_v44 = vadd.f32 %v3387_v29, %v3368_v34  ;;  %p3882_p10 = scmp.lt.s32.totalorder %s3880_s22, %s3876_s20 }
 0x34c   : > { %v3407_v43 = vpop.f32.mrf.mxu0  ;;  %v3427_v48 = vpop.f32.mrf.mxu1  ;;  %p3878_p7 = pnand %p3877_p4, %p4008_p5 }
 0x34d   : > { %v3408_v51 = vadd.f32 %v3407_v43, %v3388_v44  ;;  %v3447_v55 = vpop.f32.mrf.mxu2  ;;  %v3467_v12 = vpop.f32.mrf.mxu3  ;;  %p3883_p11 = por %p3882_p10, %p3881_p9 }
 0x34e   : > { %p3879_p8 = pneg %p3878_p7 }
 0x34f   : > { %v3428_v53 = vadd.f32 %v3427_v48, %v3408_v51 }
 0x350   : > { %p3884_p12 = pnand %p3883_p11, %p3879_p8 }
 0x351   : > { %v3448_v5 = vadd.f32 %v3447_v55, %v3428_v53 }
 0x353   : > { %v3468_v35 = vadd.f32 %v3467_v12, %v3448_v5 }
 0x354   : > { %v3487_v8 = vpop.f32.mrf.mxu0  ;;  %v3507_v37 = vpop.f32.mrf.mxu1 }
 0x355   : > { %v3488_v56 = vadd.f32 %v3487_v8, %v3468_v35  ;;  %v3527_v50 = vpop.f32.mrf.mxu2 }
 0x357   : > { %v3508_v46 = vadd.f32 %v3507_v37, %v3488_v56 }
 0x359   : > { %v3528_v61 = vadd.f32 %v3527_v50, %v3508_v46 }
 0x365   : > { %v3547_v57 = vpop.f32.mrf.mxu3 }
 0x366   : > { %v3548_v45 = vadd.f32 %v3547_v57, %v3528_v61 }
 0x3ad   : > { %v3567_v7 = vpop.f32.mrf.mxu0  ;;  %v3607_v59 = vpop.f32.mrf.mxu2 }
 0x3ae   : > { %v3568_v49 = vadd.f32 %v3567_v7, %v3548_v45 }
 0x3bc   : > { %v3627_v63 = vpop.f32.mrf.mxu3 }
 0x3bf   : > { %v3587_v47 = vpop.f32.mrf.mxu1 }
 0x3c0   : > { %v3588_v1 = vadd.f32 %v3587_v47, %v3568_v49 }
 0x3c2   : > { %v3608_v62 = vadd.f32 %v3607_v59, %v3588_v1 }
 0x3c4   : > { %v3628_v23 = vadd.f32 %v3627_v63, %v3608_v62 }
 0x3c6   : > { %v3630_v0 = vmax.f32 %v3628_v23, 0.0 }
 0x3c8   : > { %3632 = vst.msk [vmem:[%s296_s13] sm:$0x1] %vm3631_vm0, %v3630_v0 }
 0x3c9   : > { %3887 = shalt.err (!%p3884_p12)
}
 0x3ca   : > { %3786 = dma.vmem_to_hbm [thread:$0]  (%p4008_p5), %s3667_s14, 16, %s3669_s17, %s3639_s18  }
 0x3cb PF: > { %p3796_p13 = scmp.ge.s32.totalorder %s3926_s27, 2  ;;  %s3680_s15 = sand.u32 1, %s3914_s24  }
 0x3cc   : > { %s3681_s8 = scalar_lea.sflag [#allocation3], %s3680_s15 }
 0x3cd   : > { %p3790_p0 = pnand %p3796_p13, %p4012_p6 }
 0x3cf   : > { %p3791_p1 = pneg %p3790_p0 }
 0x3d1   : > { %3905 = dma.done.wait (%p3791_p1), %s3681_s8, 256  }
 0x3d2   : > { %3907 = vsyncadd (%p3791_p1), %s3681_s8, 4294967040  ;;  %s3691_s0 = scalar_lea.sflag [#allocation5], %s3680_s15 }
 0x3d3   : > { %3909 = dma.done.wait (%p3791_p1), %s3691_s0, 16  }
 0x3d4   : > { %3911 = vsyncadd (%p3791_p1), %s3691_s0, 4294967280  ;;  %p21_p5 = scmp.ge.s32.totalorder %s3995_s30, 4   ;;  %s6801_s24 = smov %s3918_s25 }
 0x3d5   : > { %s6802_s25 = smov %s3922_s26  ;;  %s6803_s26 = smov %s4006_s10 }
 0x3d6   : > { %s6804_s27 = smov %s3995_s30  ;;  %23 = sbr.rel (!%p21_p5) target bundleno = 7 (0x7), region = 99 }
 0x3db   :  { %3696 = vsyncpa [#allocation3], 1 }
 0x3dc   :  { %3698 = vsyncpa [#allocation3 + $0x1], 1 }
 0x3dd   :  { %3699 = vsyncpa [#allocation5], 1 }
 0x3de   :  { %3701 = vsyncpa [#allocation5 + $0x1], 1 }

</bundles_post_ra>
